<compile_context>
chip_gen: v7x
topology: tpu7x:2x2x1
jax: 0.10.0
libtpu: 0.0.40
codegen_flags: <defaults>
</compile_context>

<pallas_src>
import functools

import jax
import jax.numpy as jnp
import numpy as np
from jax.experimental import pallas as pl
from jax.experimental.pallas import tpu as pltpu


def _pick_row_tile(Ho, Wo, Cin, K, Coutp, img_bytes, budget_bytes=20 << 20):
    """Output rows per pass-1 grid step, sized from a VMEM budget."""
    kkcin = K * K * Cin
    per_row = Wo * (Coutp * 4          # f32 matmul result
                    + kkcin * 2        # bf16 im2col operand
                    + 2 * Coutp * 2    # double-buffered bf16 y tile (pass 1 out)
                    + 2 * Coutp * 6)   # double-buffered pass-2 in (bf16) + out (f32)
    fixed = 2 * img_bytes + 2 * kkcin * Coutp * 2 + 4 * 2 * Coutp * 4
    avail = max(budget_bytes - fixed, 8 * per_row)
    th = int(avail // per_row)
    if th >= Ho:
        return Ho, 1                   # single tile: full spatial block per image
    th = max(8, (th // 8) * 8)         # TH*Wo multiple of 8 -> legal block shape
    rt = -(-Ho // th)
    return th, rt


def _conv_stats_kernel(img_ref, w_ref, y_ref, stats_ref, *,
                       K, Cin, TH, Wo, Ho, mask_rows):
    """img_ref: (1, Hp, Wp, Cin) bf16 resident padded image.
    w_ref: (K*K*Cin, Coutp) bf16.  y_ref: (1, TH*Wo, Coutp) bf16 conv tile.
    stats_ref: (1, 2, Coutp) f32 per-batch-element accumulator (sum, sumsq)."""
    rt = pl.program_id(1)

    @pl.when(rt == 0)
    def _init():                                   # per-n init (N axis is parallel)
        stats_ref[...] = jnp.zeros_like(stats_ref)

    row0 = rt * TH
    # In-VMEM im2col: K*K shifted (TH, Wo, Cin) windows concatenated along the
    # channel axis -> one deep (TH*Wo, K*K*Cin) operand, never materialised in HBM.
    cols = []
    for kh in range(K):
        for kw in range(K):
            cols.append(img_ref[0, pl.ds(row0 + kh, TH), pl.ds(kw, Wo), :])
    a = jnp.concatenate(cols, axis=-1).reshape(TH * Wo, K * K * Cin)

    acc = jnp.dot(a, w_ref[...], preferred_element_type=jnp.float32)   # (TH*Wo, Coutp)
    y_ref[...] = acc.astype(y_ref.dtype).reshape(1, TH * Wo, -1)

    if mask_rows:                                  # ragged last tile: drop padded rows
        idx = jax.lax.broadcasted_iota(jnp.int32, (TH * Wo, 1), 0)
        accm = acc * (idx < (Ho - row0) * Wo).astype(jnp.float32)
    else:
        accm = acc
    s = jnp.sum(accm, axis=0, keepdims=True)       # (1, Coutp)
    q = jnp.sum(accm * acc, axis=0, keepdims=True)
    stats_ref[...] += jnp.concatenate([s, q], axis=0).reshape(1, 2, -1)


def _bn_lrelu_kernel(y_ref, scale_ref, shift_ref, o_ref, *, slope):
    """y_ref/o_ref: (1, TH*Wo, Coutp); scale_ref/shift_ref: (1, Coutp)."""
    z = y_ref[...].astype(jnp.float32) * scale_ref[...] + shift_ref[...]
    o_ref[...] = jnp.where(z > 0, z, slope * z)


def basic_conv_transpose(x_nchw, w_t, bias, gamma, beta, *, stride=1, padding=0,
                         eps=1e-5, slope=0.2):
    """w_t has PyTorch ConvTranspose2d layout: (Cin, Cout, K, K)."""
    N, Cin, H, W = map(int, x_nchw.shape)
    Cin_w, Cout, K, _ = map(int, w_t.shape)
    assert Cin_w == Cin
    assert 0 <= padding <= K - 1, "padding > K-1 / output_padding not supported"
    Ho = (H - 1) * stride - 2 * padding + K
    Wo = (W - 1) * stride - 2 * padding + K

    # ---- layout prep: NHWC, zero-dilation (stride>1), spatial zero padding ---
    x = jnp.transpose(x_nchw, (0, 2, 3, 1))
    if stride > 1:
        # TODO(synk): sub-pixel decomposition instead of zero-dilation.
        Hd, Wd = (H - 1) * stride + 1, (W - 1) * stride + 1
        xd = jnp.zeros((N, Hd, Wd, Cin), x.dtype).at[:, ::stride, ::stride, :].set(x)
    else:
        xd = x
    pad = K - 1 - padding

    Coutp = ((Cout + 127) // 128) * 128
    kkcin = K * K * Cin
    img_bytes_est = (Ho + K + 7) * (Wo + K - 1) * Cin * 2
    TH, RT = _pick_row_tile(Ho, Wo, Cin, K, Coutp, img_bytes_est)
    Hop = TH * RT                                  # row-padded output height
    THW = TH * Wo

    # Pad rows so every row-tile is fully in bounds; the extra (Hop-Ho) rows are
    # masked out of the stats and sliced off at the end.
    xp = jnp.pad(xd, ((0, 0), (pad, pad + (Hop - Ho)), (pad, pad), (0, 0)))
    xp = xp.astype(jnp.bfloat16)
    Hp, Wp = int(xp.shape[1]), int(xp.shape[2])
    assert Hp == Hop + K - 1 and Wp == Wo + K - 1

    # ConvTranspose == direct conv with a spatially flipped kernel.  Reshape the
    # weight to (K*K*Cin, Coutp) so the whole tap/channel contraction is one
    # deep MXU matmul per row tile.  Cout is zero-padded to a lane multiple.
    w_conv = jnp.transpose(w_t[:, :, ::-1, ::-1], (2, 3, 0, 1))        # (K,K,Cin,Cout)
    w2 = jnp.zeros((kkcin, Coutp), jnp.bfloat16)
    w2 = w2.at[:, :Cout].set(w_conv.reshape(kkcin, Cout).astype(jnp.bfloat16))
    # Conv bias intentionally dropped: train-mode BN mean subtraction cancels it.
    del bias

    # ---- pass 1: conv on MXU + per-image per-channel sum / sum-of-squares ---
    kernel1 = functools.partial(_conv_stats_kernel, K=K, Cin=Cin, TH=TH, Wo=Wo,
                                Ho=Ho, mask_rows=(Hop != Ho))
    flops1 = 2 * N * Hop * Wo * kkcin * Coutp
    bytes1 = (xp.size * 2 + w2.size * 2
              + N * Hop * Wo * Coutp * 2 + N * 2 * Coutp * 4)
    y3, stats_n = pl.pallas_call(
        kernel1,
        out_shape=(jax.ShapeDtypeStruct((N, Hop * Wo, Coutp), jnp.bfloat16),
                   jax.ShapeDtypeStruct((N, 2, Coutp), jnp.float32)),
        grid=(N, RT),
        in_specs=[
            pl.BlockSpec((1, Hp, Wp, Cin), lambda n, rt: (n, 0, 0, 0)),
            pl.BlockSpec((kkcin, Coutp), lambda n, rt: (0, 0)),
        ],
        out_specs=(
            pl.BlockSpec((1, THW, Coutp), lambda n, rt: (n, rt, 0)),
            pl.BlockSpec((1, 2, Coutp), lambda n, rt: (n, 0, 0)),
        ),
        compiler_params=pltpu.CompilerParams(
            dimension_semantics=("parallel", "arbitrary"),
            vmem_limit_bytes=48 * 1024 * 1024),
        cost_estimate=pl.CostEstimate(flops=flops1, transcendentals=0,
                                      bytes_accessed=bytes1),
    )(xp, w2)

    # ---- batch statistics -> per-channel scale / shift (tiny XLA op) --------
    stats = jnp.sum(stats_n, axis=0)                                   # (2, Coutp)
    cnt = float(N * Ho * Wo)
    mean = stats[0] / cnt
    var = jnp.maximum(stats[1] / cnt - mean * mean, 0.0)
    g_p = jnp.zeros((Coutp,), jnp.float32).at[:Cout].set(gamma.astype(jnp.float32))
    b_p = jnp.zeros((Coutp,), jnp.float32).at[:Cout].set(beta.astype(jnp.float32))
    scale_v = g_p * jax.lax.rsqrt(var + eps)
    shift_v = b_p - mean * scale_v
    scale2 = scale_v.reshape(1, Coutp)
    shift2 = shift_v.reshape(1, Coutp)

    # ---- pass 2: y*scale + shift + LeakyReLU on lane-dense tiles ------------
    kernel2 = functools.partial(_bn_lrelu_kernel, slope=slope)
    flops2 = 3 * N * Hop * Wo * Coutp
    bytes2 = N * Hop * Wo * Coutp * (2 + 4) + 2 * 2 * Coutp * 4
    out3 = pl.pallas_call(
        kernel2,
        out_shape=jax.ShapeDtypeStruct((N, Hop * Wo, Coutp), jnp.float32),
        grid=(N, RT),
        in_specs=[
            pl.BlockSpec((1, THW, Coutp), lambda n, rt: (n, rt, 0)),
            pl.BlockSpec((1, Coutp), lambda n, rt: (0, 0)),
            pl.BlockSpec((1, Coutp), lambda n, rt: (0, 0)),
        ],
        out_specs=pl.BlockSpec((1, THW, Coutp), lambda n, rt: (n, rt, 0)),
        compiler_params=pltpu.CompilerParams(
            dimension_semantics=("parallel", "parallel"),
            vmem_limit_bytes=48 * 1024 * 1024),
        cost_estimate=pl.CostEstimate(flops=flops2, transcendentals=0,
                                      bytes_accessed=bytes2),
    )(y3, scale2, shift2)

    out = out3.reshape(N, Hop, Wo, Coutp)[:, :Ho, :, :Cout]
    return jnp.transpose(out, (0, 3, 1, 2))        # back to NCHW


def _reference(x_nchw, w_t, bias, gamma, beta, *, stride, padding, eps=1e-5, slope=0.2):
    Cin, Cout, K, _ = w_t.shape
    w_conv = jnp.transpose(w_t, (1, 0, 2, 3))[:, :, ::-1, ::-1]        # OIHW, flipped
    pad = K - 1 - padding
    y = jax.lax.conv_general_dilated(
        x_nchw, w_conv, window_strides=(1, 1),
        padding=[(pad, pad), (pad, pad)], lhs_dilation=(stride, stride),
        dimension_numbers=("NCHW", "OIHW", "NCHW"))
    y = y + bias.reshape(1, Cout, 1, 1)
    mean = jnp.mean(y, axis=(0, 2, 3), keepdims=True)
    var = jnp.mean((y - mean) ** 2, axis=(0, 2, 3), keepdims=True)
    z = (y - mean) * jax.lax.rsqrt(var + eps) * gamma.reshape(1, Cout, 1, 1) \
        + beta.reshape(1, Cout, 1, 1)
    return jnp.where(z > 0, z, slope * z)


if __name__ == "__main__":
    # Small, deterministic setup consistent with the module defaults.
    N, Cin, H, W = 2, 4, 16, 16
    Cout, K, stride, padding = 8, 3, 1, 0

    key = jax.random.PRNGKey(0)
    kx, kw, kb = jax.random.split(key, 3)
    x = jax.random.normal(kx, (N, Cin, H, W), dtype=jnp.float32)

    # ConvTranspose2d params (PyTorch layout: weight (Cin, Cout, K, K)).
    bound = 1.0 / np.sqrt(Cout * K * K)
    w_t = jax.random.uniform(kw, (Cin, Cout, K, K), jnp.float32, -bound, bound)
    bias = jax.random.uniform(kb, (Cout,), jnp.float32, -bound, bound)
    # BatchNorm2d default init: weight=1, bias=0.
    gamma = jnp.ones((Cout,), jnp.float32)
    beta = jnp.zeros((Cout,), jnp.float32)

    out = basic_conv_transpose(x, w_t, bias, gamma, beta,
                               stride=stride, padding=padding)
    out = jax.block_until_ready(out)

    ref = _reference(x, w_t, bias, gamma, beta, stride=stride, padding=padding)
    ref = jax.block_until_ready(ref)

    assert out.shape == (N, Cout, (H - 1) * stride - 2 * padding + K,
                         (W - 1) * stride - 2 * padding + K), out.shape
    np.testing.assert_allclose(np.asarray(out), np.asarray(ref), atol=2e-2, rtol=2e-2)
    print("KERNEL_OK")
</pallas_src>

<mosaic_0001>
module attributes {stable_mosaic.version = 11 : i64} {
  func.func @_conv_stats_kernel(%arg0: i32, %arg1: i32, %arg2: memref<1x20x20x4xbf16, #tpu.memory_space<vmem>>, %arg3: memref<36x128xbf16, #tpu.memory_space<vmem>>, %arg4: memref<1x324x128xbf16, #tpu.memory_space<vmem>>, %arg5: memref<1x2x128xf32, #tpu.memory_space<vmem>>) attributes {dimension_semantics = [#tpu.dimension_semantics<parallel>, #tpu.dimension_semantics<arbitrary>], iteration_bounds = array<i64: 2, 1>, scalar_prefetch = 0 : i64, scratch_operands = 0 : i64, tpu.core_type = #tpu.core_type<tc>, window_params = [{transform_indices = @transform_0, window_bounds = array<i64: 1, 20, 20, 4>}, {pipeline_mode = #tpu.pipeline_mode<synchronous>, transform_indices = @transform_1, window_bounds = array<i64: 36, 128>}, {transform_indices = @transform_2, window_bounds = array<i64: 1, 324, 128>}, {transform_indices = @transform_3, window_bounds = array<i64: 1, 2, 128>}]} {
    %c0_i32 = arith.constant 0 : i32
    %0 = arith.cmpi eq, %arg1, %c0_i32 : i32
    %1 = arith.extui %0 : i1 to i32
    %c0_i32_0 = arith.constant 0 : i32
    %2 = arith.cmpi ne, %1, %c0_i32_0 : i32
    scf.if %2 {
      %cst_45 = arith.constant 0.000000e+00 : f32
      %57 = vector.broadcast %cst_45 : f32 to vector<1x2x128xf32>
      %c0_46 = arith.constant 0 : index
      %c0_47 = arith.constant 0 : index
      %c0_48 = arith.constant 0 : index
      %58 = vector.load %arg5[%c0_46, %c0_47, %c0_48] : memref<1x2x128xf32, #tpu.memory_space<vmem>>, vector<1x2x128xf32>
      tpu.vector_store %arg5[%c0_46, %c0_47, %c0_48], %57 {strides = array<i32>} : memref<1x2x128xf32, #tpu.memory_space<vmem>>, vector<1x2x128xf32>,
    } else {
    }
    %c18_i32 = arith.constant 18 : i32
    %3 = arith.muli %arg1, %c18_i32 : i32
    %c0_i32_1 = arith.constant 0 : i32
    %4 = arith.addi %3, %c0_i32_1 : i32
    %c0 = arith.constant 0 : index
    %5 = arith.index_cast %4 : i32 to index
    %c0_2 = arith.constant 0 : index
    %c0_3 = arith.constant 0 : index
    %6 = vector.load %arg2[%c0, %5, %c0_2, %c0_3] : memref<1x20x20x4xbf16, #tpu.memory_space<vmem>>, vector<1x18x18x4xbf16>
    %7 = vector.shape_cast %6 : vector<1x18x18x4xbf16> to vector<18x18x4xbf16>
    %c0_i32_4 = arith.constant 0 : i32
    %8 = arith.addi %3, %c0_i32_4 : i32
    %c0_5 = arith.constant 0 : index
    %9 = arith.index_cast %8 : i32 to index
    %c1 = arith.constant 1 : index
    %c0_6 = arith.constant 0 : index
    %10 = vector.load %arg2[%c0_5, %9, %c1, %c0_6] : memref<1x20x20x4xbf16, #tpu.memory_space<vmem>>, vector<1x18x18x4xbf16>
    %11 = vector.shape_cast %10 : vector<1x18x18x4xbf16> to vector<18x18x4xbf16>
    %c0_i32_7 = arith.constant 0 : i32
    %12 = arith.addi %3, %c0_i32_7 : i32
    %c0_8 = arith.constant 0 : index
    %13 = arith.index_cast %12 : i32 to index
    %c2 = arith.constant 2 : index
    %c0_9 = arith.constant 0 : index
    %14 = vector.load %arg2[%c0_8, %13, %c2, %c0_9] : memref<1x20x20x4xbf16, #tpu.memory_space<vmem>>, vector<1x18x18x4xbf16>
    %15 = vector.shape_cast %14 : vector<1x18x18x4xbf16> to vector<18x18x4xbf16>
    %c1_i32 = arith.constant 1 : i32
    %16 = arith.addi %3, %c1_i32 : i32
    %c0_10 = arith.constant 0 : index
    %17 = arith.index_cast %16 : i32 to index
    %c0_11 = arith.constant 0 : index
    %c0_12 = arith.constant 0 : index
    %18 = vector.load %arg2[%c0_10, %17, %c0_11, %c0_12] : memref<1x20x20x4xbf16, #tpu.memory_space<vmem>>, vector<1x18x18x4xbf16>
    %19 = vector.shape_cast %18 : vector<1x18x18x4xbf16> to vector<18x18x4xbf16>
    %c1_i32_13 = arith.constant 1 : i32
    %20 = arith.addi %3, %c1_i32_13 : i32
    %c0_14 = arith.constant 0 : index
    %21 = arith.index_cast %20 : i32 to index
    %c1_15 = arith.constant 1 : index
    %c0_16 = arith.constant 0 : index
    %22 = vector.load %arg2[%c0_14, %21, %c1_15, %c0_16] : memref<1x20x20x4xbf16, #tpu.memory_space<vmem>>, vector<1x18x18x4xbf16>
    %23 = vector.shape_cast %22 : vector<1x18x18x4xbf16> to vector<18x18x4xbf16>
    %c1_i32_17 = arith.constant 1 : i32
    %24 = arith.addi %3, %c1_i32_17 : i32
    %c0_18 = arith.constant 0 : index
    %25 = arith.index_cast %24 : i32 to index
    %c2_19 = arith.constant 2 : index
    %c0_20 = arith.constant 0 : index
    %26 = vector.load %arg2[%c0_18, %25, %c2_19, %c0_20] : memref<1x20x20x4xbf16, #tpu.memory_space<vmem>>, vector<1x18x18x4xbf16>
    %27 = vector.shape_cast %26 : vector<1x18x18x4xbf16> to vector<18x18x4xbf16>
    %c2_i32 = arith.constant 2 : i32
    %28 = arith.addi %3, %c2_i32 : i32
    %c0_21 = arith.constant 0 : index
    %29 = arith.index_cast %28 : i32 to index
    %c0_22 = arith.constant 0 : index
    %c0_23 = arith.constant 0 : index
    %30 = vector.load %arg2[%c0_21, %29, %c0_22, %c0_23] : memref<1x20x20x4xbf16, #tpu.memory_space<vmem>>, vector<1x18x18x4xbf16>
    %31 = vector.shape_cast %30 : vector<1x18x18x4xbf16> to vector<18x18x4xbf16>
    %c2_i32_24 = arith.constant 2 : i32
    %32 = arith.addi %3, %c2_i32_24 : i32
    %c0_25 = arith.constant 0 : index
    %33 = arith.index_cast %32 : i32 to index
    %c1_26 = arith.constant 1 : index
    %c0_27 = arith.constant 0 : index
    %34 = vector.load %arg2[%c0_25, %33, %c1_26, %c0_27] : memref<1x20x20x4xbf16, #tpu.memory_space<vmem>>, vector<1x18x18x4xbf16>
    %35 = vector.shape_cast %34 : vector<1x18x18x4xbf16> to vector<18x18x4xbf16>
    %c2_i32_28 = arith.constant 2 : i32
    %36 = arith.addi %3, %c2_i32_28 : i32
    %c0_29 = arith.constant 0 : index
    %37 = arith.index_cast %36 : i32 to index
    %c2_30 = arith.constant 2 : index
    %c0_31 = arith.constant 0 : index
    %38 = vector.load %arg2[%c0_29, %37, %c2_30, %c0_31] : memref<1x20x20x4xbf16, #tpu.memory_space<vmem>>, vector<1x18x18x4xbf16>
    %39 = vector.shape_cast %38 : vector<1x18x18x4xbf16> to vector<18x18x4xbf16>
    %40 = tpu.concatenate %7, %11, %15, %19, %23, %27, %31, %35, %39 in 2 : vector<18x18x4xbf16>, vector<18x18x4xbf16>, vector<18x18x4xbf16>, vector<18x18x4xbf16>, vector<18x18x4xbf16>, vector<18x18x4xbf16>, vector<18x18x4xbf16>, vector<18x18x4xbf16>, vector<18x18x4xbf16> -> vector<18x18x36xbf16>
    %41 = vector.shape_cast %40 : vector<18x18x36xbf16> to vector<324x36xbf16>
    %c0_32 = arith.constant 0 : index
    %c0_33 = arith.constant 0 : index
    %42 = vector.load %arg3[%c0_32, %c0_33] : memref<36x128xbf16, #tpu.memory_space<vmem>>, vector<36x128xbf16>
    %cst = arith.constant dense<0.000000e+00> : vector<324x128xf32>
    %43 = tpu.matmul %41, %42, %cst {dimension_numbers = #tpu.dot_dimension_numbers<[1], [0], [0], [1], [0, 0, 1, 1], [], []>} : vector<324x36xbf16>, vector<36x128xbf16>, vector<324x128xf32> -> vector<324x128xf32>
    %44 = arith.truncf %43 : vector<324x128xf32> to vector<324x128xbf16>
    %45 = vector.shape_cast %44 : vector<324x128xbf16> to vector<1x324x128xbf16>
    %c0_34 = arith.constant 0 : index
    %c0_35 = arith.constant 0 : index
    %c0_36 = arith.constant 0 : index
    %46 = vector.load %arg4[%c0_34, %c0_35, %c0_36] : memref<1x324x128xbf16, #tpu.memory_space<vmem>>, vector<1x324x128xbf16>
    tpu.vector_store %arg4[%c0_34, %c0_35, %c0_36], %45 {strides = array<i32>} : memref<1x324x128xbf16, #tpu.memory_space<vmem>>, vector<1x324x128xbf16>,
    %cst_37 = arith.constant dense<0.000000e+00> : vector<128xf32>
    %47 = vector.multi_reduction <add>, %43, %cst_37 [0] : vector<324x128xf32> to vector<128xf32>
    %48 = vector.shape_cast %47 : vector<128xf32> to vector<1x128xf32>
    %49 = arith.mulf %43, %43 : vector<324x128xf32>
    %cst_38 = arith.constant dense<0.000000e+00> : vector<128xf32>
    %50 = vector.multi_reduction <add>, %49, %cst_38 [0] : vector<324x128xf32> to vector<128xf32>
    %51 = vector.shape_cast %50 : vector<128xf32> to vector<1x128xf32>
    %c0_39 = arith.constant 0 : index
    %c0_40 = arith.constant 0 : index
    %c0_41 = arith.constant 0 : index
    %52 = vector.load %arg5[%c0_39, %c0_40, %c0_41] : memref<1x2x128xf32, #tpu.memory_space<vmem>>, vector<1x2x128xf32>
    %53 = tpu.concatenate %48, %51 in 0 : vector<1x128xf32>, vector<1x128xf32> -> vector<2x128xf32>
    %54 = vector.shape_cast %53 : vector<2x128xf32> to vector<1x2x128xf32>
    %55 = arith.addf %52, %54 : vector<1x2x128xf32>
    %c0_42 = arith.constant 0 : index
    %c0_43 = arith.constant 0 : index
    %c0_44 = arith.constant 0 : index
    %56 = vector.load %arg5[%c0_42, %c0_43, %c0_44] : memref<1x2x128xf32, #tpu.memory_space<vmem>>, vector<1x2x128xf32>
    tpu.vector_store %arg5[%c0_42, %c0_43, %c0_44], %55 {strides = array<i32>} : memref<1x2x128xf32, #tpu.memory_space<vmem>>, vector<1x2x128xf32>,
    return
  }
  func.func @transform_0(%arg0: i32, %arg1: i32) -> (i32, i32, i32, i32) {
    %c0_i32 = arith.constant 0 : i32
    %c0_i32_0 = arith.constant 0 : i32
    %c0_i32_1 = arith.constant 0 : i32
    %c0_i32_2 = arith.constant 0 : i32
    return %arg0, %c0_i32, %c0_i32_0, %c0_i32_1 : i32, i32, i32, i32
  }
  func.func @transform_1(%arg0: i32, %arg1: i32) -> (i32, i32) {
    %c0_i32 = arith.constant 0 : i32
    %c0_i32_0 = arith.constant 0 : i32
    %c0_i32_1 = arith.constant 0 : i32
    return %c0_i32, %c0_i32_0 : i32, i32
  }
  func.func @transform_2(%arg0: i32, %arg1: i32) -> (i32, i32, i32) {
    %c0_i32 = arith.constant 0 : i32
    %c0_i32_0 = arith.constant 0 : i32
    return %arg0, %arg1, %c0_i32 : i32, i32, i32
  }
  func.func @transform_3(%arg0: i32, %arg1: i32) -> (i32, i32, i32) {
    %c0_i32 = arith.constant 0 : i32
    %c0_i32_0 = arith.constant 0 : i32
    %c0_i32_1 = arith.constant 0 : i32
    return %arg0, %c0_i32, %c0_i32_0 : i32, i32, i32
  }
}

</mosaic_0001>

<bundles_post_ra>
// kernel: tpu_custom_call.1
= control target key start
LH: loop header
LB: loop body
LE: loop exit
PB: predicated region body
PF: predicated region fallthrough
CT: control target
= control target key end

     0   :  { %9 = vsyncpa [#allocation3], 0  ;;  %s10658_s0 = inlined_call_operand.vmem [shape: bf16[2,20,20,4], index: 0, kind: input, shape index: {}]   ;;  %s10659_s1 = inlined_call_operand.vmem [shape: bf16[36,128], index: 1, kind: input, shape index: {}]   ;;  %s10660_s2 = inlined_call_operand.vmem [shape: bf16[2,324,128], index: 2, kind: output, shape index: {0}]   ;;  %s10661_s3 = inlined_call_operand.hbm [shape: f32[2,2,128], index: 3, kind: output, shape index: {1}]  }
   0x1   :  { %11 = vsyncpa [#allocation3 + $0x1], 0  ;;  %s7512_s12 = smov 0   ;;  %s7514_s13 = smov 0  }
   0x2   :  { %s7516_s14 = smov 0   ;;  %s7518_s15 = smov 0  }
   0x3   :  { %s7520_s16 = smov 0   ;;  %s7522_s17 = smov 0  }
   0x4 LB: > { %s6342_s18 = sadd.s32 4294967295, %s7478_s17   ;;  %s6343_s19 = sadd.s32 4294967294, %s7478_s17   ;;  %s7478_s17 = sphi %s7522_s17, %s17_s17   ;;  %s7474_s16 = sphi %s7520_s16, %s10883_s16   ;;  %s7470_s15 = sphi %s7518_s15, %s10882_s15   ;;  %s7466_s14 = sphi %s7516_s14, %s10881_s14   ;;  %s7462_s13 = sphi %s7514_s13, %s10880_s13   ;;  %s7458_s12 = sphi %s7512_s12, %s10879_s12  }
   0x5   : > { %s29_s20 = sadd.s32 1, %s7474_s16  ;;  %s111_s21 = sadd.s32 1, %s7466_s14 }
   0x6   : > { %p31_p0 = scmp.ge.s32.totalorder %s29_s20, 2  ;;  %p121_p1 = scmp.ne.s32.totalorder %s7466_s14, %s7462_s13 }
   0x7   : > { %p122_p2 = scmp.eq.s32.totalorder %s6342_s18, 1  ;;  %p127_p3 = scmp.ne.s32.totalorder %s7462_s13, %s7458_s12 }
   0x8   : > { %s10885_s20 = smov (%p31_p0, %s29_s20), 0  ;;  %p128_p5 = scmp.eq.s32.totalorder %s6343_s19, 1 }
   0x9   : > { %p7552_p4 = por %p122_p2, %p121_p1  ;;  %s108_s23 = ssub.s32 %s7474_s16, %s10885_s20 }
   0xa   : > { %p6346_p6 = scmp.ge.s32.totalorder %s7478_s17, 1  ;;  %p109_p7 = scmp.eq.s32.totalorder %s108_s23, 0 }
   0xb   : > { %p7559_p8 = por %p128_p5, %p127_p3  ;;  %p157_p9 = scmp.lt.s32.totalorder %s7478_s17, 3 }
   0xc   : > { %s7565_s25 = scalar_select %p109_p7, %s7466_s14, %s111_s21  }
   0xd   : > { %p158_p10 = pnand %p6346_p6, %p157_p9 }
   0xf   : > { %161 = sbr.rel (%p158_p10) target bundleno = 983 (0x3d7), region = 28 }
  0x16   : > { %p190_p11 = scmp.lt.s32.totalorder %s7470_s15, 1  ;;  %s7480_s4 = smov 4   ;;  %vm691_vm0 = vsmask.f32 7424  ;;  %vm1088_vm1 = vcmask 1046528   ;;  %vm5650_vm2 = vcmask 1041408  }
  0x17   : > { %s7481_s5 = smov 8   ;;  %s7482_s6 = smov 12   ;;  %vm7489_vm3 = vmmov 0   ;;  %vm2799_vm4 = vcmask 31744   ;;  %vm2890_vm5 = vcmask 64512   ;;  %vm2963_vm6 = vcmask 97280  }
  0x18   : > { %s7569_s26 = scalar_select %p190_p11, %s7470_s15, 1  ;;  %vm3036_vm7 = vcmask 130048   ;;  %vm3109_vm8 = vcmask 162816   ;;  %vm3182_vm9 = vcmask 195584   ;;  %vm3255_vm10 = vcmask 228352  }
  0x19   : > { %s7483_s7 = smov 20   ;;  %s7484_s8 = smov 16   ;;  %vm3328_vm11 = vcmask 261120   ;;  %vm5586_vm12 = vcmask 293888   ;;  %vm6099_vm13 = vcmask 1043456   ;;  %vm6197_vm14 = vcmask 1040384  }
  0x1a   : > { %s7113_s27 = smul.u32 240, %s7569_s26  ;;  %s7485_s11 = smov 28  }
  0x1b   : > { %s7487_s18 = smov 24   ;;  %s7488_s23 = smov 32  }
  0x1c   : > { %s7575_s30 = scalar_lea.vmem %s10658_s0, %s7113_s27  ;;  %s7114_s29 = smul.u32 164, %s7569_s26 }
  0x1d   : > { %v7578_v0 = vld [vmem:[%s7575_s30 + $0x14] ss:$0 sps:$4 sm:$0x33]   ;;  %v7581_v1 = vld [vmem:[%s7575_s30 + $0x8] ss:$0 sps:$4 sm:$0x33]  }
  0x1e   : > { %v715_v2 = vshll.u32 %v7578_v0, 16  ;;  %v719_v3 = vshrl.u32 %v7578_v0, 16  ;;  %v215_v4 = vld [vmem:[%s7575_s30] sm:$0xf]  ;;  %v700_v5 = vshll.u32 %v7581_v1, 16  ;;  %v704_v6 = vshrl.u32 %v7581_v1, 16  ;;  %s9885_s9 = scalar_lea.vmem %s10660_s2, %s7114_s29 }
  0x1f   : > { %v7589_v7 = vld [vmem:[%s7575_s30 + $0x20] ss:$0 sps:$4 sm:$0x33]   ;;  %v7594_v9 = vld [vmem:[%s7575_s30 + $0x4] sm:$0xf] }
  0x20   : > { %v7591_v8 = vrot.slane %v715_v2, 1  ;;  %v702_v10 = vrot.slane %v700_v5, 1  ;;  %v730_v11 = vshll.u32 %v7589_v7, 16  ;;  %v734_v12 = vshrl.u32 %v7589_v7, 16  ;;  %v221_v16 = vld [vmem:[%s7575_s30 + $0x18] sm:$0xf] }
  0x21   : > { %v7599_v13 = vcombine.low %v215_v4, %v7594_v9  ;;  %v7602_v14 = vld [vmem:[%s7575_s30 + $0x2c] ss:$0 sps:$4 sm:$0x33]   ;;  %v7607_v17 = vld [vmem:[%s7575_s30 + $0x1c] sm:$0xf] }
  0x22   : > { %v721_v15 = vor.u32 %v719_v3, %v7591_v8  ;;  %v706_v18 = vor.u32 %v704_v6, %v702_v10  ;;  %v732_v19 = vrot.slane %v730_v11, 1  ;;  %v7612_v22 = vld [vmem:[%s7575_s30 + $0x38] ss:$0 sps:$4 sm:$0x33]   ;;  %v745_v23 = vshll.u32 %v7602_v14, 16 }
  0x23   : > { %10703 = vst [vmem:[#allocation5_spill] sm:$0xff] %v7599_v13  ;;  %v693_v20 = vshrl.u32 %v7599_v13, 16  ;;  %v695_v21 = vshll.u32 %v7599_v13, 16  ;;  %v749_v24 = vshrl.u32 %v7602_v14, 16  ;;  %v7618_v25 = vcombine.low %v221_v16, %v7607_v17  ;;  %v224_v26 = vld [vmem:[%s7575_s30 + $0x24] sm:$0xf] }
  0x24   : > { %968 = vrot.lane.b32.xlu1 %v721_v15, %s7480_s4  ;;  %v7622_v27 = vld [vmem:[%s7575_s30 + $0x28] sm:$0xf]  ;;  %964 = vrot.lane.b32.xlu0 %v706_v18, %s7480_s4  ;;  %v736_v28 = vor.u32 %v734_v12, %v732_v19  ;;  %v760_v30 = vshll.u32 %v7612_v22, 16  ;;  %v218_v31 = vld [vmem:[%s7575_s30 + $0xc] sm:$0xf]  ;;  %v747_v32 = vrot.slane %v745_v23, 1 }
  0x25   : > { %10704 = vst [vmem:[#allocation6_spill] sm:$0xff] %v7618_v25  ;;  %v697_v29 = vrot.slane %v695_v21, 1  ;;  %v723_v33 = vshrl.u32 %v7618_v25, 16  ;;  %v725_v34 = vshll.u32 %v7618_v25, 16  ;;  %v7630_v35 = vcombine.low %v224_v26, %v7622_v27  ;;  %v7633_v36 = vld [vmem:[%s7575_s30 + $0x10] sm:$0xf] }
  0x26   : > { %v762_v38 = vrot.slane %v760_v30, 1  ;;  %v764_v39 = vshrl.u32 %v7612_v22, 16  ;;  %v7637_v40 = vcombine.low %v218_v31, %v7633_v36  ;;  %v227_v41 = vld [vmem:[%s7575_s30 + $0x30] sm:$0xf]  ;;  %v7641_v42 = vld [vmem:[%s7575_s30 + $0x34] sm:$0xf]  ;;  %v751_v43 = vor.u32 %v749_v24, %v747_v32 }
  0x27   : > { %10705 = vst [vmem:[#allocation7_spill] sm:$0xff] %v7630_v35  ;;  %v698_v37 = vor.u32 %v697_v29, %v693_v20  ;;  %v727_v44 = vrot.slane %v725_v34, 1  ;;  %v738_v45 = vshrl.u32 %v7630_v35, 16  ;;  %v740_v46 = vshll.u32 %v7630_v35, 16  ;;  %v230_v54 = vld [vmem:[%s7575_s30 + $0x3c] sm:$0xf] }
  0x28   : > { %10706 = vst [vmem:[#allocation8_spill] sm:$0xff] %v7637_v40  ;;  %972 = vrot.lane.b32.xlu1 %v736_v28, %s7480_s4  ;;  %v708_v48 = vshrl.u32 %v7637_v40, 16  ;;  %v710_v49 = vshll.u32 %v7637_v40, 16  ;;  %v7650_v50 = vld [vmem:[%s7575_s30 + $0x44] ss:$0 sps:$4 sm:$0x33]   ;;  %v7654_v53 = vcombine.low %v227_v41, %v7641_v42  ;;  %v766_v56 = vor.u32 %v764_v39, %v762_v38 }
  0x29   : > { %v703_v47 = vsel %vm691_vm0, %v698_v37, %v702_v10  ;;  %v728_v51 = vor.u32 %v727_v44, %v723_v33  ;;  %v742_v52 = vrot.slane %v740_v46, 1  ;;  %v7658_v55 = vld [vmem:[%s7575_s30 + $0x40] sm:$0xf]  ;;  %v775_v58 = vshll.u32 %v7650_v50, 16  ;;  %v233_v5 = vld [vmem:[%s7575_s30 + $0x48] sm:$0xf] }
  0x2a   : > { %962 = vrot.lane.b32.xlu0 %v703_v47, %s7480_s4  ;;  %10707 = vst [vmem:[#allocation9_spill] sm:$0xff] %v7654_v53  ;;  %v712_v57 = vrot.slane %v710_v49, 1  ;;  %v7662_v59 = vcombine.low %v230_v54, %v7658_v55  ;;  %v753_v62 = vshrl.u32 %v7654_v53, 16  ;;  %v755_v63 = vshll.u32 %v7654_v53, 16  ;;  %v7679_v16 = vld [vmem:[%s7575_s30 + $0x4c] sm:$0xf] }
  0x2b   : > { %v733_v60 = vsel %vm691_vm0, %v728_v51, %v732_v19  ;;  %v743_v61 = vor.u32 %v742_v52, %v738_v45  ;;  %v7669_v2 = vld [vmem:[%s7575_s30 + $0x50] ss:$0 sps:$4 sm:$0x33]   ;;  %v7684_v21 = vcombine.low %v233_v5, %v7679_v16  ;;  %v7687_v23 = vld [vmem:[%s7575_s30 + $0x5c] ss:$0 sps:$4 sm:$0x33]  }
  0x2c   : > { %10708 = vst [vmem:[#allocation10_spill] sm:$0xff] %v7662_v59  ;;  %976 = vrot.lane.b32.xlu1 %v751_v43, %s7480_s4  ;;  %v713_v3 = vor.u32 %v712_v57, %v708_v48  ;;  %v770_v4 = vshll.u32 %v7662_v59, 16  ;;  %v757_v11 = vrot.slane %v755_v63, 1  ;;  %v768_v12 = vshrl.u32 %v7662_v59, 16  ;;  %v236_v29 = vld [vmem:[%s7575_s30 + $0x54] sm:$0xf] }
  0x2d   : > { %v790_v15 = vshll.u32 %v7669_v2, 16  ;;  %v748_v19 = vsel %vm691_vm0, %v743_v61, %v747_v32  ;;  %10709 = vst [vmem:[#allocation11_spill] sm:$0xff] %v7684_v21  ;;  %v777_v26 = vrot.slane %v775_v58, 1  ;;  %v779_v28 = vshrl.u32 %v7650_v50, 16  ;;  %v7693_v30 = vld [vmem:[%s7575_s30 + $0x58] sm:$0xf] }
  0x2e   : > { %970 = vrot.lane.b32.xlu0 %v733_v60, %s7480_s4  ;;  %v772_v20 = vrot.slane %v770_v4, 1  ;;  %v758_v24 = vor.u32 %v757_v11, %v753_v62  ;;  %v718_v31 = vsel %vm691_vm0, %v713_v3, %v7591_v8  ;;  %v794_v32 = vshrl.u32 %v7669_v2, 16  ;;  %v239_v43 = vld [vmem:[%s7575_s30 + $0x60] sm:$0xf]  ;;  %v7710_v48 = vld [vmem:[%s7575_s30 + $0x64] sm:$0xf] }
  0x2f   : > { %v785_v33 = vshll.u32 %v7684_v21, 16  ;;  %v792_v37 = vrot.slane %v790_v15, 1  ;;  %v805_v39 = vshll.u32 %v7687_v23, 16  ;;  %v7703_v41 = vcombine.low %v236_v29, %v7693_v30  ;;  %v7715_v52 = vld [vmem:[%s7575_s30 + $0x68] ss:$0 sps:$4 sm:$0x33]  }
  0x30   : > { %980 = vrot.lane.b32.xlu1 %v766_v56, %s7480_s4  ;;  %v763_v44 = vsel %vm691_vm0, %v758_v24, %v762_v38  ;;  %v773_v45 = vor.u32 %v772_v20, %v768_v12  ;;  %v783_v46 = vshrl.u32 %v7684_v21, 16  ;;  %v781_v49 = vor.u32 %v779_v28, %v777_v26  ;;  %v242_v54 = vld [vmem:[%s7575_s30 + $0x6c] sm:$0xf]  ;;  %v7723_v57 = vld [vmem:[%s7575_s30 + $0x74] ss:$0 sps:$4 sm:$0x33]  }
  0x31   : > { %10710 = vst [vmem:[#allocation12_spill] sm:$0xff] %v7703_v41  ;;  %v787_v47 = vrot.slane %v785_v33, 1  ;;  %v800_v51 = vshll.u32 %v7703_v41, 16  ;;  %v809_v56 = vshrl.u32 %v7687_v23, 16  ;;  %v7720_v38 = vcombine.low %v239_v43, %v7710_v48  ;;  %v7726_v58 = vld [vmem:[%s7575_s30 + $0x70] sm:$0xf] }
  0x32   : > { %974 = vrot.lane.b32.xlu0 %v748_v19, %s7480_s4  ;;  %v807_v60 = vrot.slane %v805_v39, 1  ;;  %v798_v61 = vshrl.u32 %v7703_v41, 16  ;;  %v7731_v63 = vcombine.low %v242_v54, %v7726_v58  ;;  %v778_v3 = vsel %vm691_vm0, %v773_v45, %v777_v26  ;;  %v7736_v11 = vld [vmem:[%s7575_s30 + $0x80] ss:$0 sps:$4 sm:$0x33]  }
  0x33   : > { %10711 = vst [vmem:[#allocation13_spill] sm:$0xff] %v7720_v38  ;;  %v802_v62 = vrot.slane %v800_v51, 1  ;;  %v788_v4 = vor.u32 %v787_v47, %v783_v46  ;;  %v815_v5 = vshll.u32 %v7720_v38, 16  ;;  %v245_v12 = vld [vmem:[%s7575_s30 + $0x78] sm:$0xf]  ;;  %v796_v15 = vor.u32 %v794_v32, %v792_v37 }
  0x34   : > { %966 = vrot.lane.b32.xlu1 %v718_v31, %s7480_s4  ;;  %10712 = vst [vmem:[#allocation14_spill] sm:$0xff] %v7731_v63  ;;  %v820_v19 = vshll.u32 %v7715_v52, 16  ;;  %v824_v20 = vshrl.u32 %v7715_v52, 16  ;;  %v7743_v24 = vld [vmem:[%s7575_s30 + $0x7c] sm:$0xf]  ;;  %v813_v26 = vshrl.u32 %v7720_v38, 16  ;;  %v811_v39 = vor.u32 %v809_v56, %v807_v60 }
  0x35   : > { %v817_v28 = vrot.slane %v815_v5, 1  ;;  %v835_v29 = vshll.u32 %v7723_v57, 16  ;;  %v830_v31 = vshll.u32 %v7731_v63, 16  ;;  %v248_v33 = vld [vmem:[%s7575_s30 + $0x84] sm:$0xf]  ;;  %v850_v32 = vshll.u32 %v7736_v11, 16 }
  0x36   : > { %978 = vrot.lane.b32.xlu0 %v763_v44, %s7480_s4  ;;  %v7752_v43 = vcombine.low %v245_v12, %v7743_v24  ;;  %v7755_v44 = vld [vmem:[%s7575_s30 + $0x8c] ss:$0 sps:$4 sm:$0x33]   ;;  %v7758_v45 = vld [vmem:[%s7575_s30 + $0x88] sm:$0xf]  ;;  %v793_v46 = vsel %vm691_vm0, %v788_v4, %v792_v37  ;;  %v803_v47 = vor.u32 %v802_v62, %v798_v61  ;;  %v822_v56 = vrot.slane %v820_v19, 1 }
  0x37   : > { %v832_v51 = vrot.slane %v830_v31, 1  ;;  %v251_v54 = vld [vmem:[%s7575_s30 + $0x90] sm:$0xf]  ;;  %v7767_v12 = vld [vmem:[%s7575_s30 + $0x94] sm:$0xf]  ;;  %v837_v37 = vrot.slane %v835_v29, 1  ;;  %v7773_v4 = vcombine.low %v248_v33, %v7758_v45 }
  0x38   : > { %984 = vrot.lane.b32.xlu1 %v781_v49, %s7480_s4  ;;  %10713 = vst [vmem:[#allocation15_spill] sm:$0xff] %v7752_v43  ;;  %v828_v49 = vshrl.u32 %v7731_v63, 16  ;;  %v845_v5 = vshll.u32 %v7752_v43, 16  ;;  %v854_v61 = vshrl.u32 %v7736_v11, 16  ;;  %v865_v62 = vshll.u32 %v7755_v44, 16 }
  0x39   : > { %10714 = vst [vmem:[#allocation16_spill] sm:$0xff] %v7773_v4  ;;  %v7776_v19 = vrot.slane %v850_v32, 1  ;;  %v843_v31 = vshrl.u32 %v7752_v43, 16  ;;  %v7780_v34 = vld [vmem:[%s7575_s30 + $0x98] ss:$0 sps:$4 sm:$0x33]   ;;  %v7783_v29 = vcombine.low %v251_v54, %v7767_v12  ;;  %v808_v8 = vsel %vm691_vm0, %v803_v47, %v807_v60 }
  0x3a   : > { %982 = vrot.lane.b32.xlu0 %v778_v3, %s7480_s4  ;;  %v839_v3 = vshrl.u32 %v7723_v57, 16  ;;  %v833_v18 = vor.u32 %v832_v51, %v828_v49  ;;  %v869_v33 = vshrl.u32 %v7755_v44, 16  ;;  %v7788_v10 = vld [vmem:[%s7575_s30 + $0xa4] ss:$0 sps:$4 sm:$0x33]   ;;  %v860_v32 = vshll.u32 %v7773_v4, 16 }
  0x3b   : > { %10715 = vst [vmem:[#allocation17_spill] sm:$0xff] %v7783_v29  ;;  %v254_v6 = vld [vmem:[%s7575_s30 + $0x9c] sm:$0xf]  ;;  %v7796_v54 = vrot.slane %v865_v62, 1  ;;  %v858_v60 = vshrl.u32 %v7773_v4, 16  ;;  %v875_v47 = vshll.u32 %v7783_v29, 16  ;;  %v856_v51 = vor.u32 %v854_v61, %v7776_v19 }
  0x3c   : > { %988 = vrot.lane.b32.xlu1 %v796_v15, %s7480_s4  ;;  %v818_v15 = vor.u32 %v817_v28, %v813_v26  ;;  %v826_v26 = vor.u32 %v824_v20, %v822_v56  ;;  %v847_v28 = vrot.slane %v845_v5, 1  ;;  %v257_v49 = vld [vmem:[%s7575_s30 + $0xa8] sm:$0xf]  ;;  %v841_v20 = vor.u32 %v839_v3, %v837_v37  ;;  %v7809_v62 = vld [vmem:[%s7575_s30 + $0xb0] ss:$0 sps:$4 sm:$0x33]  }
  0x3d   : > { %v880_v5 = vshll.u32 %v7780_v34, 16  ;;  %v7812_v41 = vld [vmem:[%s7575_s30 + $0xac] sm:$0xf]  ;;  %v838_v4 = vsel %vm691_vm0, %v833_v18, %v837_v37  ;;  %v862_v3 = vrot.slane %v860_v32, 1  ;;  %v910_v43 = vshll.u32 %v7809_v62, 16 }
  0x3e   : > { %986 = vrot.lane.b32.xlu0 %v793_v46, %s7480_s4  ;;  %v7794_v46 = vld [vmem:[%s7575_s30 + $0xa0] sm:$0xf]  ;;  %v7823_v63 = vld [vmem:[%s7575_s30 + $0xb8] sm:$0xf]  ;;  %v848_v18 = vor.u32 %v847_v28, %v843_v31  ;;  %v871_v37 = vor.u32 %v869_v33, %v7796_v54  ;;  %v884_v32 = vshrl.u32 %v7780_v34, 16  ;;  %v899_v28 = vshrl.u32 %v7788_v10, 16 }
  0x3f   : > { %v7806_v38 = vcombine.low %v254_v6, %v7794_v46  ;;  %v877_v6 = vrot.slane %v875_v47, 1  ;;  %10717 = vst [vmem:[#allocation19_spill] sm:$0xff] %v7823_v63  ;;  %v7831_v59 = vld [vmem:[%s7575_s30 + $0xbc] ss:$0 sps:$4 sm:$0x33]   ;;  %v912_v25 = vrot.slane %v910_v43, 1 }
  0x40   : > { %992 = vrot.lane.b32.xlu1 %v811_v39, %s7480_s4  ;;  %v823_v39 = vsel %vm691_vm0, %v818_v15, %v822_v56  ;;  %v895_v56 = vshll.u32 %v7788_v10, 16  ;;  %v260_v15 = vld [vmem:[%s7575_s30 + $0xb4] sm:$0xf]  ;;  %v7839_v31 = vld [vmem:[%s7575_s30 + $0xc8] ss:$0 sps:$4 sm:$0x33]  }
  0x41   : > { %10716 = vst [vmem:[#allocation18_spill] sm:$0xff] %v7806_v38  ;;  %v890_v21 = vshll.u32 %v7806_v38, 16  ;;  %v888_v61 = vshrl.u32 %v7806_v38, 16  ;;  %v7836_v53 = vcombine.low %v260_v15, %v7823_v63  ;;  %v925_v38 = vshll.u32 %v7831_v59, 16  ;;  %v263_v35 = vld [vmem:[%s7575_s30 + $0xc0] sm:$0xf] }
  0x42   : > { %990 = vrot.lane.b32.xlu0 %v808_v8, %s7480_s4  ;;  %v873_v8 = vshrl.u32 %v7783_v29, 16  ;;  %v7828_v29 = vcombine.low %v257_v49, %v7812_v41  ;;  %v897_v33 = vrot.slane %v895_v56, 1  ;;  %v7848_v15 = vld [vmem:[%s7575_s30 + $0xc4] sm:$0xf] }
  0x43   : > { %v892_v47 = vrot.slane %v890_v21, 1  ;;  %10719 = vst [vmem:[#allocation21_spill] sm:$0xff] %v7836_v53  ;;  %v914_v21 = vshrl.u32 %v7809_v62, 16  ;;  %10720 = vst [vmem:[#allocation22_spill] sm:$0xff] %v7848_v15  ;;  %v920_v63 = vshll.u32 %v7836_v53, 16  ;;  %v918_v43 = vshrl.u32 %v7836_v53, 16 }
  0x44   : > { %996 = vrot.lane.b32.xlu1 %v826_v26, %s7480_s4  ;;  %10718 = vst [vmem:[#allocation20_spill] sm:$0xff] %v7828_v29  ;;  %v882_v26 = vrot.slane %v880_v5, 1  ;;  %v905_v49 = vshll.u32 %v7828_v29, 16  ;;  %v878_v5 = vor.u32 %v877_v6, %v873_v8  ;;  %v903_v40 = vshrl.u32 %v7828_v29, 16 }
  0x45   : > { %v893_v56 = vor.u32 %v892_v47, %v888_v61  ;;  %v7856_v8 = vcombine.low %v263_v35, %v7848_v15  ;;  %v922_v61 = vrot.slane %v920_v63, 1  ;;  %v940_v47 = vshll.u32 %v7839_v31, 16 }
  0x46   : > { %994 = vrot.lane.b32.xlu0 %v823_v39, %s7480_s4  ;;  %v863_v39 = vor.u32 %v862_v3, %v858_v60  ;;  %v907_v13 = vrot.slane %v905_v49, 1  ;;  %v929_v60 = vshrl.u32 %v7831_v59, 16  ;;  %v853_v3 = vsel %vm691_vm0, %v848_v18, %v7776_v19  ;;  %v287_v49 = vld [vmem:[%s7575_s30] sm:$0xe]  ;;  %v289_v18 = vld [vmem:[%s7575_s30 + $0x18] sm:$0xe] }
  0x47   : > { %10721 = vst [vmem:[#allocation23_spill] sm:$0xff] %v7856_v8  ;;  %v886_v6 = vor.u32 %v884_v32, %v882_v26  ;;  %v883_v53 = vsel %vm691_vm0, %v878_v5, %v882_v26  ;;  %v7867_v35 = vor.u32 %v899_v28, %v897_v33  ;;  %v7870_v19 = vld [vmem:[%s7575_s30 + $0xd4] ss:$0 sps:$4 sm:$0x33]   ;;  %v7875_v32 = vsel %vm691_vm0, %v893_v56, %v897_v33  ;;  %v7882_v26 = vld [vmem:[%s7575_s30 + $0xd0] sm:$0xf] }
  0x48   : > { %1000 = vrot.lane.b32.xlu1 %v841_v20, %s7480_s4  ;;  %v927_v20 = vrot.slane %v925_v38, 1  ;;  %v868_v38 = vsel %vm691_vm0, %v863_v39, %v7796_v54  ;;  %10722 = vst [vmem:[#allocation24_spill] sm:$0xff] %v7870_v19  ;;  %v7877_v29 = vor.u32 %v914_v21, %v912_v25  ;;  %v266_v39 = vld [vmem:[%s7575_s30 + $0xcc] sm:$0xf]  ;;  %v935_v5 = vshll.u32 %v7856_v8, 16 }
  0x49   : > { %v6584_v63 = vcombine.low %v287_v49, %v7594_v9  ;;  %v290_v56 = vld [vmem:[%s7575_s30 + $0x24] sm:$0xe]  ;;  %v291_v21 = vld [vmem:[%s7575_s30 + $0x30] sm:$0xe]  ;;  %v933_v54 = vshrl.u32 %v7856_v8, 16  ;;  %v6586_v15 = vcombine.low %v289_v18, %v7607_v17  ;;  %v7900_v9 = vcombine.low %v266_v39, %v7882_v26 }
  0x4a   : > { %998 = vrot.lane.b32.xlu0 %v838_v4, %s7480_s4  ;;  %v288_v4 = vld [vmem:[%s7575_s30 + $0xc] sm:$0xe]  ;;  %v7885_v28 = vor.u32 %v929_v60, %v927_v20  ;;  %v955_v60 = vshll.u32 %v7870_v19, 16  ;;  %v293_v17 = vld [vmem:[%s7575_s30 + $0x48] sm:$0xe]  ;;  %v10724_v39 = vrot.slane %v7581_v1, 1 }
  0x4b   : > { %v6585_v33 = vcombine.low %v288_v4, %v7633_v36  ;;  %10723 = vst [vmem:[#allocation25_spill] sm:$0xff] %v7900_v9  ;;  %v1089_v36 = vrot.slane %v6584_v63, 1  ;;  %v294_v18 = vld [vmem:[%s7575_s30 + $0x54] sm:$0xe] }
  0x4c   : > { %1004 = vrot.lane.b32.xlu1 %v856_v51, %s7480_s4  ;;  %v908_v51 = vor.u32 %v907_v13, %v903_v40  ;;  %v923_v13 = vor.u32 %v922_v61, %v918_v43  ;;  %v7892_v40 = vrot.slane %v940_v47, 1  ;;  %v1095_v43 = vrot.slane %v6586_v15, 1 }
  0x4d   : > { %v1092_v49 = vrot.slane %v6585_v33, 1  ;;  %v6587_v61 = vcombine.low %v290_v56, %v7622_v27  ;;  %v6588_v47 = vcombine.low %v291_v21, %v7641_v42  ;;  %v7915_v63 = vsel %vm1088_vm1, %v1089_v36, %v10724_v39  ;;  %v295_v42 = vld [vmem:[%s7575_s30 + $0x60] sm:$0xe] }
  0x4e   : > { %1002 = vrot.lane.b32.xlu0 %v853_v3, %s7480_s4  ;;  %v292_v3 = vld [vmem:[%s7575_s30 + $0x3c] sm:$0xe]  ;;  %v7903_v4 = vsel %vm691_vm0, %v908_v51, %v912_v25  ;;  %v10725_v25 = vrot.slane %v7578_v0, 1  ;;  %v7925_v51 = vsel %vm691_vm0, %v923_v13, %v927_v20  ;;  %v950_v21 = vshll.u32 %v7900_v9, 16  ;;  %v297_v20 = vld [vmem:[%s7575_s30 + $0x78] sm:$0xe] }
  0x4f   : > { %v6589_v27 = vcombine.low %v292_v3, %v7658_v55  ;;  %v1098_v33 = vrot.slane %v6587_v61, 1  ;;  %v1101_v56 = vrot.slane %v6588_v47, 1  ;;  %v6590_v55 = vcombine.low %v293_v17, %v7679_v16  ;;  %v298_v16 = vld [vmem:[%s7575_s30 + $0x84] sm:$0xe] }
  0x50   : > { %1008 = vrot.lane.b32.xlu1 %v871_v37, %s7480_s4  ;;  %v7910_v37 = vrot.slane %v935_v5, 1  ;;  %v7920_v15 = vsel %vm1088_vm1, %v1092_v49, %v10725_v25  ;;  %v6591_v3 = vcombine.low %v294_v18, %v7693_v30  ;;  %v296_v49 = vld [vmem:[%s7575_s30 + $0x6c] sm:$0xe]  ;;  %v10727_v13 = vrot.slane %v7602_v14, 1 }
  0x51   : > { %v1104_v36 = vrot.slane %v6589_v27, 1  ;;  %v10728_v61 = vrot.slane %v7612_v22, 1  ;;  %v1114_v47 = vrot.slane %v7715_v52, 1  ;;  %v6592_v39 = vcombine.low %v295_v42, %v7710_v48  ;;  %v300_v42 = vld [vmem:[%s7575_s30 + $0x9c] sm:$0xe] }
  0x52   : > { %1006 = vrot.lane.b32.xlu0 %v868_v38, %s7480_s4  ;;  %v10726_v38 = vrot.slane %v7589_v7, 1  ;;  %v10729_v30 = vrot.slane %v7650_v50, 1  ;;  %v1107_v18 = vrot.slane %v6590_v55, 1  ;;  %v1110_v25 = vrot.slane %v6591_v3, 1 }
  0x53   : > { %v10681_v27 = vrot.slane %v7723_v57, 1  ;;  %v6594_v48 = vcombine.low %v297_v20, %v7743_v24  ;;  %v10731_v55 = vrot.slane %v7687_v23, 1  ;;  %v301_v24 = vld [vmem:[%s7575_s30 + $0xa8] sm:$0xe] }
  0x54   : > { %v7930_v5 = vsel %vm1088_vm1, %v1095_v43, %v10726_v38  ;;  %1012 = vrot.lane.b32.xlu1 %v886_v6, %s7480_s4  ;;  %v7941_v43 = vsel %vm1088_vm1, %v1098_v33, %v10727_v13  ;;  %v7946_v6 = vsel %vm1088_vm1, %v1101_v56, %v10728_v61  ;;  %v7955_v17 = vsel %vm1088_vm1, %v1104_v36, %v10729_v30  ;;  %v299_v38 = vld [vmem:[%s7575_s30 + $0x90] sm:$0xe] }
  0x55   : > { %v1113_v33 = vrot.slane %v6592_v39, 1  ;;  %v6593_v56 = vcombine.low %v296_v49, %v7726_v58  ;;  %v10680_v13 = vrot.slane %v7736_v11, 1  ;;  %v7973_v3 = vsel %vm1088_vm1, %v1110_v25, %v10731_v55 }
  0x56   : > { %1010 = vrot.lane.b32.xlu0 %v883_v53, %s7480_s4  ;;  %v10730_v53 = vrot.slane %v7669_v2, 1  ;;  %v1123_v58 = vrot.slane %v7755_v44, 1  ;;  %v6595_v49 = vcombine.low %v298_v16, %v7758_v45  ;;  %v1119_v61 = vrot.slane %v6594_v48, 1  ;;  %v302_v16 = vld [vmem:[%s7575_s30 + $0xb4] sm:$0xe] }
  0x57   : > { %v1116_v20 = vrot.slane %v6593_v56, 1  ;;  %v1126_v39 = vrot.slane %v7780_v34, 1  ;;  %v1129_v25 = vrot.slane %v7788_v10, 1  ;;  %v6597_v45 = vcombine.low %v300_v42, %v7794_v46  ;;  %v6350_v44 = vld [vmem:[%s7575_s30 + $0xc] sm:$0xf] }
  0x58   : > { %1016 = vrot.lane.b32.xlu1 %v7867_v35, %s7480_s4  ;;  %v7968_v36 = vsel %vm1088_vm1, %v1107_v18, %v10730_v53  ;;  %v7981_v35 = vsel %vm1088_vm1, %v1113_v33, %v1114_v47  ;;  %v1122_v30 = vrot.slane %v6595_v49, 1  ;;  %v6596_v18 = vcombine.low %v299_v38, %v7767_v12  ;;  %v303_v53 = vld [vmem:[%s7575_s30 + $0xc0] sm:$0xe]  ;;  %v10732_v49 = vld [vmem:[#allocation19_spill] sm:$0xff]  ;;  %v8135_v34 = vld [vmem:[%s7575_s30 + $0x1c] sm:$0xf] }
  0x59   : > { %v1118_v33 = vsel %vm1088_vm1, %v1116_v20, %v10681_v27  ;;  %v1121_v56 = vsel %vm1088_vm1, %v1119_v61, %v10680_v13  ;;  %v1132_v48 = vrot.slane %v7809_v62, 1  ;;  %v1128_v38 = vrot.slane %v6597_v45, 1  ;;  %v10733_v13 = vld [vmem:[#allocation22_spill] sm:$0xff] }
  0x5a   : > { %1014 = vrot.lane.b32.xlu0 %v7875_v32, %s7480_s4  ;;  %v6598_v32 = vcombine.low %v301_v24, %v7812_v41  ;;  %v1124_v12 = vsel %vm1088_vm1, %v1122_v30, %v1123_v58  ;;  %v1125_v46 = vrot.slane %v6596_v18, 1  ;;  %v1135_v42 = vrot.slane %v7831_v59, 1  ;;  %v6354_v59 = vld [vmem:[%s7575_s30 + $0x1c] sm:$0xf] }
  0x5b   : > { %v6599_v20 = vcombine.low %v302_v16, %v10732_v49  ;;  %v1138_v61 = vrot.slane %v7839_v31, 1  ;;  %v6600_v27 = vcombine.low %v303_v53, %v10733_v13  ;;  %v948_v41 = vshrl.u32 %v7900_v9, 16 }
  0x5c   : > { %1020 = vrot.lane.b32.xlu1 %v7877_v29, %s7480_s4  ;;  %v1131_v55 = vrot.slane %v6598_v32, 1  ;;  %v952_v29 = vrot.slane %v950_v21, 1  ;;  %v1127_v24 = vsel %vm1088_vm1, %v1125_v46, %v1126_v39  ;;  %v1130_v30 = vsel %vm1088_vm1, %v1128_v38, %v1129_v25 }
  0x5d   : > { %v938_v18 = vor.u32 %v7910_v37, %v933_v54  ;;  %v1137_v45 = vrot.slane %v6600_v27, 1  ;;  %v10734_v21 = vshrl.u32 %v7839_v31, 16  ;;  %v957_v32 = vrot.slane %v955_v60, 1 }
  0x5e   : > { %1018 = vrot.lane.b32.xlu0 %v7903_v4, %s7480_s4  ;;  %v8023_v13 = vsel %vm1088_vm1, %v1131_v55, %v1132_v48  ;;  %v1134_v4 = vrot.slane %v6599_v20, 1  ;;  %v959_v53 = vshrl.u32 %v7870_v19, 16  ;;  %v953_v27 = vor.u32 %v952_v29, %v948_v41  ;;  %v6353_v29 = vld [vmem:[%s7575_s30 + $0x18] sm:$0xf] }
  0x5f   : > { %v946_v16 = vor.u32 %v10734_v21, %v7892_v40  ;;  %v8041_v37 = vsel %vm1088_vm1, %v1137_v45, %v1138_v61  ;;  %v10735_v38 = vrot.slane %v7581_v1, 1  ;;  %v10738_v1 = vrot.slane %v7602_v14, 1 }
  0x60   : > { %1024 = vrot.lane.b32.xlu1 %v7885_v28, %s7480_s4  ;;  %v8036_v54 = vsel %vm1088_vm1, %v1134_v4, %v1135_v42  ;;  %v943_v28 = vsel %vm691_vm0, %v938_v18, %v7892_v40  ;;  %v961_v60 = vor.u32 %v959_v53, %v957_v32  ;;  %v958_v46 = vsel %vm691_vm0, %v953_v27, %v957_v32  ;;  %v6512_v53 = vld [vmem:[%s7575_s30 + $0x18] sm:$0xe] }
  0x61   : > { %v10736_v40 = vrot.slane %v7578_v0, 1  ;;  %v10739_v0 = vrot.slane %v7612_v22, 1  ;;  %v10741_v14 = vrot.slane %v7669_v2, 1  ;;  %v10742_v22 = vrot.slane %v7687_v23, 1 }
  0x62   : > { %1022 = vrot.lane.b32.xlu0 %v7925_v51, %s7480_s4  ;;  %v10737_v51 = vrot.slane %v7589_v7, 1  ;;  %v10740_v7 = vrot.slane %v7650_v50, 1  ;;  %v10743_v50 = vrot.slane %v7723_v57, 1  ;;  %v10744_v2 = vrot.slane %v7736_v11, 1 }
  0x63   : > { %v10682_v55 = vrot.slane %v7870_v19, 1  ;;  %v6604_v21 = vcombine.low %v6353_v29, %v6354_v59  ;;  %v8243_v29 = vld [vmem:[%s7575_s30 + $0x2c] ss:$0 sps:$4 sm:$0x33]  }
  0x64   : > { %1028 = vrot.lane.b32.xlu1 %v946_v16, %s7480_s4 }
  0x66   : > { %1026 = vrot.lane.b32.xlu0 %v943_v28, %s7480_s4 }
  0x68   : > { %1032 = vrot.lane.b32.xlu1 %v961_v60, %s7480_s4  ;;  %v6423_v60 = vld [vmem:[%s7575_s30 + $0x18] sm:$0xe] }
  0x6a   : > { %1030 = vrot.lane.b32.xlu0 %v958_v46, %s7480_s4  ;;  %v1503_v46 = vshll.u32 %v6604_v21, 16 }
  0x6c   : > { %1145 = vrot.lane.b32.xlu1 %v10735_v38, %s7481_s5  ;;  %v8203_v38 = vld [vmem:[%s7575_s30 + $0x20] ss:$0 sps:$4 sm:$0x33]  }
  0x6e   : > { %1143 = vrot.lane.b32.xlu0 %v7915_v63, %s7481_s5 }
  0x70   : > { %1149 = vrot.lane.b32.xlu1 %v10736_v40, %s7481_s5 }
  0x72   : > { %1147 = vrot.lane.b32.xlu0 %v7920_v15, %s7481_s5 }
  0x74   : > { %1153 = vrot.lane.b32.xlu1 %v10737_v51, %s7481_s5  ;;  %v6728_v51 = vcombine.low %v6512_v53, %v8135_v34 }
  0x76   : > { %1151 = vrot.lane.b32.xlu0 %v7930_v5, %s7481_s5  ;;  %v6351_v5 = vld [vmem:[%s7575_s30 + $0x10] sm:$0xf] }
  0x78   : > { %1157 = vrot.lane.b32.xlu1 %v10738_v1, %s7481_s5 }
  0x7a   : > { %1155 = vrot.lane.b32.xlu0 %v7941_v43, %s7481_s5  ;;  %v6440_v43 = vld [vmem:[%s7575_s30 + $0x18] sm:$0xf] }
  0x7b   : > { %v8145_v10 = vcombine.low %v6440_v43, %v8135_v34  ;;  %v2673_v43 = vrot.slane %v6728_v51, 1 }
  0x7c   : > { %1161 = vrot.lane.b32.xlu1 %v10739_v0, %s7481_s5  ;;  %v6443_v0 = vld [vmem:[%s7575_s30 + $0x24] sm:$0xf] }
  0x7d   : > { %v2278_v18 = vshrl.u32 %v8145_v10, 16 }
  0x7e   : > { %1159 = vrot.lane.b32.xlu0 %v7946_v6, %s7481_s5 }
  0x80   : > { %1165 = vrot.lane.b32.xlu1 %v10740_v7, %s7481_s5  ;;  %v8213_v7 = vld [vmem:[%s7575_s30 + $0x28] sm:$0xf] }
  0x82   : > { %1163 = vrot.lane.b32.xlu0 %v7955_v17, %s7481_s5  ;;  %v6602_v17 = vcombine.low %v6350_v44, %v6351_v5  ;;  %v1505_v44 = vrot.slane %v1503_v46, 1  ;;  %v7256_v46 = vld [vmem:[%s7575_s30 + $0x14] ss:$0 sps:$4 sm:$0x11]  }
  0x84   : > { %1169 = vrot.lane.b32.xlu1 %v10741_v14, %s7481_s5  ;;  %v1486_v49 = vshrl.u32 %v6602_v17, 16 }
  0x86   : > { %1167 = vrot.lane.b32.xlu0 %v7968_v36, %s7481_s5  ;;  %v304_v36 = vld [vmem:[%s7575_s30 + $0xcc] sm:$0xe] }
  0x88   : > { %1173 = vrot.lane.b32.xlu1 %v10742_v22, %s7481_s5  ;;  %v6657_v22 = vcombine.low %v6423_v60, %v6354_v59  ;;  %v7305_v59 = vld [vmem:[%s10659_s1 + $0x8] sm:$0xff]  }
  0x8a   : > { %1171 = vrot.lane.b32.xlu0 %v7973_v3, %s7481_s5 }
  0x8c   : > { %1177 = vrot.lane.b32.xlu1 %v1114_v47, %s7481_s5  ;;  %v6422_v47 = vld [vmem:[%s7575_s30 + $0xc] sm:$0xe] }
  0x8d   : > { %v6656_v62 = vcombine.low %v6422_v47, %v6351_v5  ;;  %v1508_v5 = vshll.u32 %v8203_v38, 16  ;;  %v6676_v47 = vcombine.low %v6443_v0, %v8213_v7 }
  0x8e   : > { %1175 = vrot.lane.b32.xlu0 %v7981_v35, %s7481_s5  ;;  %v6601_v35 = vcombine.low %v304_v36, %v7882_v26 }
  0x8f   : > { %v2293_v53 = vshrl.u32 %v6676_v47, 16 }
  0x90   : > { %1181 = vrot.lane.b32.xlu1 %v10743_v50, %s7481_s5  ;;  %v1140_v26 = vrot.slane %v6601_v35, 1  ;;  %v10683_v35 = vmov 0.0  }
  0x91   : > { %7017 = vmatprep.subr.bf16.mxu0 %v10683_v35  ;;  %7107 = vmatprep.subr.bf16.mxu1 %v10683_v35 }
  0x92   : > { %1179 = vrot.lane.b32.xlu0 %v1118_v33, %s7481_s5  ;;  %v1142_v31 = vsel %vm1088_vm1, %v1140_v26, %v10682_v55  ;;  %7023 = vmatprep.mubr.msk.bf16.mxu0 %vm7489_vm3, %v10683_v35  ;;  %v1512_v55 = vshrl.u32 %v8203_v38, 16 }
  0x93   : > { %7067 = vmatprep.mubr.msk.bf16.mxu1 %vm7489_vm3, %v10683_v35 }
  0x94   : > { %1185 = vrot.lane.b32.xlu1 %v10744_v2, %s7481_s5  ;;  %v1501_v2 = vshrl.u32 %v6604_v21, 16 }
  0x96   : > { %1183 = vrot.lane.b32.xlu0 %v1121_v56, %s7481_s5  ;;  %v8105_v23 = vpop.permute.xlu1 %968  ;;  %v8107_v52 = vpop.permute.xlu0 %964  ;;  %v8161_v56 = vld [vmem:[%s7575_s30 + $0x20] ss:$0 sps:$4 sm:$0x33]   ;;  %v1506_v26 = vor.u32 %v1505_v44, %v1501_v2 }
  0x97   : > { %v2285_v4 = vshll.u32 %v8161_v56, 16  ;;  %v2674_v34 = vrot.slane %v8161_v56, 1 }
  0x98   : > { %1189 = vrot.lane.b32.xlu1 %v1123_v58, %s7481_s5 }
  0x99   : > { %v8196_v28 = vrot.slane %v2285_v4, 1 }
  0x9a   : > { %1187 = vrot.lane.b32.xlu0 %v1124_v12, %s7481_s5  ;;  %v8113_v57 = vpop.permute.xlu1 %972 }
  0x9c   : > { %v8115_v11 = vpop.permute.xlu0 %962  ;;  %1193 = vrot.lane.b32.xlu1 %v1126_v39, %s7481_s5  ;;  %v1488_v39 = vshll.u32 %v6602_v17, 16 }
  0x9e   : > { %1191 = vrot.lane.b32.xlu0 %v1127_v24, %s7481_s5  ;;  %v8121_v63 = vpop.permute.xlu1 %976  ;;  %v1490_v20 = vrot.slane %v1488_v39, 1  ;;  %v1881_v24 = vrot.slane %v6656_v62, 1  ;;  %v1884_v39 = vrot.slane %v6657_v22, 1  ;;  %v10687_v62 = vrot.slane %v8203_v38, 1 }
  0xa0   : > { %v8123_v15 = vpop.permute.xlu0 %970  ;;  %1197 = vrot.lane.b32.xlu1 %v1129_v25, %s7481_s5  ;;  %v8153_v25 = vld [vmem:[%s7575_s30 + $0x14] ss:$0 sps:$4 sm:$0x33]  }
  0xa1   : > { %v1493_v41 = vshll.u32 %v8153_v25, 16 }
  0xa2   : > { %1195 = vrot.lane.b32.xlu0 %v1130_v30, %s7481_s5  ;;  %v8132_v6 = vpop.permute.xlu1 %980  ;;  %v1882_v30 = vrot.slane %v8153_v25, 1 }
  0xa3   : > { %v8187_v16 = vrot.slane %v1493_v41, 1  ;;  %v2295_v41 = vshll.u32 %v6676_v47, 16 }
  0xa4   : > { %v8139_v3 = vpop.permute.xlu0 %974  ;;  %1201 = vrot.lane.b32.xlu1 %v1132_v48, %s7481_s5  ;;  %v2280_v48 = vshll.u32 %v8145_v10, 16 }
  0xa6   : > { %1199 = vrot.lane.b32.xlu0 %v8023_v13, %s7481_s5  ;;  %v8149_v58 = vpop.permute.xlu1 %966  ;;  %v2282_v13 = vrot.slane %v2280_v48, 1 }
  0xa8   : > { %v8155_v33 = vpop.permute.xlu0 %978  ;;  %1205 = vrot.lane.b32.xlu1 %v1135_v42, %s7481_s5 }
  0xaa   : > { %1203 = vrot.lane.b32.xlu0 %v8036_v54, %s7481_s5  ;;  %v8166_v12 = vpop.permute.xlu1 %984  ;;  %v1883_v54 = vsel %vm1088_vm1, %v1881_v24, %v1882_v30  ;;  %v1886_v24 = vsel %vm1088_vm1, %v1884_v39, %v10687_v62  ;;  %v8365_v62 = vld [vmem:[%s7575_s30 + $0x38] ss:$0 sps:$4 sm:$0x33]  }
  0xab   : > { %10745 = vst [vmem:[#allocation19_spill] sm:$0xff] %v8166_v12 }
  0xac   : > { %v8172_v42 = vpop.permute.xlu0 %982  ;;  %1209 = vrot.lane.b32.xlu1 %v1138_v61, %s7481_s5  ;;  %v1491_v61 = vor.u32 %v1490_v20, %v1486_v49  ;;  %v8236_v49 = vrot.slane %v1508_v5, 1  ;;  %v2675_v20 = vsel %vm1088_vm1, %v2673_v43, %v2674_v34 }
  0xae   : > { %1207 = vrot.lane.b32.xlu0 %v8041_v37, %s7481_s5  ;;  %v8182_v45 = vpop.permute.xlu1 %988  ;;  %v2283_v37 = vor.u32 %v2282_v13, %v2278_v18  ;;  %v1496_v40 = vsel %vm691_vm0, %v1491_v61, %v8187_v16  ;;  %v6356_v18 = vld [vmem:[%s7575_s30 + $0x24] sm:$0xf]  ;;  %v1511_v4 = vsel %vm691_vm0, %v1506_v26, %v8236_v49  ;;  %v7307_v61 = vld [vmem:[%s10659_s1 + $0x10] ss:$0 sps:$4 sm:$0x33]  }
  0xaf   : > { %10746 = vst [vmem:[#allocation22_spill] sm:$0xff] %v8182_v45  ;;  %v5652_v51 = vsel %vm5650_vm2, %v7307_v61, 0  ;;  %v6431_v45 = vld [vmem:[%s7575_s30 + $0x78] sm:$0xe] }
  0xb0   : > { %v8189_v32 = vpop.permute.xlu0 %986  ;;  %1359 = vrot.lane.b32.xlu1 %v6602_v17, %s7482_s6  ;;  %v2288_v14 = vsel %vm691_vm0, %v2283_v37, %v8196_v28  ;;  %v7302_v17 = vld [vmem:[%s10659_s1] sm:$0xff]   ;;  %v2300_v37 = vshll.u32 %v8243_v29, 16 }
  0xb1   : > { %10747 = vst [vmem:[#allocation26_spill] sm:$0xff] %v8189_v32  ;;  %7018 = vmatpush3.bf16.msra.mxu0 %v7302_v17  ;;  %7110 = vmatpush3.bf16.msra.mxu1 %v7302_v17 }
  0xb2   : > { %1211 = vrot.lane.b32.xlu0 %v1142_v31, %s7481_s5  ;;  %v8199_v27 = vpop.permute.xlu1 %992  ;;  %7019 = vmatprep.subr.bf16.mxu0 %v10683_v35  ;;  %v6357_v31 = vld [vmem:[%s7575_s30 + $0x28] sm:$0xf]  ;;  %v8278_v44 = vrot.slane %v2300_v37, 1 }
  0xb3   : > { %10748 = vst [vmem:[#allocation27_spill] sm:$0xff] %v8199_v27  ;;  %7108 = vmatprep.subr.bf16.mxu1 %v10683_v35  ;;  %v6606_v0 = vcombine.low %v6356_v18, %v6357_v31 }
  0xb4   : > { %v8208_v1 = vpop.permute.xlu0 %990  ;;  %1935 = vrot.lane.b32.xlu1 %v1883_v54, %s7483_s7  ;;  %v2297_v54 = vrot.slane %v2295_v41, 1  ;;  %v10686_v41 = vrot.slane %v8243_v29, 1 }
  0xb5   : > { %10749 = vst [vmem:[#allocation28_spill] sm:$0xff] %v8208_v1  ;;  %7020 = vmatpush3.bf16.msra.mxu0 %v7305_v59  ;;  %7111 = vmatpush3.bf16.msra.mxu1 %v7305_v59  ;;  %v1518_v17 = vshll.u32 %v6606_v0, 16  ;;  %v1516_v59 = vshrl.u32 %v6606_v0, 16 }
  0xb6   : > { %1755 = vrot.lane.b32.xlu0 %v1496_v40, %s7484_s8  ;;  %v8218_v50 = vpop.permute.xlu1 %996  ;;  %7021 = vmatprep.subr.bf16.mxu0 %v10683_v35  ;;  %v6513_v40 = vld [vmem:[%s7575_s30 + $0x24] sm:$0xe]  ;;  %v2298_v2 = vor.u32 %v2297_v54, %v2293_v53  ;;  %v6446_v53 = vld [vmem:[%s7575_s30 + $0x30] sm:$0xf]  ;;  %v6447_v54 = vld [vmem:[%s7575_s30 + $0x34] sm:$0xf] }
  0xb7   : > { %10750 = vst [vmem:[#allocation29_spill] sm:$0xff] %v8218_v50  ;;  %7109 = vmatprep.subr.bf16.mxu1 %v10683_v35  ;;  %v6729_v22 = vcombine.low %v6513_v40, %v8213_v7  ;;  %v8289_v7 = vld [vmem:[%s7575_s30 + $0x2c] ss:$0 sps:$4 sm:$0x33]  }
  0xb8   : > { %v8226_v36 = vpop.permute.xlu0 %994  ;;  %2547 = vrot.lane.b32.xlu1 %v2288_v14, %s7485_s11  ;;  %v2303_v26 = vsel %vm691_vm0, %v2298_v2, %v8278_v44  ;;  %v1523_v18 = vshll.u32 %v8289_v7, 16  ;;  %v2289_v2 = vshrl.u32 %v8161_v56, 16 }
  0xb9   : > { %10751 = vst [vmem:[#allocation30_spill] sm:$0xff] %v8226_v36  ;;  %7022 = vmatpush3.bf16.msra.mxu0 %v5652_v51  ;;  %7112 = vmatpush3.bf16.msra.mxu1 %v5652_v51  ;;  %v6426_v36 = vld [vmem:[%s7575_s30 + $0x3c] sm:$0xe] }
  0xba   : > { %2151 = vrot.lane.b32.xlu0 %v8145_v10, %s7487_s18  ;;  %v8234_v48 = vpop.permute.xlu1 %1000  ;;  %v8315_v40 = vrot.slane %v1523_v18, 1 }
  0xbb   : > { %10752 = vst [vmem:[#allocation31_spill] sm:$0xff] %v8234_v48 }
  0xbc   : > { %v8248_v10 = vpop.permute.xlu0 %998  ;;  %1363 = vrot.lane.b32.xlu1 %v6604_v21, %s7482_s6  ;;  %v1497_v21 = vshrl.u32 %v8153_v25, 16 }
  0xbd   : > { %10753 = vst [vmem:[#allocation32_spill] sm:$0xff] %v8248_v10 }
  0xbe   : > { %2727 = vrot.lane.b32.xlu0 %v2675_v20, %s7488_s23  ;;  %v8257_v13 = vpop.permute.xlu1 %1004  ;;  %v1499_v43 = vor.u32 %v1497_v21, %v8187_v16  ;;  %v2676_v20 = vrot.slane %v6729_v22, 1  ;;  %v7265_v22 = vld [vmem:[%s7575_s30 + $0x20] ss:$0 sps:$4 sm:$0x11]  }
  0xbf   : > { %10754 = vst [vmem:[#allocation33_spill] sm:$0xff] %v8257_v13  ;;  %v8576_v13 = vld [vmem:[%s7575_s30 + $0x58] sm:$0xf] }
  0xc0   : > { %v8268_v60 = vpop.permute.xlu0 %1002  ;;  %1939 = vrot.lane.b32.xlu1 %v1886_v24, %s7483_s7  ;;  %v1520_v24 = vrot.slane %v1518_v17, 1  ;;  %v2678_v21 = vsel %vm1088_vm1, %v2676_v20, %v10686_v41  ;;  %v2291_v20 = vor.u32 %v2289_v2, %v8196_v28  ;;  %v7270_v2 = vld [vmem:[%s7575_s30 + $0x20] ss:$0 sps:$4 sm:$0x11]  }
  0xc1   : > { %10755 = vst [vmem:[#allocation34_spill] sm:$0xff] %v8268_v60 }
  0xc2   : > { %1759 = vrot.lane.b32.xlu0 %v1511_v4, %s7484_s8  ;;  %v8275_v14 = vpop.permute.xlu1 %1008  ;;  %v6424_v4 = vld [vmem:[%s7575_s30 + $0x24] sm:$0xe] }
  0xc3   : > { %10756 = vst [vmem:[#allocation35_spill] sm:$0xff] %v8275_v14  ;;  %v6658_v37 = vcombine.low %v6424_v4, %v6357_v31  ;;  %v10685_v31 = vrot.slane %v8289_v7, 1 }
  0xc4   : > { %v8282_v5 = vpop.permute.xlu0 %1006  ;;  %1361 = vrot.lane.b32.xlu1 %v7256_v46, %s7482_s6  ;;  %v1521_v46 = vor.u32 %v1520_v24, %v1516_v59  ;;  %v8333_v24 = vld [vmem:[%s7575_s30 + $0x38] ss:$0 sps:$4 sm:$0x33]  }
  0xc5   : > { %10757 = vst [vmem:[#allocation36_spill] sm:$0xff] %v8282_v5  ;;  %v10782_v14 = vrot.slane %v8333_v24, 1  ;;  %v3441_v5 = vlaneseq }
  0xc6   : > { %2155 = vrot.lane.b32.xlu0 %v6676_v47, %s7487_s18  ;;  %v8292_v39 = vpop.permute.xlu1 %1012  ;;  %v1526_v25 = vsel %vm691_vm0, %v1521_v46, %v8315_v40  ;;  %v2315_v46 = vshll.u32 %v8333_v24, 16 }
  0xc7   : > { %10758 = vst [vmem:[#allocation37_spill] sm:$0xff] %v8292_v39  ;;  %v6362_v39 = vld [vmem:[%s7575_s30 + $0x3c] sm:$0xf] }
  0xc8   : > { %v8297_v16 = vpop.permute.xlu0 %1010  ;;  %1757 = vrot.lane.b32.xlu1 %v1499_v43, %s7484_s8  ;;  %v6678_v43 = vcombine.low %v6446_v53, %v6447_v54  ;;  %v6360_v53 = vld [vmem:[%s7575_s30 + $0x34] sm:$0xf] }
  0xc9   : > { %10759 = vst [vmem:[#allocation38_spill] sm:$0xff] %v8297_v16 }
  0xca   : > { %2551 = vrot.lane.b32.xlu0 %v2303_v26, %s7485_s11  ;;  %v8302_v47 = vpop.permute.xlu1 %1016  ;;  %v2310_v59 = vshll.u32 %v6678_v43, 16 }
  0xcb   : > { %10760 = vst [vmem:[#allocation39_spill] sm:$0xff] %v8302_v47 }
  0xcc   : > { %v8308_v61 = vpop.permute.xlu0 %1014  ;;  %1937 = vrot.lane.b32.xlu1 %v1882_v30, %s7483_s7  ;;  %v1887_v30 = vrot.slane %v6658_v37, 1  ;;  %v2308_v37 = vshrl.u32 %v6678_v43, 16  ;;  %v2312_v28 = vrot.slane %v2310_v59, 1 }
  0xcd   : > { %10761 = vst [vmem:[#allocation40_spill] sm:$0xff] %v8308_v61 }
  0xce   : > { %2731 = vrot.lane.b32.xlu0 %v2678_v21, %s7488_s23  ;;  %v8318_v51 = vpop.permute.xlu1 %1020  ;;  %v6359_v21 = vld [vmem:[%s7575_s30 + $0x30] sm:$0xf]  ;;  %v2313_v59 = vor.u32 %v2312_v28, %v2308_v37  ;;  %v10689_v37 = vrot.slane %v8333_v24, 1 }
  0xcf   : > { %10762 = vst [vmem:[#allocation41_spill] sm:$0xff] %v8318_v51 }
  0xd0   : > { %v8322_v17 = vpop.permute.xlu0 %1018  ;;  %1367 = vrot.lane.b32.xlu1 %v6606_v0, %s7482_s6  ;;  %v1889_v0 = vsel %vm1088_vm1, %v1887_v30, %v10685_v31  ;;  %v6608_v30 = vcombine.low %v6359_v21, %v6360_v53  ;;  %v8358_v31 = vrot.slane %v2315_v46, 1  ;;  %v1538_v46 = vshll.u32 %v8365_v62, 16 }
  0xd1   : > { %10763 = vst [vmem:[#allocation42_spill] sm:$0xff] %v8322_v17 }
  0xd2   : > { %2153 = vrot.lane.b32.xlu0 %v7265_v22, %s7487_s18  ;;  %v8329_v26 = vpop.permute.xlu1 %1024  ;;  %v1533_v21 = vshll.u32 %v6608_v30, 16 }
  0xd3   : > { %10764 = vst [vmem:[#allocation43_spill] sm:$0xff] %v8329_v26 }
  0xd4   : > { %v8335_v18 = vpop.permute.xlu0 %1022  ;;  %1763 = vrot.lane.b32.xlu1 %v1526_v25, %s7484_s8  ;;  %v6514_v25 = vld [vmem:[%s7575_s30 + $0x30] sm:$0xe] }
  0xd5   : > { %10765 = vst [vmem:[#allocation44_spill] sm:$0xff] %v8335_v18  ;;  %v6730_v35 = vcombine.low %v6514_v25, %v6447_v54 }
  0xd6   : > { %2549 = vrot.lane.b32.xlu0 %v2291_v20, %s7485_s11  ;;  %v8342_v4 = vpop.permute.xlu1 %1028 }
  0xd7   : > { %10766 = vst [vmem:[#allocation45_spill] sm:$0xff] %v8342_v4  ;;  %v2679_v54 = vrot.slane %v6730_v35, 1  ;;  %v8391_v4 = vrot.slane %v1538_v46, 1 }
  0xd8   : > { %v8347_v22 = vpop.permute.xlu0 %1026  ;;  %1943 = vrot.lane.b32.xlu1 %v1889_v0, %s7483_s7  ;;  %v1514_v0 = vor.u32 %v1512_v55, %v8236_v49  ;;  %v1531_v55 = vshrl.u32 %v6608_v30, 16  ;;  %v1535_v49 = vrot.slane %v1533_v21, 1  ;;  %v6450_v21 = vld [vmem:[%s7575_s30 + $0x40] sm:$0xf] }
  0xd9   : > { %10767 = vst [vmem:[#allocation46_spill] sm:$0xff] %v8347_v22  ;;  %v2681_v35 = vsel %vm1088_vm1, %v2679_v54, %v10689_v37  ;;  %v7275_v54 = vld [vmem:[%s7575_s30 + $0x2c] ss:$0 sps:$4 sm:$0x11]  }
  0xda   : > { %2729 = vrot.lane.b32.xlu0 %v2674_v34, %s7488_s23  ;;  %v8356_v20 = vpop.permute.xlu1 %1032  ;;  %v2318_v34 = vsel %vm691_vm0, %v2313_v59, %v8358_v31  ;;  %v10770_v59 = vrot.slane %v8203_v38, 1  ;;  %v8399_v37 = vld [vmem:[%s7575_s30 + $0x5c] ss:$0 sps:$4 sm:$0x33]  }
  0xdb   : > { %10768 = vst [vmem:[#allocation47_spill] sm:$0xff] %v8356_v20  ;;  %v1536_v20 = vor.u32 %v1535_v49, %v1531_v55  ;;  %v10691_v49 = vrot.slane %v8365_v62, 1 }
  0xdc   : > { %v8360_v41 = vpop.permute.xlu0 %1030  ;;  %1365 = vrot.lane.b32.xlu1 %v7270_v2, %s7482_s6  ;;  %v6425_v2 = vld [vmem:[%s7575_s30 + $0x30] sm:$0xe] }
  0xdd   : > { %10769 = vst [vmem:[#allocation48_spill] sm:$0xff] %v8360_v41  ;;  %v6659_v9 = vcombine.low %v6425_v2, %v6360_v53  ;;  %v1541_v38 = vsel %vm691_vm0, %v1536_v20, %v8391_v4  ;;  %v2360_v2 = vshll.u32 %v8399_v37, 16 }
  0xde   : > { %2159 = vrot.lane.b32.xlu0 %v6678_v43, %s7487_s18  ;;  %v8368_v56 = vpop.permute.xlu1 %1145 }
  0xdf   : > { %v1890_v55 = vrot.slane %v6659_v9, 1 }
  0xe0   : > { %v8373_v28 = vpop.permute.xlu0 %1143  ;;  %1761 = vrot.lane.b32.xlu1 %v1514_v0, %s7484_s8  ;;  %v6449_v0 = vld [vmem:[%s7575_s30 + $0x3c] sm:$0xf] }
  0xe1   : > { %v6680_v8 = vcombine.low %v6449_v0, %v6450_v21  ;;  %v1892_v9 = vsel %vm1088_vm1, %v1890_v55, %v10691_v49  ;;  %v2364_v0 = vshrl.u32 %v8399_v37, 16  ;;  %v1527_v55 = vshrl.u32 %v8289_v7, 16 }
  0xe2   : > { %2555 = vrot.lane.b32.xlu0 %v2318_v34, %s7485_s11  ;;  %v8378_v43 = vpop.permute.xlu1 %1149  ;;  %v2304_v34 = vshrl.u32 %v8243_v29, 16 }
  0xe4   : > { %v8384_v25 = vpop.permute.xlu0 %1147  ;;  %1941 = vrot.lane.b32.xlu1 %v10770_v59, %s7483_s7  ;;  %v2306_v46 = vor.u32 %v2304_v34, %v8278_v44  ;;  %v2325_v59 = vshll.u32 %v6680_v8, 16  ;;  %v8424_v44 = vrot.slane %v2360_v2, 1  ;;  %v2323_v34 = vshrl.u32 %v6680_v8, 16 }
  0xe5   : > { %v10771_v2 = vrot.slane %v8243_v29, 1 }
  0xe6   : > { %2735 = vrot.lane.b32.xlu0 %v2681_v35, %s7488_s23  ;;  %v8395_v41 = vpop.permute.xlu1 %1153  ;;  %v8413_v35 = vld [vmem:[%s7575_s30 + $0x44] ss:$0 sps:$4 sm:$0x33]   ;;  %v8435_v49 = vor.u32 %v2364_v0, %v8424_v44  ;;  %v6363_v0 = vld [vmem:[%s7575_s30 + $0x40] sm:$0xf] }
  0xe7   : > { %v2330_v26 = vshll.u32 %v8413_v35, 16 }
  0xe8   : > { %v8401_v22 = vpop.permute.xlu0 %1151  ;;  %1371 = vrot.lane.b32.xlu1 %v6608_v30, %s7482_s6 }
  0xe9   : > { %v8442_v50 = vrot.slane %v2330_v26, 1  ;;  %v10693_v26 = vrot.slane %v8413_v35, 1 }
  0xea   : > { %2157 = vrot.lane.b32.xlu0 %v7275_v54, %s7487_s18  ;;  %v8408_v53 = vpop.permute.xlu1 %1157  ;;  %v2327_v54 = vrot.slane %v2325_v59, 1 }
  0xec   : > { %v8415_v30 = vpop.permute.xlu0 %1155  ;;  %1767 = vrot.lane.b32.xlu1 %v1541_v38, %s7484_s8  ;;  %v7278_v38 = vld [vmem:[%s7575_s30 + $0x2c] ss:$0 sps:$4 sm:$0x11]   ;;  %v2328_v51 = vor.u32 %v2327_v54, %v2323_v34 }
  0xee   : > { %2553 = vrot.lane.b32.xlu0 %v2306_v46, %s7485_s11  ;;  %v8422_v20 = vpop.permute.xlu1 %1161  ;;  %v6515_v46 = vld [vmem:[%s7575_s30 + $0x3c] sm:$0xe]  ;;  %v2333_v29 = vsel %vm691_vm0, %v2328_v51, %v8442_v50  ;;  %v8467_v51 = vld [vmem:[%s7575_s30 + $0x44] ss:$0 sps:$4 sm:$0x33]  }
  0xef   : > { %v6731_v47 = vcombine.low %v6515_v46, %v6450_v21  ;;  %v6610_v21 = vcombine.low %v6362_v39, %v6363_v0 }
  0xf0   : > { %v8428_v18 = vpop.permute.xlu0 %1159  ;;  %1947 = vrot.lane.b32.xlu1 %v1892_v9, %s7483_s7  ;;  %v1529_v9 = vor.u32 %v1527_v55, %v8315_v40  ;;  %v2319_v40 = vshrl.u32 %v8333_v24, 16  ;;  %v10777_v55 = vrot.slane %v8289_v7, 1  ;;  %v6453_v7 = vld [vmem:[%s7575_s30 + $0x4c] sm:$0xf] }
  0xf1   : > { %v2682_v34 = vrot.slane %v6731_v47, 1  ;;  %v1548_v39 = vshll.u32 %v6610_v21, 16 }
  0xf2   : > { %2733 = vrot.lane.b32.xlu0 %v10771_v2, %s7488_s23  ;;  %v8440_v59 = vpop.permute.xlu1 %1165  ;;  %v2321_v46 = vor.u32 %v2319_v40, %v8358_v31 }
  0xf3   : > { %10772 = vst [vmem:[#allocation49_spill] sm:$0xff] %v8440_v59  ;;  %v2684_v47 = vsel %vm1088_vm1, %v2682_v34, %v10693_v26  ;;  %v1550_v34 = vrot.slane %v1548_v39, 1  ;;  %v1553_v26 = vshll.u32 %v8467_v51, 16 }
  0xf4   : > { %v8444_v17 = vpop.permute.xlu0 %1163  ;;  %1369 = vrot.lane.b32.xlu1 %v7278_v38, %s7482_s6 }
  0xf6   : > { %2163 = vrot.lane.b32.xlu0 %v6680_v8, %s7487_s18  ;;  %v8451_v19 = vpop.permute.xlu1 %1169 }
  0xf7   : > { %10773 = vst [vmem:[#allocation50_spill] sm:$0xff] %v8451_v19  ;;  %v2334_v19 = vshrl.u32 %v8413_v35, 16 }
  0xf8   : > { %v8456_v54 = vpop.permute.xlu0 %1167  ;;  %1765 = vrot.lane.b32.xlu1 %v1529_v9, %s7484_s8  ;;  %v7282_v9 = vld [vmem:[%s7575_s30 + $0x38] ss:$0 sps:$4 sm:$0x11]  }
  0xf9   : > { %10774 = vst [vmem:[#allocation51_spill] sm:$0xff] %v8456_v54 }
  0xfa   : > { %2559 = vrot.lane.b32.xlu0 %v2333_v29, %s7485_s11  ;;  %v8461_v8 = vpop.permute.xlu1 %1173  ;;  %v1546_v29 = vshrl.u32 %v6610_v21, 16 }
  0xfb   : > { %10775 = vst [vmem:[#allocation52_spill] sm:$0xff] %v8461_v8  ;;  %v6452_v8 = vld [vmem:[%s7575_s30 + $0x48] sm:$0xf] }
  0xfc   : > { %v8469_v38 = vpop.permute.xlu0 %1171  ;;  %1945 = vrot.lane.b32.xlu1 %v10777_v55, %s7483_s7  ;;  %v1551_v40 = vor.u32 %v1550_v34, %v1546_v29  ;;  %v6660_v55 = vcombine.low %v6426_v36, %v6363_v0  ;;  %v10694_v36 = vrot.slane %v8467_v51, 1  ;;  %v8505_v0 = vld [vmem:[%s7575_s30 + $0x50] ss:$0 sps:$4 sm:$0x33]  }
  0xfd   : > { %10776 = vst [vmem:[#allocation53_spill] sm:$0xff] %v8469_v38  ;;  %v10789_v38 = vrot.slane %v8365_v62, 1 }
  0xfe   : > { %2739 = vrot.lane.b32.xlu0 %v2684_v47, %s7488_s23  ;;  %v8476_v2 = vpop.permute.xlu1 %1177  ;;  %v8489_v47 = vrot.slane %v1553_v26, 1  ;;  %v1893_v26 = vrot.slane %v6660_v55, 1  ;;  %v2345_v55 = vshll.u32 %v8505_v0, 16 }
  0xff   : > { %10778 = vst [vmem:[#allocation54_spill] sm:$0xff] %v8476_v2  ;;  %v6682_v2 = vcombine.low %v6452_v8, %v6453_v7 }
 0x100   : > { %v8480_v61 = vpop.permute.xlu0 %1175  ;;  %2557 = vrot.lane.b32.xlu1 %v2321_v46, %s7485_s11  ;;  %v1542_v46 = vshrl.u32 %v8365_v62, 16  ;;  %v1895_v29 = vsel %vm1088_vm1, %v1893_v26, %v10694_v36 }
 0x101   : > { %10779 = vst [vmem:[#allocation55_spill] sm:$0xff] %v8480_v61  ;;  %v7284_v61 = vld [vmem:[%s7575_s30 + $0x38] ss:$0 sps:$4 sm:$0x11]   ;;  %v2338_v34 = vshrl.u32 %v6682_v2, 16 }
 0x102   : > { %2161 = vrot.lane.b32.xlu0 %v7282_v9, %s7487_s18  ;;  %v8487_v31 = vpop.permute.xlu1 %1181  ;;  %v1556_v9 = vsel %vm691_vm0, %v1551_v40, %v8489_v47 }
 0x103   : > { %10780 = vst [vmem:[#allocation56_spill] sm:$0xff] %v8487_v31 }
 0x104   : > { %v8491_v39 = vpop.permute.xlu0 %1179  ;;  %1375 = vrot.lane.b32.xlu1 %v6610_v21, %s7482_s6  ;;  %v2340_v21 = vshll.u32 %v6682_v2, 16 }
 0x105   : > { %10781 = vst [vmem:[#allocation57_spill] sm:$0xff] %v8491_v39 }
 0x106   : > { %2737 = vrot.lane.b32.xlu0 %v10782_v14, %s7488_s23  ;;  %v8499_v27 = vpop.permute.xlu1 %1185  ;;  %v1544_v14 = vor.u32 %v1542_v46, %v8391_v4  ;;  %v2342_v40 = vrot.slane %v2340_v21, 1  ;;  %v6366_v4 = vld [vmem:[%s7575_s30 + $0x4c] sm:$0xf] }
 0x107   : > { %10783 = vst [vmem:[#allocation58_spill] sm:$0xff] %v8499_v27  ;;  %v6365_v27 = vld [vmem:[%s7575_s30 + $0x48] sm:$0xf] }
 0x108   : > { %v8507_v8 = vpop.permute.xlu0 %1183  ;;  %1373 = vrot.lane.b32.xlu1 %v7284_v61, %s7482_s6  ;;  %v6516_v61 = vld [vmem:[%s7575_s30 + $0x48] sm:$0xe]  ;;  %v6612_v36 = vcombine.low %v6365_v27, %v6366_v4  ;;  %v10695_v27 = vrot.slane %v8505_v0, 1 }
 0x109   : > { %10784 = vst [vmem:[#allocation59_spill] sm:$0xff] %v8507_v8  ;;  %v6732_v26 = vcombine.low %v6516_v61, %v6453_v7 }
 0x10a   : > { %1771 = vrot.lane.b32.xlu0 %v1556_v9, %s7484_s8  ;;  %v8512_v24 = vpop.permute.xlu1 %1189  ;;  %v2343_v9 = vor.u32 %v2342_v40, %v2338_v34  ;;  %v8543_v40 = vld [vmem:[%s7575_s30 + $0x50] ss:$0 sps:$4 sm:$0x33]   ;;  %v1563_v62 = vshll.u32 %v6612_v36, 16  ;;  %v1561_v61 = vshrl.u32 %v6612_v36, 16 }
 0x10b   : > { %10785 = vst [vmem:[#allocation60_spill] sm:$0xff] %v8512_v24  ;;  %v8527_v24 = vrot.slane %v2345_v55, 1  ;;  %v2685_v7 = vrot.slane %v6732_v26, 1 }
 0x10c   : > { %v8518_v16 = vpop.permute.xlu0 %1187  ;;  %1769 = vrot.lane.b32.xlu1 %v1544_v14, %s7484_s8  ;;  %v7288_v14 = vld [vmem:[%s7575_s30 + $0x44] ss:$0 sps:$4 sm:$0x11]   ;;  %v1565_v26 = vrot.slane %v1563_v62, 1 }
 0x10d   : > { %10786 = vst [vmem:[#allocation61_spill] sm:$0xff] %v8518_v16  ;;  %v2348_v34 = vsel %vm691_vm0, %v2343_v9, %v8527_v24  ;;  %v2687_v9 = vsel %vm1088_vm1, %v2685_v7, %v10695_v27  ;;  %v7292_v7 = vld [vmem:[%s7575_s30 + $0x44] ss:$0 sps:$4 sm:$0x11]  }
 0x10e   : > { %1951 = vrot.lane.b32.xlu0 %v1895_v29, %s7483_s7  ;;  %v8525_v46 = vpop.permute.xlu1 %1193  ;;  %v1566_v62 = vor.u32 %v1565_v26, %v1561_v61  ;;  %v10696_v61 = vrot.slane %v8543_v40, 1  ;;  %v8588_v26 = vld [vmem:[%s7575_s30 + $0x80] ss:$0 sps:$4 sm:$0x33]  }
 0x10f   : > { %10787 = vst [vmem:[#allocation62_spill] sm:$0xff] %v8525_v46  ;;  %v6377_v46 = vld [vmem:[%s7575_s30 + $0x78] sm:$0xf] }
 0x110   : > { %v8529_v21 = vpop.permute.xlu0 %1191  ;;  %1949 = vrot.lane.b32.xlu1 %v10789_v38, %s7483_s7 }
 0x111   : > { %10788 = vst [vmem:[#allocation63_spill] sm:$0xff] %v8529_v21 }
 0x112   : > { %2167 = vrot.lane.b32.xlu0 %v6682_v2, %s7487_s18  ;;  %v8537_v29 = vpop.permute.xlu1 %1197  ;;  %v2336_v2 = vor.u32 %v2334_v19, %v8442_v50  ;;  %v6427_v19 = vld [vmem:[%s7575_s30 + $0x48] sm:$0xe] }
 0x113   : > { %10790 = vst [vmem:[#allocation64_spill] sm:$0xff] %v8537_v29  ;;  %v1568_v29 = vshll.u32 %v8543_v40, 16 }
 0x114   : > { %v8545_v38 = vpop.permute.xlu0 %1195  ;;  %2165 = vrot.lane.b32.xlu1 %v7288_v14, %s7487_s18 }
 0x115   : > { %10791 = vst [vmem:[#allocation65_spill] sm:$0xff] %v8545_v38  ;;  %v8558_v38 = vld [vmem:[%s7575_s30 + $0x7c] sm:$0xf]  ;;  %v8569_v27 = vrot.slane %v1568_v29, 1 }
 0x116   : > { %2563 = vrot.lane.b32.xlu0 %v2348_v34, %s7485_s11  ;;  %v8550_v55 = vpop.permute.xlu1 %1201  ;;  %v6620_v34 = vcombine.low %v6377_v46, %v8558_v38 }
 0x117   : > { %10792 = vst [vmem:[#allocation66_spill] sm:$0xff] %v8550_v55  ;;  %v6661_v55 = vcombine.low %v6427_v19, %v6366_v4  ;;  %v1571_v29 = vsel %vm691_vm0, %v1566_v62, %v8569_v27  ;;  %v6380_v62 = vld [vmem:[%s7575_s30 + $0x84] sm:$0xf] }
 0x118   : > { %v8560_v14 = vpop.permute.xlu0 %1199  ;;  %2561 = vrot.lane.b32.xlu1 %v2336_v2, %s7485_s11  ;;  %v10796_v2 = vrot.slane %v8413_v35, 1  ;;  %v1557_v35 = vshrl.u32 %v8467_v51, 16 }
 0x119   : > { %10793 = vst [vmem:[#allocation67_spill] sm:$0xff] %v8560_v14  ;;  %v6455_v14 = vld [vmem:[%s7575_s30 + $0x54] sm:$0xf]  ;;  %v1896_v4 = vrot.slane %v6661_v55, 1  ;;  %v8597_v55 = vld [vmem:[%s7575_s30 + $0x88] sm:$0xf] }
 0x11a   : > { %2743 = vrot.lane.b32.xlu0 %v2687_v9, %s7488_s23  ;;  %v8565_v50 = vpop.permute.xlu1 %1205  ;;  %v1623_v9 = vshll.u32 %v6620_v34, 16  ;;  %v6622_v1 = vcombine.low %v6380_v62, %v8597_v55 }
 0x11b   : > { %10794 = vst [vmem:[#allocation68_spill] sm:$0xff] %v8565_v50 }
 0x11c   : > { %v8571_v21 = vpop.permute.xlu0 %1203  ;;  %1379 = vrot.lane.b32.xlu1 %v6612_v36, %s7482_s6  ;;  %v6684_v36 = vcombine.low %v6455_v14, %v8576_v13  ;;  %v1625_v50 = vrot.slane %v1623_v9, 1  ;;  %v1898_v14 = vsel %vm1088_vm1, %v1896_v4, %v10696_v61  ;;  %v1559_v61 = vor.u32 %v1557_v35, %v8489_v47 }
 0x11d   : > { %10795 = vst [vmem:[#allocation69_spill] sm:$0xff] %v8571_v21  ;;  %v1628_v21 = vshll.u32 %v8588_v26, 16  ;;  %v6665_v47 = vcombine.low %v6431_v45, %v8558_v38  ;;  %v6517_v45 = vld [vmem:[%s7575_s30 + $0x54] sm:$0xe] }
 0x11e   : > { %2741 = vrot.lane.b32.xlu0 %v10796_v2, %s7488_s23  ;;  %v8581_v46 = vpop.permute.xlu1 %1209  ;;  %v2353_v31 = vshrl.u32 %v6684_v36, 16 }
 0x11f   : > { %10797 = vst [vmem:[#allocation70_spill] sm:$0xff] %v8581_v46  ;;  %v1621_v46 = vshrl.u32 %v6620_v34, 16 }
 0x120   : > { %v8590_v19 = vpop.permute.xlu0 %1207  ;;  %1377 = vrot.lane.b32.xlu1 %v7292_v7, %s7482_s6 }
 0x121   : > { %10798 = vst [vmem:[#allocation71_spill] sm:$0xff] %v8590_v19  ;;  %v2355_v19 = vshll.u32 %v6684_v36, 16  ;;  %v1626_v16 = vor.u32 %v1625_v50, %v1621_v46  ;;  %v6467_v50 = vld [vmem:[%s7575_s30 + $0x84] sm:$0xf]  ;;  %v8622_v46 = vld [vmem:[%s7575_s30 + $0x88] sm:$0xf] }
 0x122   : > { %1775 = vrot.lane.b32.xlu0 %v1571_v29, %s7484_s8  ;;  %v1360_v2 = vpop.permute.xlu1 %1359  ;;  %v10800_v29 = vld [vmem:[#allocation5_spill] sm:$0xff]  ;;  %v8633_v38 = vcombine.low %v6467_v50, %v8622_v46  ;;  %v8649_v50 = vld [vmem:[%s7575_s30 + $0x8c] ss:$0 sps:$4 sm:$0x33]  }
 0x123   : > { %v2801_v9 = vsel %vm2799_vm4, %v10800_v29, %v8115_v11  ;;  %v8615_v29 = vrot.slane %v1628_v21, 1  ;;  %v2357_v62 = vrot.slane %v2355_v19, 1 }
 0x124   : > { %v8603_v7 = vpop.permute.xlu0 %1211  ;;  %1395 = vrot.lane.b32.xlu1 %v6620_v34, %s7482_s6  ;;  %v2892_v11 = vsel %vm2890_vm5, %v2801_v9, %v8373_v28  ;;  %v1638_v28 = vshll.u32 %v6622_v1, 16  ;;  %v10801_v9 = vrot.slane %v8467_v51, 1  ;;  %v6733_v51 = vcombine.low %v6517_v45, %v8576_v13 }
 0x125   : > { %10799 = vst [vmem:[#allocation72_spill] sm:$0xff] %v8603_v7  ;;  %v7490_v7 = vmov 1966171168   ;;  %v2965_v54 = vsel %vm2963_vm6, %v2892_v11, %v1360_v2  ;;  %v3442_v2 = vshrl.u32 %v3441_v5, 7  ;;  %v10697_v5 = vrot.slane %v8588_v26, 1 }
 0x126   : > { %1955 = vrot.lane.b32.xlu0 %v1898_v14, %s7483_s7  ;;  %v1936_v4 = vpop.permute.xlu1 %1935  ;;  %v3439_v34 = vunpack.c.l.s4 %v7490_v7  ;;  %v8626_v14 = vld [vmem:[%s7575_s30 + $0x8c] ss:$0 sps:$4 sm:$0x33]   ;;  %v2358_v7 = vor.u32 %v2357_v62, %v2353_v31  ;;  %v1636_v31 = vshrl.u32 %v6622_v1, 16 }
 0x127   : > { %v1643_v11 = vshll.u32 %v8626_v14, 16 }
 0x128   : > { %v1756_v59 = vpop.permute.xlu0 %1755  ;;  %2171 = vrot.lane.b32.xlu1 %v6684_v36, %s7487_s18  ;;  %v3440_v19 = vunpack.c.0.s8 %v3439_v34  ;;  %v1631_v36 = vsel %vm691_vm0, %v1626_v16, %v8615_v29  ;;  %v1640_v34 = vrot.slane %v1638_v28, 1 }
 0x129   : > { %v3038_v35 = vsel %vm3036_vm7, %v2965_v54, %v1756_v59 }
 0x12a   : > { %1773 = vrot.lane.b32.xlu0 %v1559_v61, %s7484_s8  ;;  %v2548_v21 = vpop.permute.xlu1 %2547  ;;  %v3111_v59 = vsel %vm3109_vm8, %v3038_v35, %v1936_v4  ;;  %v1908_v61 = vrot.slane %v6665_v47, 1  ;;  %v8643_v62 = vsub.s32 %v3440_v19, %v3442_v2  ;;  %v2363_v47 = vsel %vm691_vm0, %v2358_v7, %v8424_v44 }
 0x12b   : > { %v2415_v35 = vshll.u32 %v8633_v38, 16  ;;  %v1641_v19 = vor.u32 %v1640_v34, %v1636_v31  ;;  %v8659_v2 = vrot.slane %v1643_v11, 1 }
 0x12c   : > { %v2152_v54 = vpop.permute.xlu0 %2151  ;;  %1953 = vrot.lane.b32.xlu1 %v10801_v9, %s7483_s7  ;;  %v1910_v13 = vsel %vm1088_vm1, %v1908_v61, %v10697_v5  ;;  %v2420_v61 = vshll.u32 %v8649_v50, 16 }
 0x12d   : > { %v3184_v16 = vsel %vm3182_vm9, %v3111_v59, %v2152_v54 }
 0x12e   : > { %1791 = vrot.lane.b32.xlu0 %v1631_v36, %s7484_s8  ;;  %v1364_v4 = vpop.permute.xlu1 %1363  ;;  %v3257_v28 = vsel %vm3255_vm10, %v3184_v16, %v2548_v21  ;;  %v7300_v36 = vld [vmem:[%s7575_s30 + $0x50] ss:$0 sps:$4 sm:$0x11]   ;;  %v2688_v21 = vrot.slane %v6733_v51, 1  ;;  %v2349_v16 = vshrl.u32 %v8505_v0, 16  ;;  %v10802_v51 = vld [vmem:[#allocation8_spill] sm:$0xff] }
 0x130   : > { %v2728_v59 = vpop.permute.xlu0 %2727  ;;  %1399 = vrot.lane.b32.xlu1 %v6622_v1, %s7482_s6  ;;  %v6432_v1 = vld [vmem:[%s7575_s30 + $0x84] sm:$0xe] }
 0x131   : > { %v3330_v54 = vsel %vm3328_vm11, %v3257_v28, %v2728_v59  ;;  %v2413_v28 = vshrl.u32 %v8633_v38, 16  ;;  %v2417_v59 = vrot.slane %v2415_v35, 1  ;;  %v6666_v5 = vcombine.low %v6432_v1, %v8597_v55 }
 0x132   : > { %v3437_v44 = vcombine.high %v3330_v54, %v3330_v54  ;;  %v3444_v7 = vrot.slane %v3330_v54, %v8643_v62  ;;  %2567 = vrot.lane.b32.xlu0 %v2363_v47, %s7485_s11  ;;  %v1940_v45 = vpop.permute.xlu1 %1939  ;;  %v2806_v47 = vsel %vm2799_vm4, %v10802_v51, %v8149_v58  ;;  %v1646_v54 = vsel %vm691_vm0, %v1641_v19, %v8659_v2  ;;  %v6368_v58 = vld [vmem:[%s7575_s30 + $0x54] sm:$0xf]  ;;  %v8686_v51 = vld [vmem:[%s7575_s30 + $0x58] sm:$0xf] }
 0x133   : > { %v2896_v55 = vsel %vm2890_vm5, %v2806_v47, %v8384_v25  ;;  %v2351_v19 = vor.u32 %v2349_v16, %v8527_v24  ;;  %v8691_v1 = vrot.slane %v2420_v61, 1  ;;  %v1911_v39 = vrot.slane %v6666_v5, 1 }
 0x134   : > { %v3451_v31 = vrot.slane %v3437_v44, %v8643_v62  ;;  %v3452_v34 = vcombine.high %v3444_v7, %v3444_v7  ;;  %v1760_v11 = vpop.permute.xlu0 %1759  ;;  %2169 = vrot.lane.b32.xlu1 %v7300_v36, %s7487_s18  ;;  %v3460_v35 = vrot.slane %v3444_v7, %v8643_v62  ;;  %v10803_v36 = vrot.slane %v8399_v37, 1 }
 0x135   : > { %v2418_v7 = vor.u32 %v2417_v59, %v2413_v28  ;;  %v10698_v25 = vrot.slane %v8626_v14, 1  ;;  %v6614_v24 = vcombine.low %v6368_v58, %v8686_v51 }
 0x136   : > { %v3453_v9 = vcombine.high %v3451_v31, %v3451_v31  ;;  %v3474_v48 = vrot.slane %v3452_v34, %v8643_v62  ;;  %1971 = vrot.lane.b32.xlu0 %v1910_v13, %s7483_s7  ;;  %v8679_v44 = vpop.permute.xlu1 %1361  ;;  %v2690_v32 = vsel %vm1088_vm1, %v2688_v21, %v10803_v36  ;;  %v3467_v34 = vrot.slane %v3451_v31, %v8643_v62  ;;  %v6521_v21 = vld [vmem:[%s7575_s30 + $0x84] sm:$0xe] }
 0x137   : > { %v2969_v36 = vsel %vm2963_vm6, %v2896_v55, %v1364_v4  ;;  %v6737_v5 = vcombine.low %v6521_v21, %v8622_v46  ;;  %v1578_v58 = vshll.u32 %v6614_v24, 16  ;;  %v1913_v55 = vsel %vm1088_vm1, %v1911_v39, %v10698_v25  ;;  %v7229_v39 = vld [vmem:[%s7575_s30 + $0x8] ss:$0 sps:$4 sm:$0x11]  }
 0x138   : > { %v3481_v13 = vrot.slane %v3453_v9, %v8643_v62  ;;  %v4576_v12 = vcombine.low %v3460_v35, %v3474_v48  ;;  %v6746_v8 = vcombine.high %v3460_v35, %v3474_v48  ;;  %v2156_v60 = vpop.permute.xlu0 %2155  ;;  %1795 = vrot.lane.b32.xlu1 %v1646_v54, %s7484_s8  ;;  %v3042_v4 = vsel %vm3036_vm7, %v2969_v36, %v1760_v11  ;;  %v6470_v35 = vld [vmem:[%s7575_s30 + $0x90] sm:$0xf] }
 0x139   : > { %v3115_v46 = vsel %vm3109_vm8, %v3042_v4, %v1940_v45 }
 0x13a   : > { %v4578_v16 = vcombine.low %v3467_v34, %v3481_v13  ;;  %v6747_v28 = vcombine.high %v3467_v34, %v3481_v13  ;;  %v4586_v9 = vrot.slane %v4576_v12, %v8643_v62  ;;  %v4593_v48 = vrot.slane %v6746_v8, %v8643_v62  ;;  %2747 = vrot.lane.b32.xlu0 %v2690_v32, %s7488_s23  ;;  %v8703_v59 = vpop.permute.xlu1 %1757  ;;  %v8712_v12 = vld [vmem:[%s7575_s30 + $0x94] sm:$0xf]  ;;  %v8717_v8 = vld [vmem:[%s7575_s30 + $0x5c] ss:$0 sps:$4 sm:$0x33]  }
 0x13b   : > { %v2423_v32 = vsel %vm691_vm0, %v2418_v7, %v8691_v1  ;;  %v3188_v34 = vsel %vm3182_vm9, %v3115_v46, %v2156_v60  ;;  %v2700_v13 = vrot.slane %v6737_v5, 1  ;;  %v6694_v7 = vcombine.low %v6470_v35, %v8712_v12 }
 0x13c   : > { %v4600_v61 = vrot.slane %v4578_v16, %v8643_v62  ;;  %v4607_v31 = vrot.slane %v6747_v28, %v8643_v62  ;;  %v4608_v47 = vcombine.low %v4586_v9, %v4593_v48  ;;  %v2552_v54 = vpop.permute.xlu0 %2551  ;;  %2565 = vrot.lane.b32.xlu1 %v2351_v19, %s7485_s11  ;;  %v10699_v16 = vrot.slane %v8649_v50, 1 }
 0x13d   : > { %v3261_v21 = vsel %vm3255_vm10, %v3188_v34, %v2552_v54  ;;  %v1576_v60 = vshrl.u32 %v6614_v24, 16  ;;  %v1580_v9 = vrot.slane %v1578_v58, 1  ;;  %v1583_v48 = vshll.u32 %v8717_v8, 16 }
 0x13e   : > { %2187 = vrot.lane.b32.xlu0 %v8633_v38, %s7487_s18  ;;  %v1938_v11 = vpop.permute.xlu1 %1937  ;;  %v4609_v19 = vcombine.low %v4600_v61, %v4607_v31  ;;  %v4616_v38 = vrot.slane %v4608_v47, %v8643_v62  ;;  %v8740_v47 = vld [vmem:[%s7575_s30 + $0x98] ss:$0 sps:$4 sm:$0x33]   ;;  %v2430_v54 = vshll.u32 %v6694_v7, 16  ;;  %v2804_v46 = vsel %vm2799_vm4, %v7229_v39, %v8107_v52 }
 0x13f   : > { %v8750_v34 = vrot.slane %v1583_v48, 1  ;;  %v10805_v52 = vrot.slane %v8505_v0, 1 }
 0x140   : > { %v2732_v36 = vpop.permute.xlu0 %2731  ;;  %2583 = vrot.lane.b32.xlu1 %v2423_v32, %s7485_s11  ;;  %v4623_v45 = vrot.slane %v4609_v19, %v8643_v62  ;;  %v1581_v19 = vor.u32 %v1580_v9, %v1576_v60  ;;  %v2428_v60 = vshrl.u32 %v6694_v7, 16  ;;  %v2432_v9 = vrot.slane %v2430_v54, 1 }
 0x141   : > { %v3334_v28 = vsel %vm3328_vm11, %v3261_v21, %v2732_v36  ;;  %v10804_v21 = vmov 0.0   ;;  %v2894_v36 = vsel %vm2890_vm5, %v2804_v46, %v8368_v56  ;;  %v2435_v56 = vshll.u32 %v8740_v47, 16 }
 0x142   : > { %v3500_v4 = vcombine.high %v3334_v28, %v3334_v28  ;;  %v3507_v5 = vrot.slane %v3334_v28, %v8643_v62  ;;  %1975 = vrot.lane.b32.xlu0 %v1913_v55, %s7483_s7  ;;  %v8737_v61 = vpop.permute.xlu1 %1367  ;;  %v4624_v31 = vcombine.low %v4616_v38, %v4623_v45  ;;  %v2702_v55 = vsel %vm1088_vm1, %v2700_v13, %v10699_v16  ;;  %v6428_v13 = vld [vmem:[%s7575_s30 + $0x54] sm:$0xe] }
 0x143   : > { %v2967_v28 = vsel %vm2963_vm6, %v2894_v36, %v8679_v44  ;;  %v1586_v44 = vsel %vm691_vm0, %v1581_v19, %v8750_v34  ;;  %v6662_v54 = vcombine.low %v6428_v13, %v8686_v51  ;;  %v7314_v36 = vld [vmem:[%s7575_s30 + $0x80] ss:$0 sps:$4 sm:$0x11]   ;;  %v8781_v25 = vrot.slane %v2435_v56, 1 }
 0x144   : > { %v3514_v35 = vrot.slane %v3500_v4, %v8643_v62  ;;  %v3515_v32 = vcombine.high %v3507_v5, %v3507_v5  ;;  %7024 = vmatmul.mubr.msk.bf16.vlgmr.msra.gmra.mrb[0].mxu0 %vm5586_vm12, %v4624_v31  ;;  %v2154_v58 = vpop.permute.xlu0 %2153  ;;  %1383 = vrot.lane.b32.xlu1 %v6614_v24, %s7482_s6  ;;  %v3523_v48 = vrot.slane %v3507_v5, %v8643_v62  ;;  %v7315_v51 = vld [vmem:[%s7575_s30 + $0x50] ss:$0 sps:$4 sm:$0x11]  }
 0x145   : > { %7027 = vmatprep.mubr.msk.bf16.mxu0 %vm7489_vm3, %v10804_v21 }
 0x146   : > { %v3516_v38 = vcombine.high %v3514_v35, %v3514_v35  ;;  %v3530_v45 = vrot.slane %v3514_v35, %v8643_v62  ;;  %v3537_v24 = vrot.slane %v3515_v32, %v8643_v62  ;;  %2745 = vrot.lane.b32.xlu0 %v10805_v52, %s7488_s23  ;;  %v8761_v39 = vpop.permute.xlu1 %1763  ;;  %v3040_v32 = vsel %vm3036_vm7, %v2967_v28, %v8703_v59 }
 0x147   : > { %v3113_v5 = vsel %vm3109_vm8, %v3040_v32, %v1938_v11  ;;  %v2433_v52 = vor.u32 %v2432_v9, %v2428_v60  ;;  %v3545_v16 = vcombine.high %v3523_v48, %v3523_v48  ;;  %v1632_v60 = vshrl.u32 %v8588_v26, 16 }
 0x148   : > { %v8769_v4 = vrot.slane %v3516_v38, %v8643_v62  ;;  %v3546_v31 = vcombine.high %v3530_v45, %v3530_v45  ;;  %v3547_v0 = vcombine.high %v3537_v24, %v3537_v24  ;;  %v2550_v35 = vpop.permute.xlu0 %2549  ;;  %2763 = vrot.lane.b32.xlu1 %v2702_v55, %s7488_s23  ;;  %v3186_v38 = vsel %vm3182_vm9, %v3113_v5, %v2154_v58  ;;  %v6522_v55 = vld [vmem:[%s7575_s30 + $0x90] sm:$0xe]  ;;  %v8805_v5 = vld [vmem:[%s7575_s30 + $0x64] sm:$0xf] }
 0x149   : > { %v3259_v19 = vsel %vm3255_vm10, %v3186_v38, %v2550_v35  ;;  %v1900_v58 = vrot.slane %v8717_v8, 1  ;;  %v6738_v9 = vcombine.low %v6522_v55, %v8712_v12  ;;  %v2438_v56 = vsel %vm691_vm0, %v2433_v52, %v8781_v25 }
 0x14a   : > { %2191 = vrot.lane.b32.xlu0 %v6694_v7, %s7487_s18  ;;  %v1944_v46 = vpop.permute.xlu1 %1943  ;;  %v4627_v59 = vcombine.low %v3547_v0, %v3530_v45  ;;  %v4628_v28 = vcombine.low %v8769_v4, %v3546_v31  ;;  %v1899_v7 = vrot.slane %v6662_v54, 1  ;;  %v4626_v31 = vcombine.low %v3537_v24, %v3545_v16  ;;  %v6458_v54 = vld [vmem:[%s7575_s30 + $0x60] sm:$0xf] }
 0x14b   : > { %v1634_v52 = vor.u32 %v1632_v60, %v8615_v29  ;;  %v2703_v55 = vrot.slane %v6738_v9, 1  ;;  %v6383_v9 = vld [vmem:[%s7575_s30 + $0x90] sm:$0xf] }
 0x14c   : > { %v2730_v10 = vpop.permute.xlu0 %2729  ;;  %1779 = vrot.lane.b32.xlu1 %v1586_v44, %s7484_s8  ;;  %v4649_v0 = vrot.slane %v4627_v59, %v8643_v62  ;;  %v4656_v35 = vrot.slane %v4628_v28, %v8643_v62  ;;  %v1901_v12 = vsel %vm1088_vm1, %v1899_v7, %v1900_v58 }
 0x14d   : > { %v3332_v11 = vsel %vm3328_vm11, %v3259_v19, %v2730_v10  ;;  %v1572_v10 = vshrl.u32 %v8543_v40, 16  ;;  %v2704_v19 = vrot.slane %v8740_v47, 1 }
 0x14e   : > { %v3492_v13 = vrot.slane %v3332_v11, %v8643_v62  ;;  %1397 = vrot.lane.b32.xlu0 %v7314_v36, %s7482_s6  ;;  %v8792_v45 = vpop.permute.xlu1 %1365  ;;  %v10806_v36 = vld [vmem:[#allocation6_spill] sm:$0xff]  ;;  %v4658_v7 = vcombine.low %v4649_v0, %v4656_v35 }
 0x14f   : > { %v2811_v16 = vsel %vm2799_vm4, %v10806_v36, %v8123_v15  ;;  %v1574_v28 = vor.u32 %v1572_v10, %v8569_v27  ;;  %v4642_v15 = vrot.slane %v4626_v31, %v8643_v62  ;;  %v2705_v10 = vsel %vm1088_vm1, %v2703_v55, %v2704_v19  ;;  %v8840_v31 = vld [vmem:[%s7575_s30 + $0x68] ss:$0 sps:$4 sm:$0x33]  }
 0x150   : > { %v3499_v32 = vrot.slane %v3492_v13, %v8643_v62  ;;  %v2160_v44 = vpop.permute.xlu0 %2159  ;;  %1381 = vrot.lane.b32.xlu1 %v7315_v51, %s7482_s6  ;;  %v2900_v59 = vsel %vm2890_vm5, %v2811_v16, %v8401_v22  ;;  %v6686_v51 = vcombine.low %v6458_v54, %v8805_v5 }
 0x152   : > { %v4625_v24 = vcombine.low %v3499_v32, %v3523_v48  ;;  %2587 = vrot.lane.b32.xlu0 %v2438_v56, %s7485_s11  ;;  %v8814_v38 = vpop.permute.xlu1 %1761  ;;  %v2973_v48 = vsel %vm2963_vm6, %v2900_v59, %v8737_v61  ;;  %v8833_v56 = vld [vmem:[%s7575_s30 + $0x94] sm:$0xf]  ;;  %v2370_v0 = vshll.u32 %v6686_v51, 16  ;;  %v4672_v32 = vrot.slane %v4658_v7, %v8643_v62 }
 0x153   : > { %v3046_v22 = vsel %vm3036_vm7, %v2973_v48, %v8761_v39  ;;  %v2368_v55 = vshrl.u32 %v6686_v51, 16 }
 0x154   : > { %v4635_v29 = vrot.slane %v4625_v24, %v8643_v62  ;;  %v2556_v11 = vpop.permute.xlu0 %2555  ;;  %1959 = vrot.lane.b32.xlu1 %v1901_v12, %s7483_s7  ;;  %v3119_v27 = vsel %vm3109_vm8, %v3046_v22, %v1944_v46  ;;  %v7228_v12 = vld [vmem:[%s7575_s30 + $0x14] ss:$0 sps:$4 sm:$0x11]   ;;  %v2372_v59 = vrot.slane %v2370_v0, 1 }
 0x155   : > { %v3192_v61 = vsel %vm3182_vm9, %v3119_v27, %v2160_v44  ;;  %v6624_v44 = vcombine.low %v6383_v9, %v8833_v56  ;;  %v2809_v22 = vsel %vm2799_vm4, %v7228_v12, %v8105_v23  ;;  %v10807_v9 = vrot.slane %v8588_v26, 1 }
 0x156   : > { %v4657_v13 = vcombine.low %v4635_v29, %v4642_v15  ;;  %1793 = vrot.lane.b32.xlu0 %v1634_v52, %s7484_s8  ;;  %v1942_v60 = vpop.permute.xlu1 %1941  ;;  %v3265_v39 = vsel %vm3255_vm10, %v3192_v61, %v2556_v11  ;;  %v7320_v29 = vld [vmem:[%s7575_s30 + $0x8c] ss:$0 sps:$4 sm:$0x11]   ;;  %v8859_v11 = vld [vmem:[%s7575_s30 + $0x98] ss:$0 sps:$4 sm:$0x33]  }
 0x157   : > { %v1653_v7 = vshll.u32 %v6624_v44, 16  ;;  %v2424_v26 = vshrl.u32 %v8649_v50, 16  ;;  %v1658_v12 = vshll.u32 %v8859_v11, 16 }
 0x158   : > { %v2736_v46 = vpop.permute.xlu0 %2735  ;;  %1777 = vrot.lane.b32.xlu1 %v1574_v28, %s7484_s8  ;;  %v4665_v35 = vrot.slane %v4657_v13, %v8643_v62  ;;  %v2375_v28 = vshll.u32 %v8840_v31, 16 }
 0x159   : > { %v3338_v54 = vsel %vm3328_vm11, %v3265_v39, %v2736_v46 }
 0x15a   : > { %v3563_v36 = vcombine.high %v3338_v54, %v3338_v54  ;;  %v3570_v16 = vrot.slane %v3338_v54, %v8643_v62  ;;  %2767 = vrot.lane.b32.xlu0 %v2705_v10, %s7488_s23  ;;  %v8851_v24 = vpop.permute.xlu1 %1371  ;;  %v4673_v52 = vcombine.low %v4665_v35, %v4672_v32  ;;  %v2373_v10 = vor.u32 %v2372_v59, %v2368_v55  ;;  %v6518_v35 = vld [vmem:[%s7575_s30 + $0x60] sm:$0xe] }
 0x15b   : > { %v8872_v0 = vrot.slane %v2375_v28, 1  ;;  %v1651_v54 = vshrl.u32 %v6624_v44, 16  ;;  %v10808_v55 = vrot.slane %v8543_v40, 1  ;;  %v2426_v40 = vor.u32 %v2424_v26, %v8691_v1 }
 0x15c   : > { %v3577_v15 = vrot.slane %v3563_v36, %v8643_v62  ;;  %7028 = vmatmul.mubr.msk.bf16.gmra.mrb[4].mxu0 %vm5586_vm12, %v4673_v52  ;;  %v2158_v48 = vpop.permute.xlu0 %2157  ;;  %2175 = vrot.lane.b32.xlu1 %v6686_v51, %s7487_s18  ;;  %v3578_v27 = vcombine.high %v3570_v16, %v3570_v16  ;;  %v2898_v51 = vsel %vm2890_vm5, %v2809_v22, %v8378_v43  ;;  %v1655_v43 = vrot.slane %v1653_v7, 1 }
 0x15d   : > { %7031 = vmatprep.mubr.msk.bf16.mxu0 %vm7489_vm3, %v10804_v21  ;;  %v2971_v39 = vsel %vm2963_vm6, %v2898_v51, %v8792_v45  ;;  %v7323_v51 = vld [vmem:[%s7575_s30 + $0x5c] ss:$0 sps:$4 sm:$0x11]   ;;  %v3548_v26 = vcombine.high %v8769_v4, %v8769_v4 }
 0x15e   : > { %v3579_v13 = vcombine.high %v3577_v15, %v3577_v15  ;;  %1973 = vrot.lane.b32.xlu0 %v10807_v9, %s7483_s7  ;;  %v8868_v61 = vpop.permute.xlu1 %1767  ;;  %v3044_v32 = vsel %vm3036_vm7, %v2971_v39, %v8814_v38  ;;  %v8887_v45 = vrot.slane %v3577_v15, %v8643_v62  ;;  %v3600_v52 = vrot.slane %v3578_v27, %v8643_v62 }
 0x15f   : > { %v3117_v36 = vsel %vm3109_vm8, %v3044_v32, %v1942_v60  ;;  %v2378_v38 = vsel %vm691_vm0, %v2373_v10, %v8872_v0  ;;  %v3586_v60 = vrot.slane %v3570_v16, %v8643_v62  ;;  %v1656_v27 = vor.u32 %v1655_v43, %v1651_v54  ;;  %v6433_v10 = vld [vmem:[%s7575_s30 + $0x90] sm:$0xe]  ;;  %v6473_v54 = vld [vmem:[%s7575_s30 + $0x9c] sm:$0xf]  ;;  %v8918_v43 = vld [vmem:[%s7575_s30 + $0xa0] sm:$0xf] }
 0x160   : > { %v8877_v46 = vrot.slane %v3579_v13, %v8643_v62  ;;  %v2554_v23 = vpop.permute.xlu0 %2553  ;;  %2189 = vrot.lane.b32.xlu1 %v7320_v29, %s7487_s18  ;;  %v3190_v28 = vsel %vm3182_vm9, %v3117_v36, %v2158_v48  ;;  %v6734_v29 = vcombine.low %v6518_v35, %v8805_v5  ;;  %v8904_v13 = vrot.slane %v1658_v12, 1 }
 0x161   : > { %v3263_v7 = vsel %vm3255_vm10, %v3190_v28, %v2554_v23  ;;  %v6748_v5 = vcombine.high %v3586_v60, %v3600_v52  ;;  %v4675_v1 = vcombine.low %v3586_v60, %v3600_v52  ;;  %v6667_v36 = vcombine.low %v6433_v10, %v8833_v56  ;;  %v10809_v52 = vld [vmem:[#allocation7_spill] sm:$0xff] }
 0x162   : > { %1957 = vrot.lane.b32.xlu0 %v10808_v55, %s7483_s7  ;;  %v1948_v59 = vpop.permute.xlu1 %1947  ;;  %v4677_v15 = vcombine.low %v8887_v45, %v8877_v46  ;;  %v2691_v39 = vrot.slane %v6734_v29, 1  ;;  %v1661_v12 = vsel %vm691_vm0, %v1656_v27, %v8904_v13  ;;  %v2816_v55 = vsel %vm2799_vm4, %v10809_v52, %v8139_v3  ;;  %v7231_v29 = vld [vmem:[%s7575_s30 + $0x20] ss:$0 sps:$4 sm:$0x11]  }
 0x163   : > { %v4698_v28 = vrot.slane %v6748_v5, %v8643_v62  ;;  %v2904_v60 = vsel %vm2890_vm5, %v2816_v55, %v8415_v30  ;;  %v8935_v56 = vcombine.low %v6473_v54, %v8918_v43  ;;  %v4691_v3 = vrot.slane %v4675_v1, %v8643_v62  ;;  %v8951_v1 = vld [vmem:[%s7575_s30 + $0xa4] ss:$0 sps:$4 sm:$0x33]  }
 0x164   : > { %v2734_v22 = vpop.permute.xlu0 %2733  ;;  %1403 = vrot.lane.b32.xlu1 %v6624_v44, %s7482_s6  ;;  %v2692_v44 = vrot.slane %v8840_v31, 1  ;;  %v4705_v23 = vrot.slane %v4677_v15, %v8643_v62  ;;  %v1914_v27 = vrot.slane %v6667_v36, 1  ;;  %v1915_v5 = vrot.slane %v8859_v11, 1 }
 0x165   : > { %v3336_v48 = vsel %vm3328_vm11, %v3263_v7, %v2734_v22  ;;  %v2977_v22 = vsel %vm2963_vm6, %v2904_v60, %v8851_v24  ;;  %v2814_v24 = vsel %vm2799_vm4, %v7231_v29, %v8113_v57  ;;  %v2443_v29 = vshrl.u32 %v8935_v56, 16 }
 0x166   : > { %v3555_v16 = vrot.slane %v3336_v48, %v8643_v62  ;;  %2571 = vrot.lane.b32.xlu0 %v2378_v38, %s7485_s11  ;;  %v1370_v9 = vpop.permute.xlu1 %1369  ;;  %v2693_v15 = vsel %vm1088_vm1, %v2691_v39, %v2692_v44  ;;  %v4707_v7 = vcombine.low %v4698_v28, %v4705_v23  ;;  %v3050_v30 = vsel %vm3036_vm7, %v2977_v22, %v8868_v61 }
 0x167   : > { %v2445_v23 = vshll.u32 %v8935_v56, 16  ;;  %v2902_v61 = vsel %vm2890_vm5, %v2814_v24, %v8395_v41  ;;  %v1916_v41 = vsel %vm1088_vm1, %v1914_v27, %v1915_v5  ;;  %v10811_v22 = vrot.slane %v8399_v37, 1 }
 0x168   : > { %v3562_v35 = vrot.slane %v3555_v16, %v8643_v62  ;;  %v2164_v32 = vpop.permute.xlu0 %2163  ;;  %2585 = vrot.lane.b32.xlu1 %v2426_v40, %s7485_s11  ;;  %v3123_v16 = vsel %vm3109_vm8, %v3050_v30, %v1948_v59  ;;  %v4721_v57 = vrot.slane %v4707_v7, %v8643_v62  ;;  %v1647_v37 = vshrl.u32 %v8626_v14, 16 }
 0x169   : > { %v3196_v39 = vsel %vm3182_vm9, %v3123_v16, %v2164_v32  ;;  %v2975_v32 = vsel %vm2963_vm6, %v2902_v61, %v1370_v9  ;;  %v2447_v60 = vrot.slane %v2445_v23, 1  ;;  %v6523_v23 = vld [vmem:[%s7575_s30 + $0x9c] sm:$0xe] }
 0x16a   : > { %v4674_v4 = vcombine.low %v3548_v26, %v3562_v35  ;;  %2173 = vrot.lane.b32.xlu0 %v7323_v51, %s7487_s18  ;;  %v1766_v38 = vpop.permute.xlu1 %1765  ;;  %v10810_v35 = vrot.slane %v8649_v50, 1 }
 0x16b   : > { %v3048_v36 = vsel %vm3036_vm7, %v2975_v32, %v1766_v38 }
 0x16c   : > { %v4684_v40 = vrot.slane %v4674_v4, %v8643_v62  ;;  %v2560_v48 = vpop.permute.xlu0 %2559  ;;  %1799 = vrot.lane.b32.xlu1 %v1661_v12, %s7484_s8  ;;  %v7327_v4 = vld [vmem:[%s7575_s30 + $0x8c] ss:$0 sps:$4 sm:$0x11]  }
 0x16d   : > { %v3269_v26 = vsel %vm3255_vm10, %v3196_v39, %v2560_v48  ;;  %v8985_v48 = vld [vmem:[%s7575_s30 + $0x64] sm:$0xf] }
 0x16e   : > { %v4706_v51 = vcombine.low %v4684_v40, %v4691_v3  ;;  %2751 = vrot.lane.b32.xlu0 %v2693_v15, %s7488_s23  ;;  %v1946_v10 = vpop.permute.xlu1 %1945  ;;  %v2450_v15 = vshll.u32 %v8951_v1, 16  ;;  %v6371_v40 = vld [vmem:[%s7575_s30 + $0x60] sm:$0xf] }
 0x16f   : > { %v3121_v9 = vsel %vm3109_vm8, %v3048_v36, %v1946_v10  ;;  %v2448_v10 = vor.u32 %v2447_v60, %v2443_v29  ;;  %v6616_v39 = vcombine.low %v6371_v40, %v8985_v48 }
 0x170   : > { %v2740_v59 = vpop.permute.xlu0 %2739  ;;  %2765 = vrot.lane.b32.xlu1 %v10810_v35, %s7488_s23  ;;  %v4714_v54 = vrot.slane %v4706_v51, %v8643_v62  ;;  %v8994_v24 = vrot.slane %v2450_v15, 1 }
 0x171   : > { %v3342_v12 = vsel %vm3328_vm11, %v3269_v26, %v2740_v59 }
 0x172   : > { %v3626_v52 = vcombine.high %v3342_v12, %v3342_v12  ;;  %v3633_v55 = vrot.slane %v3342_v12, %v8643_v62  ;;  %2569 = vrot.lane.b32.xlu0 %v8435_v49, %s7485_s11  ;;  %v2558_v50 = vpop.permute.xlu1 %2557  ;;  %v4722_v28 = vcombine.low %v4714_v54, %v4721_v57  ;;  %v7329_v54 = vld [vmem:[%s7575_s30 + $0x5c] ss:$0 sps:$4 sm:$0x11]  }
 0x174   : > { %v8976_v38 = vrot.slane %v3626_v52, %v8643_v62  ;;  %v3641_v3 = vcombine.high %v3633_v55, %v3633_v55  ;;  %v3649_v7 = vrot.slane %v3633_v55, %v8643_v62  ;;  %7032 = vmatmul.mubr.msk.bf16.gmra.mrb[8].mxu0 %vm5586_vm12, %v4722_v28  ;;  %v2162_v49 = vpop.permute.xlu0 %2161  ;;  %2749 = vrot.lane.b32.xlu1 %v10811_v22, %s7488_s23  ;;  %v9018_v28 = vld [vmem:[%s7575_s30 + $0x68] ss:$0 sps:$4 sm:$0x33]   ;;  %v6429_v22 = vld [vmem:[%s7575_s30 + $0x60] sm:$0xe] }
 0x175   : > { %v3194_v30 = vsel %vm3182_vm9, %v3121_v9, %v2162_v49  ;;  %7035 = vmatprep.mubr.msk.bf16.mxu0 %vm7489_vm3, %v10804_v21  ;;  %v6739_v52 = vcombine.low %v6523_v23, %v8918_v43  ;;  %v2453_v55 = vsel %vm691_vm0, %v2448_v10, %v8994_v24  ;;  %v1593_v9 = vshll.u32 %v6616_v39, 16 }
 0x176   : > { %v3663_v27 = vrot.slane %v3641_v3, %v8643_v62  ;;  %v3671_v16 = vcombine.high %v3649_v7, %v3649_v7  ;;  %1979 = vrot.lane.b32.xlu0 %v1916_v41, %s7483_s7  ;;  %v8992_v51 = vpop.permute.xlu1 %1375  ;;  %v9001_v61 = vrot.slane %v8976_v38, %v8643_v62  ;;  %v3267_v59 = vsel %vm3255_vm10, %v3194_v30, %v2558_v50 }
 0x177   : > { %v1649_v50 = vor.u32 %v1647_v37, %v8659_v2  ;;  %v1587_v43 = vshrl.u32 %v8717_v8, 16  ;;  %v2706_v49 = vrot.slane %v6739_v52, 1  ;;  %v1595_v40 = vrot.slane %v1593_v9, 1  ;;  %v10812_v9 = vld [vmem:[#allocation9_spill] sm:$0xff] }
 0x178   : > { %v3673_v26 = vcombine.high %v3663_v27, %v3663_v27  ;;  %v2738_v35 = vpop.permute.xlu0 %2737  ;;  %1401 = vrot.lane.b32.xlu1 %v7327_v4, %s7482_s6  ;;  %v4725_v32 = vcombine.low %v3663_v27, %v3671_v16  ;;  %v6749_v4 = vcombine.high %v8887_v45, %v8877_v46  ;;  %v2707_v46 = vrot.slane %v8951_v1, 1 }
 0x179   : > { %v3340_v57 = vsel %vm3328_vm11, %v3267_v59, %v2738_v35  ;;  %v1591_v45 = vshrl.u32 %v6616_v39, 16  ;;  %v1598_v30 = vshll.u32 %v9018_v28, 16  ;;  %v6663_v23 = vcombine.low %v6429_v22, %v8985_v48  ;;  %v6461_v35 = vld [vmem:[%s7575_s30 + $0x6c] sm:$0xf] }
 0x17a   : > { %v4726_v12 = vcombine.low %v3673_v26, %v9001_v61  ;;  %v3618_v41 = vrot.slane %v3340_v57, %v8643_v62  ;;  %2195 = vrot.lane.b32.xlu0 %v8935_v56, %s7487_s18  ;;  %v9011_v36 = vpop.permute.xlu1 %1373  ;;  %v4747_v15 = vrot.slane %v4725_v32, %v8643_v62  ;;  %v4733_v27 = vrot.slane %v6749_v4, %v8643_v62 }
 0x17b   : > { %v2708_v57 = vsel %vm1088_vm1, %v2706_v49, %v2707_v46  ;;  %v1596_v32 = vor.u32 %v1595_v40, %v1591_v45  ;;  %v1903_v52 = vrot.slane %v9018_v28, 1  ;;  %v2821_v4 = vsel %vm2799_vm4, %v10812_v9, %v8155_v33  ;;  %v9069_v33 = vld [vmem:[%s7575_s30 + $0x74] ss:$0 sps:$4 sm:$0x33]  }
 0x17c   : > { %v4754_v29 = vrot.slane %v4726_v12, %v8643_v62  ;;  %v3625_v56 = vrot.slane %v3618_v41, %v8643_v62  ;;  %v1772_v60 = vpop.permute.xlu0 %1771  ;;  %1385 = vrot.lane.b32.xlu1 %v7329_v54, %s7482_s6  ;;  %v9039_v54 = vld [vmem:[%s7575_s30 + $0x70] sm:$0xf]  ;;  %v9044_v12 = vrot.slane %v1598_v30, 1  ;;  %v10813_v22 = vrot.slane %v8626_v14, 1 }
 0x17e   : > { %v4724_v3 = vcombine.low %v3625_v56, %v3649_v7  ;;  %2591 = vrot.lane.b32.xlu0 %v2453_v55, %s7485_s11  ;;  %v1770_v2 = vpop.permute.xlu1 %1769  ;;  %v1589_v7 = vor.u32 %v1587_v43, %v8750_v34  ;;  %v4756_v37 = vcombine.low %v4747_v15, %v4754_v29  ;;  %v9051_v55 = vcombine.low %v6461_v35, %v9039_v54 }
 0x17f   : > { %v2908_v43 = vsel %vm2890_vm5, %v2821_v4, %v8428_v18  ;;  %v1601_v15 = vsel %vm691_vm0, %v1596_v32, %v9044_v12  ;;  %v6386_v4 = vld [vmem:[%s7575_s30 + $0x9c] sm:$0xf] }
 0x180   : > { %v4740_v16 = vrot.slane %v4724_v3, %v8643_v62  ;;  %v1952_v10 = vpop.permute.xlu0 %1951  ;;  %1797 = vrot.lane.b32.xlu1 %v1649_v50, %s7484_s8  ;;  %v4770_v48 = vrot.slane %v4756_v37, %v8643_v62  ;;  %v7233_v50 = vld [vmem:[%s7575_s30 + $0x2c] ss:$0 sps:$4 sm:$0x11]   ;;  %v2981_v3 = vsel %vm2963_vm6, %v2908_v43, %v8992_v51  ;;  %v2385_v40 = vshll.u32 %v9051_v55, 16 }
 0x181   : > { %v3054_v45 = vsel %vm3036_vm7, %v2981_v3, %v1772_v60  ;;  %v2819_v51 = vsel %vm2799_vm4, %v7233_v50, %v8121_v63  ;;  %v7335_v63 = vld [vmem:[%s7575_s30 + $0x68] ss:$0 sps:$4 sm:$0x11]  }
 0x182   : > { %v4755_v26 = vcombine.low %v4733_v27, %v4740_v16  ;;  %1387 = vrot.lane.b32.xlu0 %v6616_v39, %s7482_s6  ;;  %v1950_v59 = vpop.permute.xlu1 %1949  ;;  %v1902_v39 = vrot.slane %v6663_v23, 1  ;;  %v3127_v14 = vsel %vm3109_vm8, %v3054_v45, %v1952_v10  ;;  %v2906_v60 = vsel %vm2890_vm5, %v2819_v51, %v8408_v53 }
 0x183   : > { %v2439_v16 = vshrl.u32 %v8740_v47, 16  ;;  %v2383_v10 = vshrl.u32 %v9051_v55, 16  ;;  %v3642_v53 = vcombine.high %v8976_v38, %v8976_v38  ;;  %v7336_v38 = vld [vmem:[%s7575_s30 + $0x98] ss:$0 sps:$4 sm:$0x11]   ;;  %v2379_v45 = vshrl.u32 %v8840_v31, 16 }
 0x184   : > { %v2168_v41 = vpop.permute.xlu0 %2167  ;;  %1781 = vrot.lane.b32.xlu1 %v1589_v7, %s7484_s8  ;;  %v4763_v34 = vrot.slane %v4755_v26, %v8643_v62  ;;  %v1904_v18 = vsel %vm1088_vm1, %v1902_v39, %v1903_v52  ;;  %v2979_v7 = vsel %vm2963_vm6, %v2906_v60, %v9011_v36  ;;  %v2390_v26 = vshll.u32 %v9069_v33, 16  ;;  %v10814_v31 = vld [vmem:[#allocation10_spill] sm:$0xff] }
 0x185   : > { %v3200_v27 = vsel %vm3182_vm9, %v3127_v14, %v2168_v41  ;;  %v3052_v35 = vsel %vm3036_vm7, %v2979_v7, %v1770_v2  ;;  %v2387_v36 = vrot.slane %v2385_v40, 1  ;;  %v3670_v8 = vrot.slane %v3642_v53, %v8643_v62 }
 0x186   : > { %2771 = vrot.lane.b32.xlu0 %v2708_v57, %s7488_s23  ;;  %v2166_v29 = vpop.permute.xlu1 %2165  ;;  %v4771_v56 = vcombine.low %v4763_v34, %v4770_v48  ;;  %v3125_v32 = vsel %vm3109_vm8, %v3052_v35, %v1950_v59  ;;  %v2441_v59 = vor.u32 %v2439_v16, %v8781_v25  ;;  %v9112_v9 = vrot.slane %v2390_v26, 1  ;;  %v9146_v26 = vld [vmem:[%s7575_s30 + $0xa4] ss:$0 sps:$4 sm:$0x33]  }
 0x187   : > { %v3198_v2 = vsel %vm3182_vm9, %v3125_v32, %v2166_v29  ;;  %v2388_v43 = vor.u32 %v2387_v36, %v2383_v10 }
 0x188   : > { %7036 = vmatmul.mubr.msk.bf16.gmra.mrb[12].mxu0 %vm5586_vm12, %v4771_v56  ;;  %v2564_v49 = vpop.permute.xlu0 %2563  ;;  %1977 = vrot.lane.b32.xlu1 %v10813_v22, %s7483_s7  ;;  %v9116_v56 = vld [vmem:[%s7575_s30 + $0xa0] sm:$0xf] }
 0x189   : > { %7039 = vmatprep.mubr.msk.bf16.mxu0 %vm7489_vm3, %v10804_v21  ;;  %v3273_v37 = vsel %vm3255_vm10, %v3200_v27, %v2564_v49  ;;  %v3674_v27 = vcombine.high %v3670_v8, %v3670_v8  ;;  %v2393_v16 = vsel %vm691_vm0, %v2388_v43, %v9112_v9 }
 0x18a   : > { %1783 = vrot.lane.b32.xlu0 %v1601_v15, %s7484_s8  ;;  %v2562_v30 = vpop.permute.xlu1 %2561  ;;  %v6519_v15 = vld [vmem:[%s7575_s30 + $0x6c] sm:$0xe] }
 0x18b   : > { %v3271_v48 = vsel %vm3255_vm10, %v3198_v2, %v2562_v30  ;;  %v6735_v30 = vcombine.low %v6519_v15, %v9039_v54  ;;  %v7341_v15 = vld [vmem:[%s7575_s30 + $0x98] ss:$0 sps:$4 sm:$0x11]  }
 0x18c   : > { %v2744_v23 = vpop.permute.xlu0 %2743  ;;  %1963 = vrot.lane.b32.xlu1 %v1904_v18, %s7483_s7  ;;  %v6626_v18 = vcombine.low %v6386_v4, %v9116_v56 }
 0x18d   : > { %v9097_v57 = vsel %vm3328_vm11, %v3273_v37, %v2744_v23  ;;  %v2694_v35 = vrot.slane %v6735_v30, 1 }
 0x18e   : > { %v3696_v41 = vrot.slane %v9097_v57, %v8643_v62  ;;  %1961 = vrot.lane.b32.xlu0 %v1900_v58, %s7483_s7  ;;  %v9105_v34 = vpop.permute.xlu1 %1379  ;;  %v3672_v58 = vcombine.high %v9001_v61, %v9001_v61  ;;  %v1668_v54 = vshll.u32 %v6626_v18, 16  ;;  %v1666_v2 = vshrl.u32 %v6626_v18, 16 }
 0x190   : > { %v3704_v39 = vcombine.high %v3696_v41, %v3696_v41  ;;  %v2742_v50 = vpop.permute.xlu0 %2741  ;;  %2177 = vrot.lane.b32.xlu1 %v7335_v63, %s7487_s18  ;;  %v3712_v3 = vrot.slane %v3696_v41, %v8643_v62  ;;  %v4772_v60 = vcombine.low %v3670_v8, %v3672_v58  ;;  %v2381_v63 = vor.u32 %v2379_v45, %v8872_v0 }
 0x191   : > { %v3344_v29 = vsel %vm3328_vm11, %v3271_v48, %v2742_v50  ;;  %v1670_v48 = vrot.slane %v1668_v54, 1 }
 0x192   : > { %v3726_v49 = vrot.slane %v3704_v39, %v8643_v62  ;;  %v3681_v25 = vrot.slane %v3344_v29, %v8643_v62  ;;  %2193 = vrot.lane.b32.xlu0 %v7336_v38, %s7487_s18  ;;  %v9127_v22 = vpop.permute.xlu1 %1377  ;;  %v4782_v32 = vrot.slane %v4772_v60, %v8643_v62  ;;  %v1673_v39 = vshll.u32 %v9146_v26, 16  ;;  %v7343_v60 = vld [vmem:[%s7575_s30 + $0x68] ss:$0 sps:$4 sm:$0x11]  }
 0x194   : > { %v4774_v61 = vcombine.low %v3712_v3, %v3726_v49  ;;  %v6750_v40 = vcombine.high %v3712_v3, %v3726_v49  ;;  %v3688_v51 = vrot.slane %v3681_v25, %v8643_v62  ;;  %v9132_v14 = vpop.permute.xlu0 %1775  ;;  %2589 = vrot.lane.b32.xlu1 %v2441_v59, %s7485_s11  ;;  %v6434_v59 = vld [vmem:[%s7575_s30 + $0x9c] sm:$0xe]  ;;  %v1671_v3 = vor.u32 %v1670_v48, %v1666_v2 }
 0x195   : > { %v9169_v49 = vrot.slane %v1673_v39, 1  ;;  %v6668_v25 = vcombine.low %v6434_v59, %v9116_v56 }
 0x196   : > { %v4796_v7 = vrot.slane %v4774_v61, %v8643_v62  ;;  %v4803_v37 = vrot.slane %v6750_v40, %v8643_v62  ;;  %2179 = vrot.lane.b32.xlu0 %v9051_v55, %s7487_s18  ;;  %v9142_v23 = vpop.permute.xlu1 %1395  ;;  %v4773_v10 = vcombine.low %v3674_v27, %v3688_v51  ;;  %v2695_v55 = vrot.slane %v9069_v33, 1  ;;  %v6477_v61 = vld [vmem:[%s7575_s30 + $0xac] sm:$0xf] }
 0x197   : > { %v1917_v56 = vrot.slane %v6668_v25, 1  ;;  %v1918_v40 = vrot.slane %v9146_v26, 1  ;;  %v3689_v27 = vcombine.high %v9097_v57, %v9097_v57 }
 0x198   : > { %v1956_v53 = vpop.permute.xlu0 %1955  ;;  %2575 = vrot.lane.b32.xlu1 %v2393_v16, %s7485_s11  ;;  %v4805_v36 = vcombine.low %v4796_v7, %v4803_v37  ;;  %v4789_v41 = vrot.slane %v4773_v10, %v8643_v62  ;;  %v2696_v58 = vsel %vm1088_vm1, %v2694_v35, %v2695_v55  ;;  %v1662_v7 = vshrl.u32 %v8859_v11, 16  ;;  %v9205_v10 = vld [vmem:[%s7575_s30 + $0xb0] ss:$0 sps:$4 sm:$0x33]  }
 0x19a   : > { %2573 = vrot.lane.b32.xlu0 %v2381_v63, %s7485_s11  ;;  %v2172_v0 = vpop.permute.xlu1 %2171  ;;  %v4804_v38 = vcombine.low %v4782_v32, %v4789_v41  ;;  %v4819_v8 = vrot.slane %v4805_v36, %v8643_v62  ;;  %v1919_v63 = vsel %vm1088_vm1, %v1917_v56, %v1918_v40  ;;  %v3703_v36 = vrot.slane %v3689_v27, %v8643_v62  ;;  %v10815_v27 = vld [vmem:[#allocation32_spill] sm:$0xff] }
 0x19b   : > { %v1664_v41 = vor.u32 %v1662_v7, %v8904_v13 }
 0x19c   : > { %v9154_v50 = vpop.permute.xlu0 %1773  ;;  %1407 = vrot.lane.b32.xlu1 %v6626_v18, %s7482_s6  ;;  %v4812_v4 = vrot.slane %v4804_v38, %v8643_v62  ;;  %v6476_v18 = vld [vmem:[%s7575_s30 + $0xa8] sm:$0xf]  ;;  %v3705_v13 = vcombine.high %v3703_v36, %v3703_v36 }
 0x19d   : > { %v6698_v51 = vcombine.low %v6476_v18, %v6477_v61  ;;  %v6524_v38 = vld [vmem:[%s7575_s30 + $0xa8] sm:$0xe] }
 0x19e   : > { %2769 = vrot.lane.b32.xlu0 %v2704_v19, %s7488_s23  ;;  %v9166_v29 = vpop.permute.xlu1 %1953  ;;  %v4820_v43 = vcombine.low %v4812_v4, %v4819_v8  ;;  %v1676_v19 = vsel %vm691_vm0, %v1671_v3, %v9169_v49  ;;  %v6740_v8 = vcombine.low %v6524_v38, %v6477_v61 }
 0x19f   : > { %v2458_v48 = vshrl.u32 %v6698_v51, 16 }
 0x1a0   : > { %v9172_v45 = vpop.permute.xlu0 %1791  ;;  %2755 = vrot.lane.b32.xlu1 %v2696_v58, %s7488_s23  ;;  %7040 = vmatmul.mubr.msk.bf16.gmra.mrb[16].mxu0 %vm5586_vm12, %v4820_v43  ;;  %v7235_v58 = vld [vmem:[%s7575_s30 + $0x38] ss:$0 sps:$4 sm:$0x11]   ;;  %v2709_v61 = vrot.slane %v6740_v8, 1 }
 0x1a1   : > { %7043 = vmatprep.mubr.msk.bf16.mxu0 %vm7489_vm3, %v10804_v21  ;;  %v2824_v56 = vsel %vm2799_vm4, %v7235_v58, %v8132_v6  ;;  %v10816_v6 = vld [vmem:[#allocation14_spill] sm:$0xff] }
 0x1a2   : > { %2753 = vrot.lane.b32.xlu0 %v2692_v44, %s7488_s23  ;;  %v9181_v47 = vpop.permute.xlu1 %1399  ;;  %v2826_v44 = vsel %vm2799_vm4, %v10814_v31, %v8172_v42  ;;  %v2460_v42 = vshll.u32 %v6698_v51, 16  ;;  %v2910_v31 = vsel %vm2890_vm5, %v2824_v56, %v8422_v20  ;;  %v2846_v7 = vsel %vm2799_vm4, %v10816_v6, %v10815_v27 }
 0x1a3   : > { %v2912_v37 = vsel %vm2890_vm5, %v2826_v44, %v8444_v17  ;;  %v2454_v20 = vshrl.u32 %v8951_v1, 16 }
 0x1a4   : > { %v2568_v30 = vpop.permute.xlu0 %2567  ;;  %1405 = vrot.lane.b32.xlu1 %v7341_v15, %s7482_s6  ;;  %v2985_v57 = vsel %vm2963_vm6, %v2912_v37, %v9105_v34  ;;  %v1602_v34 = vshrl.u32 %v9018_v28, 16  ;;  %v2462_v39 = vrot.slane %v2460_v42, 1  ;;  %v3719_v37 = vrot.slane %v3703_v36, %v8643_v62 }
 0x1a5   : > { %v3058_v35 = vsel %vm3036_vm7, %v2985_v57, %v9132_v14  ;;  %v2465_v14 = vshll.u32 %v9205_v10, 16  ;;  %v10817_v57 = vld [vmem:[#allocation57_spill] sm:$0xff] }
 0x1a6   : > { %1803 = vrot.lane.b32.xlu0 %v1676_v19, %s7484_s8  ;;  %v9196_v16 = vpop.permute.xlu1 %2169  ;;  %v3131_v17 = vsel %vm3109_vm8, %v3058_v35, %v1956_v53  ;;  %v1604_v43 = vor.u32 %v1602_v34, %v9044_v12  ;;  %v2463_v3 = vor.u32 %v2462_v39, %v2458_v48  ;;  %v2710_v19 = vrot.slane %v9205_v10, 1 }
 0x1a7   : > { %v3204_v2 = vsel %vm3182_vm9, %v3131_v17, %v2172_v0  ;;  %v9234_v25 = vrot.slane %v2465_v14, 1  ;;  %v2928_v35 = vsel %vm2890_vm5, %v2846_v7, %v10817_v57  ;;  %v6389_v14 = vld [vmem:[%s7575_s30 + $0xa8] sm:$0xf] }
 0x1a8   : > { %v9209_v54 = vpop.permute.xlu0 %1971  ;;  %1389 = vrot.lane.b32.xlu1 %v7343_v60, %s7482_s6  ;;  %v3277_v59 = vsel %vm3255_vm10, %v3204_v2, %v2568_v30  ;;  %v6374_v30 = vld [vmem:[%s7575_s30 + $0x6c] sm:$0xf]  ;;  %v9246_v60 = vld [vmem:[%s7575_s30 + $0x70] sm:$0xf] }
 0x1a9   : > { %v9275_v36 = vcombine.low %v6374_v30, %v9246_v60 }
 0x1aa   : > { %1983 = vrot.lane.b32.xlu0 %v1919_v63, %s7483_s7  ;;  %v9217_v32 = vpop.permute.xlu1 %1795  ;;  %v2983_v63 = vsel %vm2963_vm6, %v2910_v31, %v9127_v22  ;;  %v2711_v22 = vsel %vm1088_vm1, %v2709_v61, %v2710_v19  ;;  %v7349_v61 = vld [vmem:[%s7575_s30 + $0x74] ss:$0 sps:$4 sm:$0x11]  }
 0x1ab   : > { %v3056_v17 = vsel %vm3036_vm7, %v2983_v63, %v9154_v50  ;;  %v7348_v50 = vld [vmem:[%s7575_s30 + $0xa4] ss:$0 sps:$4 sm:$0x11]   ;;  %v1606_v6 = vshrl.u32 %v9275_v36, 16 }
 0x1ac   : > { %v2748_v4 = vpop.permute.xlu0 %2747  ;;  %2199 = vrot.lane.b32.xlu1 %v6698_v51, %s7487_s18  ;;  %v3733_v51 = vrot.slane %v3705_v13, %v8643_v62  ;;  %v3129_v34 = vsel %vm3109_vm8, %v3056_v17, %v9166_v29  ;;  %v9296_v29 = vld [vmem:[%s7575_s30 + $0xac] sm:$0xf] }
 0x1ad   : > { %v9227_v53 = vsel %vm3328_vm11, %v3277_v59, %v2748_v4  ;;  %v3202_v48 = vsel %vm3182_vm9, %v3129_v34, %v9196_v16  ;;  %v2394_v16 = vshrl.u32 %v9069_v33, 16  ;;  %v6430_v17 = vld [vmem:[%s7575_s30 + $0x6c] sm:$0xe] }
 0x1ae   : > { %1801 = vrot.lane.b32.xlu0 %v1664_v41, %s7484_s8  ;;  %v2566_v0 = vpop.permute.xlu1 %2565  ;;  %v3759_v15 = vrot.slane %v9227_v53, %v8643_v62  ;;  %v4821_v41 = vcombine.low %v3719_v37, %v3733_v51  ;;  %v6751_v28 = vcombine.high %v3719_v37, %v3733_v51 }
 0x1af   : > { %v3275_v4 = vsel %vm3255_vm10, %v3202_v48, %v2566_v0  ;;  %v2396_v27 = vor.u32 %v2394_v16, %v9112_v9  ;;  %v6435_v48 = vld [vmem:[%s7575_s30 + $0xa8] sm:$0xe] }
 0x1b0   : > { %v2188_v18 = vpop.permute.xlu0 %2187  ;;  %1981 = vrot.lane.b32.xlu1 %v1915_v5, %s7483_s7  ;;  %v3767_v44 = vcombine.high %v3759_v15, %v3759_v15  ;;  %v9251_v11 = vrot.slane %v3759_v15, %v8643_v62  ;;  %v2468_v5 = vsel %vm691_vm0, %v2463_v3, %v9234_v25  ;;  %v1608_v15 = vshll.u32 %v9275_v36, 16 }
 0x1b1   : > { %v4831_v56 = vrot.slane %v4821_v41, %v8643_v62  ;;  %v9341_v41 = vld [vmem:[%s7575_s30 + $0xb0] ss:$0 sps:$4 sm:$0x33]  }
 0x1b2   : > { %1785 = vrot.lane.b32.xlu0 %v1604_v43, %s7484_s8  ;;  %v2584_v12 = vpop.permute.xlu1 %2583  ;;  %v9290_v39 = vrot.slane %v3767_v44, %v8643_v62  ;;  %v9307_v43 = vld [vmem:[%s7575_s30 + $0x74] ss:$0 sps:$4 sm:$0x33]   ;;  %v1610_v7 = vrot.slane %v1608_v15, 1  ;;  %v9367_v15 = vld [vmem:[%s7575_s30 + $0x7c] sm:$0xf] }
 0x1b3   : > { %v1613_v37 = vshll.u32 %v9307_v43, 16 }
 0x1b4   : > { %v9261_v42 = vpop.permute.xlu0 %1975  ;;  %1965 = vrot.lane.b32.xlu1 %v1903_v52, %s7483_s7  ;;  %v3001_v52 = vsel %vm2963_vm6, %v2928_v35, %v9142_v23  ;;  %v3797_v23 = vcombine.high %v9251_v11, %v9251_v11 }
 0x1b5   : > { %v3074_v2 = vsel %vm3036_vm7, %v3001_v52, %v9172_v45  ;;  %v2456_v45 = vor.u32 %v2454_v20, %v8994_v24  ;;  %v9315_v24 = vcombine.low %v6389_v14, %v9296_v29  ;;  %v9353_v14 = vrot.slane %v1613_v37, 1 }
 0x1b6   : > { %2595 = vrot.lane.b32.xlu0 %v2468_v5, %s7485_s11  ;;  %v9282_v38 = vpop.permute.xlu1 %1383  ;;  %v3147_v59 = vsel %vm3109_vm8, %v3074_v2, %v9209_v54  ;;  %v4824_v51 = vcombine.low %v9290_v39, %v3797_v23  ;;  %v1611_v23 = vor.u32 %v1610_v7, %v1606_v6  ;;  %v9383_v6 = vld [vmem:[%s7575_s30 + $0xb8] sm:$0xf] }
 0x1b7   : > { %v3220_v58 = vsel %vm3182_vm9, %v3147_v59, %v2188_v18  ;;  %v4838_v18 = vrot.slane %v6751_v28, %v8643_v62  ;;  %v1683_v28 = vshll.u32 %v9315_v24, 16  ;;  %v6664_v59 = vcombine.low %v6430_v17, %v9246_v60 }
 0x1b8   : > { %v2746_v8 = vpop.permute.xlu0 %2745  ;;  %2775 = vrot.lane.b32.xlu1 %v2711_v22, %s7488_s23  ;;  %v3293_v3 = vsel %vm3255_vm10, %v3220_v58, %v2584_v12  ;;  %v4852_v9 = vrot.slane %v4824_v51, %v8643_v62  ;;  %v1681_v60 = vshrl.u32 %v9315_v24, 16 }
 0x1b9   : > { %v3348_v13 = vsel %vm3328_vm11, %v3275_v4, %v2746_v8  ;;  %v4853_v22 = vcombine.low %v4831_v56, %v4838_v18 }
 0x1ba   : > { %v3744_v54 = vrot.slane %v3348_v13, %v8643_v62  ;;  %2197 = vrot.lane.b32.xlu0 %v7348_v50, %s7487_s18  ;;  %v2764_v0 = vpop.permute.xlu1 %2763  ;;  %v6464_v13 = vld [vmem:[%s7575_s30 + $0x78] sm:$0xf] }
 0x1bb   : > { %v3366_v30 = vsel %vm3328_vm11, %v3293_v3, %v2764_v0  ;;  %v1685_v3 = vrot.slane %v1683_v28, 1  ;;  %v6669_v0 = vcombine.low %v6435_v48, %v9296_v29  ;;  %v10818_v28 = vld [vmem:[#allocation34_spill] sm:$0xff]  ;;  %v9415_v48 = vld [vmem:[%s7575_s30 + $0x80] ss:$0 sps:$4 sm:$0x33]  }
 0x1bc   : > { %v3751_v12 = vrot.slane %v3744_v54, %v8643_v62  ;;  %v4004_v31 = vcombine.high %v3366_v30, %v3366_v30  ;;  %v9323_v44 = vrot.slane %v3366_v30, %v8643_v62  ;;  %v9325_v5 = vpop.permute.xlu0 %2191  ;;  %2593 = vrot.lane.b32.xlu1 %v2456_v45, %s7485_s11  ;;  %v1688_v54 = vshll.u32 %v9341_v41, 16 }
 0x1bd   : > { %v1905_v30 = vrot.slane %v6664_v59, 1  ;;  %v1920_v1 = vrot.slane %v6669_v0, 1 }
 0x1be   : > { %v4823_v63 = vcombine.low %v3751_v12, %v9251_v11  ;;  %v4018_v20 = vrot.slane %v4004_v31, %v8643_v62  ;;  %v4019_v57 = vcombine.high %v9323_v44, %v9323_v44  ;;  %2181 = vrot.lane.b32.xlu0 %v7349_v61, %s7487_s18  ;;  %v9336_v35 = vpop.permute.xlu1 %1779  ;;  %v10700_v12 = vrot.slane %v9307_v43, 1 }
 0x1bf   : > { %v9379_v31 = vcombine.low %v6464_v13, %v9367_v15 }
 0x1c0   : > { %v4845_v11 = vrot.slane %v4823_v63, %v8643_v62  ;;  %v4020_v52 = vcombine.high %v4018_v20, %v4018_v20  ;;  %v4034_v34 = vrot.slane %v4018_v20, %v8643_v62  ;;  %v9347_v50 = vrot.slane %v4019_v57, %v8643_v62  ;;  %v9349_v2 = vpop.permute.xlu0 %1397  ;;  %2577 = vrot.lane.b32.xlu1 %v2396_v27, %s7485_s11  ;;  %v6479_v27 = vld [vmem:[%s7575_s30 + $0xb4] sm:$0xf] }
 0x1c1   : > { %v1616_v63 = vsel %vm691_vm0, %v1611_v23, %v9353_v14  ;;  %v1686_v20 = vor.u32 %v1685_v3, %v1681_v60  ;;  %v9394_v57 = vrot.slane %v1688_v54, 1  ;;  %v2400_v33 = vshll.u32 %v9379_v31, 16  ;;  %v9437_v54 = vld [vmem:[%s7575_s30 + $0xbc] ss:$0 sps:$4 sm:$0x33]  }
 0x1c2   : > { %v4854_v4 = vcombine.low %v4845_v11, %v4852_v9  ;;  %v9357_v8 = vrot.slane %v4020_v52, %v8643_v62  ;;  %v4050_v45 = vcombine.high %v4034_v34, %v4034_v34  ;;  %v4051_v16 = vcombine.high %v9347_v50, %v9347_v50  ;;  %1391 = vrot.lane.b32.xlu0 %v9275_v36, %s7482_s6  ;;  %v9363_v58 = vpop.permute.xlu1 %1381  ;;  %v10819_v11 = vld [vmem:[#allocation15_spill] sm:$0xff] }
 0x1c3   : > { %v4861_v36 = vrot.slane %v4853_v22, %v8643_v62  ;;  %v9404_v9 = vcombine.low %v6479_v27, %v9383_v6  ;;  %v2851_v52 = vsel %vm2799_vm4, %v10819_v11, %v10818_v28 }
 0x1c4   : > { %v5068_v61 = vcombine.low %v4051_v16, %v4034_v34  ;;  %v5069_v56 = vcombine.low %v9357_v8, %v4050_v45  ;;  %v2588_v18 = vpop.permute.xlu0 %2587  ;;  %1411 = vrot.lane.b32.xlu1 %v9315_v24, %s7482_s6  ;;  %v4868_v51 = vrot.slane %v4854_v4, %v8643_v62  ;;  %v1907_v34 = vsel %vm1088_vm1, %v1905_v30, %v10700_v12  ;;  %v7356_v30 = vld [vmem:[%s7575_s30 + $0xa4] ss:$0 sps:$4 sm:$0x11]  }
 0x1c5   : > { %v1691_v45 = vsel %vm691_vm0, %v1686_v20, %v9394_v57  ;;  %v1677_v16 = vshrl.u32 %v9146_v26, 16 }
 0x1c6   : > { %v5090_v29 = vrot.slane %v5068_v61, %v8643_v62  ;;  %v5097_v7 = vrot.slane %v5069_v56, %v8643_v62  ;;  %2773 = vrot.lane.b32.xlu0 %v2707_v46, %s7488_s23  ;;  %v9390_v24 = vpop.permute.xlu1 %1959  ;;  %v4869_v37 = vcombine.low %v4861_v36, %v4868_v51  ;;  %v1921_v46 = vrot.slane %v9341_v41, 1 }
 0x1c7   : > { %v2398_v61 = vshrl.u32 %v9379_v31, 16  ;;  %v2402_v56 = vrot.slane %v2400_v33, 1  ;;  %v3752_v33 = vcombine.high %v9227_v53, %v9227_v53 }
 0x1c8   : > { %7044 = vmatmul.mubr.msk.bf16.gmra.mrb[20].mxu0 %vm5586_vm12, %v4869_v37  ;;  %v9397_v17 = vpop.permute.xlu0 %1793  ;;  %2757 = vrot.lane.b32.xlu1 %v2695_v55, %s7488_s23  ;;  %v9406_v22 = vcombine.low %v5090_v29, %v5097_v7  ;;  %v10820_v55 = vld [vmem:[#allocation59_spill] sm:$0xff]  ;;  %v1922_v3 = vsel %vm1088_vm1, %v1920_v1, %v1921_v46  ;;  %v1679_v29 = vor.u32 %v1677_v16, %v9169_v49  ;;  %v2480_v1 = vshll.u32 %v9437_v54, 16 }
 0x1c9   : > { %7047 = vmatprep.mubr.msk.bf16.mxu0 %vm7489_vm3, %v10804_v21  ;;  %v2932_v23 = vsel %vm2890_vm5, %v2851_v52, %v10820_v55  ;;  %v9454_v7 = vld [vmem:[%s7575_s30 + $0xb8] sm:$0xf]  ;;  %v2403_v28 = vor.u32 %v2402_v56, %v2398_v61  ;;  %v6525_v52 = vld [vmem:[%s7575_s30 + $0xb4] sm:$0xe]  ;;  %v3766_v61 = vrot.slane %v3752_v33, %v8643_v62 }
 0x1ca   : > { %1787 = vrot.lane.b32.xlu0 %v1616_v63, %s7484_s8  ;;  %v9423_v59 = vpop.permute.xlu1 %1777  ;;  %v3005_v4 = vsel %vm2963_vm6, %v2932_v23, %v9181_v47  ;;  %v2475_v47 = vshll.u32 %v9404_v9, 16  ;;  %v6520_v49 = vld [vmem:[%s7575_s30 + $0x78] sm:$0xe]  ;;  %v7238_v23 = vld [vmem:[%s7575_s30 + $0x44] ss:$0 sps:$4 sm:$0x11]  }
 0x1cb   : > { %v3078_v13 = vsel %vm3036_vm7, %v3005_v4, %v9217_v32  ;;  %v2405_v32 = vshll.u32 %v9415_v48, 16  ;;  %v9478_v16 = vrot.slane %v2480_v1, 1  ;;  %v10823_v1 = vld [vmem:[#allocation11_spill] sm:$0xff] }
 0x1cc   : > { %v2768_v60 = vpop.permute.xlu0 %2767  ;;  %1967 = vrot.lane.b32.xlu1 %v1907_v34, %s7483_s7  ;;  %v3151_v0 = vsel %vm3109_vm8, %v3078_v13, %v9261_v42  ;;  %v6392_v42 = vld [vmem:[%s7575_s30 + $0xb4] sm:$0xf]  ;;  %v2477_v20 = vrot.slane %v2475_v47, 1  ;;  %v6736_v13 = vcombine.low %v6520_v49, %v9367_v15 }
 0x1cd   : > { %v3224_v36 = vsel %vm3182_vm9, %v3151_v0, %v9325_v5  ;;  %v2473_v5 = vshrl.u32 %v9404_v9, 16  ;;  %v9462_v11 = vrot.slane %v2405_v32, 1  ;;  %v9470_v34 = vcombine.low %v6392_v42, %v9454_v7  ;;  %v7249_v47 = vld [vmem:[%s7575_s30 + $0x74] ss:$0 sps:$4 sm:$0x11]  }
 0x1ce   : > { %1807 = vrot.lane.b32.xlu0 %v1691_v45, %s7484_s8  ;;  %v9447_v51 = vpop.permute.xlu1 %2175  ;;  %v3297_v27 = vsel %vm3255_vm10, %v3224_v36, %v2588_v18  ;;  %v10821_v32 = vld [vmem:[#allocation19_spill] sm:$0xff] }
 0x1cf   : > { %v3370_v37 = vsel %vm3328_vm11, %v3297_v27, %v2768_v60  ;;  %v2478_v45 = vor.u32 %v2477_v20, %v2473_v5  ;;  %v2408_v60 = vsel %vm691_vm0, %v2403_v28, %v9462_v11  ;;  %v1698_v0 = vshll.u32 %v9470_v34, 16  ;;  %v10822_v20 = vld [vmem:[#allocation26_spill] sm:$0xff]  ;;  %v10824_v49 = vld [vmem:[#allocation31_spill] sm:$0xff] }
 0x1d0   : > { %v9457_v63 = vpop.permute.xlu0 %1973  ;;  %1987 = vrot.lane.b32.xlu1 %v1922_v3, %s7483_s7  ;;  %v4067_v55 = vcombine.high %v3370_v37, %v3370_v37  ;;  %v6741_v3 = vcombine.low %v6525_v52, %v9383_v6  ;;  %v2829_v15 = vsel %vm2799_vm4, %v7238_v23, %v10821_v32  ;;  %v4074_v27 = vrot.slane %v3370_v37, %v8643_v62 }
 0x1d1   : > { %v2483_v6 = vsel %vm691_vm0, %v2478_v45, %v9478_v16  ;;  %v2713_v5 = vrot.slane %v9437_v54, 1  ;;  %v2831_v28 = vsel %vm2799_vm4, %v10823_v1, %v10822_v20  ;;  %v2849_v52 = vsel %vm2799_vm4, %v7249_v47, %v10824_v49  ;;  %v10825_v45 = vld [vmem:[#allocation49_spill] sm:$0xff]  ;;  %v10827_v1 = vld [vmem:[#allocation56_spill] sm:$0xff] }
 0x1d2   : > { %1409 = vrot.lane.b32.xlu0 %v7356_v30, %s7482_s6  ;;  %v9466_v18 = vpop.permute.xlu1 %2189  ;;  %v4081_v56 = vrot.slane %v4067_v55, %v8643_v62  ;;  %v2697_v30 = vrot.slane %v6736_v13, 1  ;;  %v2712_v42 = vrot.slane %v6741_v3, 1  ;;  %v9509_v55 = vld [vmem:[%s7575_s30 + $0xbc] ss:$0 sps:$4 sm:$0x33]   ;;  %v1696_v37 = vshrl.u32 %v9470_v34, 16 }
 0x1d3   : > { %v1700_v23 = vrot.slane %v1698_v0, 1  ;;  %v2914_v13 = vsel %vm2890_vm5, %v2829_v15, %v10825_v45  ;;  %v3768_v32 = vcombine.high %v3766_v61, %v3766_v61  ;;  %v2930_v47 = vsel %vm2890_vm5, %v2849_v52, %v10827_v1  ;;  %v7361_v0 = vld [vmem:[%s7575_s30 + $0xb0] ss:$0 sps:$4 sm:$0x11]  }
 0x1d4   : > { %v9475_v4 = vpop.permute.xlu0 %1957  ;;  %1805 = vrot.lane.b32.xlu1 %v1679_v29, %s7484_s8  ;;  %v2469_v29 = vshrl.u32 %v9205_v10, 16  ;;  %v4083_v20 = vcombine.high %v4081_v56, %v4081_v56  ;;  %v3782_v49 = vrot.slane %v3766_v61, %v8643_v62  ;;  %v4082_v45 = vcombine.high %v4074_v27, %v4074_v27 }
 0x1d5   : > { %v2714_v61 = vsel %vm1088_vm1, %v2712_v42, %v2713_v5 }
 0x1d6   : > { %2183 = vrot.lane.b32.xlu0 %v9379_v31, %s7487_s18  ;;  %v9487_v53 = vpop.permute.xlu1 %1403  ;;  %v2698_v31 = vrot.slane %v9415_v48, 1  ;;  %v3798_v26 = vcombine.high %v3782_v49, %v3782_v49 }
 0x1d8   : > { %v2572_v36 = vpop.permute.xlu0 %2571  ;;  %2579 = vrot.lane.b32.xlu1 %v2408_v60, %s7485_s11  ;;  %v10826_v60 = vld [vmem:[#allocation51_spill] sm:$0xff]  ;;  %v2699_v15 = vsel %vm1088_vm1, %v2697_v30, %v2698_v31 }
 0x1d9   : > { %v2916_v3 = vsel %vm2890_vm5, %v2831_v28, %v10826_v60  ;;  %v2471_v60 = vor.u32 %v2469_v29, %v9234_v25  ;;  %v1703_v25 = vshll.u32 %v9509_v55, 16  ;;  %v9543_v29 = vrot.slane %v3768_v32, %v8643_v62 }
 0x1da   : > { %2203 = vrot.lane.b32.xlu0 %v9404_v9, %s7487_s18  ;;  %v2586_v33 = vpop.permute.xlu1 %2585  ;;  %v2989_v9 = vsel %vm2963_vm6, %v2916_v3, %v9282_v38  ;;  %v3003_v38 = vsel %vm2963_vm6, %v2930_v47, %v9349_v2  ;;  %v9548_v2 = vrot.slane %v4083_v20, %v8643_v62  ;;  %v4104_v3 = vrot.slane %v4082_v45, %v8643_v62 }
 0x1db   : > { %v3062_v28 = vsel %vm3036_vm7, %v2989_v9, %v9336_v35  ;;  %v1701_v35 = vor.u32 %v1700_v23, %v1696_v37  ;;  %v3076_v42 = vsel %vm3036_vm7, %v3003_v38, %v9397_v17  ;;  %v9559_v17 = vrot.slane %v4081_v56, %v8643_v62 }
 0x1dc   : > { %v2174_v12 = vpop.permute.xlu0 %2173  ;;  %2599 = vrot.lane.b32.xlu1 %v2483_v6, %s7485_s11  ;;  %v3135_v6 = vsel %vm3109_vm8, %v3062_v28, %v9390_v24  ;;  %v3149_v52 = vsel %vm3109_vm8, %v3076_v42, %v9457_v63  ;;  %v2987_v63 = vsel %vm2963_vm6, %v2914_v13, %v9363_v58  ;;  %v9574_v1 = vrot.slane %v1703_v25, 1 }
 0x1dd   : > { %v3208_v24 = vsel %vm3182_vm9, %v3135_v6, %v9447_v51  ;;  %v3222_v51 = vsel %vm3182_vm9, %v3149_v52, %v9466_v18  ;;  %v3060_v18 = vsel %vm3036_vm7, %v2987_v63, %v9423_v59  ;;  %v4090_v47 = vrot.slane %v4074_v27, %v8643_v62 }
 0x1de   : > { %1985 = vrot.lane.b32.xlu0 %v1918_v40, %s7483_s7  ;;  %v9539_v30 = vpop.permute.xlu1 %1799  ;;  %v3799_v40 = vcombine.high %v9290_v39, %v9290_v39  ;;  %v3281_v37 = vsel %vm3255_vm10, %v3208_v24, %v2572_v36  ;;  %v6436_v39 = vld [vmem:[%s7575_s30 + $0xb4] sm:$0xe]  ;;  %v3295_v36 = vsel %vm3255_vm10, %v3222_v51, %v2586_v33  ;;  %v5118_v9 = vcombine.low %v9559_v17, %v9548_v2  ;;  %v6482_v24 = vld [vmem:[%s7575_s30 + $0xc0] sm:$0xf] }
 0x1df   : > { %v3133_v33 = vsel %vm3109_vm8, %v3060_v18, %v9475_v4  ;;  %v6670_v59 = vcombine.low %v6436_v39, %v9454_v7  ;;  %v4871_v27 = vcombine.low %v9543_v29, %v3798_v26  ;;  %v6756_v45 = vcombine.high %v4090_v47, %v4104_v3  ;;  %v9596_v7 = vld [vmem:[%s7575_s30 + $0xc4] sm:$0xf] }
 0x1e0   : > { %v2752_v23 = vpop.permute.xlu0 %2751  ;;  %2201 = vrot.lane.b32.xlu1 %v7361_v0, %s7487_s18  ;;  %v4870_v28 = vcombine.low %v3799_v40, %v3782_v49  ;;  %v3206_v38 = vsel %vm3182_vm9, %v3133_v33, %v2174_v12  ;;  %v5116_v6 = vcombine.low %v4090_v47, %v4104_v3  ;;  %v4052_v4 = vcombine.high %v9357_v8, %v9357_v8  ;;  %v7365_v8 = vld [vmem:[%s7575_s30 + $0xb0] ss:$0 sps:$4 sm:$0x11]  }
 0x1e1   : > { %v9565_v32 = vsel %vm3328_vm11, %v3281_v37, %v2752_v23  ;;  %v5146_v49 = vrot.slane %v5118_v9, %v8643_v62  ;;  %v1923_v37 = vrot.slane %v6670_v59, 1  ;;  %v1924_v23 = vrot.slane %v9509_v55, 1 }
 0x1e2   : > { %v3822_v20 = vrot.slane %v9565_v32, %v8643_v62  ;;  %2759 = vrot.lane.b32.xlu0 %v2699_v15, %s7488_s23  ;;  %v2766_v56 = vpop.permute.xlu1 %2765  ;;  %v5139_v3 = vrot.slane %v6756_v45, %v8643_v62  ;;  %v6702_v63 = vcombine.low %v6482_v24, %v9596_v7 }
 0x1e3   : > { %v3368_v58 = vsel %vm3328_vm11, %v3295_v36, %v2766_v56  ;;  %v4880_v36 = vrot.slane %v4870_v28, %v8643_v62  ;;  %v5132_v56 = vrot.slane %v5116_v6, %v8643_v62 }
 0x1e4   : > { %v3830_v13 = vcombine.high %v3822_v20, %v3822_v20  ;;  %v4059_v0 = vrot.slane %v3368_v58, %v8643_v62  ;;  %v2570_v15 = vpop.permute.xlu0 %2569  ;;  %2597 = vrot.lane.b32.xlu1 %v2471_v60, %s7485_s11  ;;  %v9613_v51 = vrot.slane %v3822_v20, %v8643_v62  ;;  %v5148_v20 = vcombine.low %v5139_v3, %v5146_v49 }
 0x1e5   : > { %v3279_v42 = vsel %vm3255_vm10, %v3206_v38, %v2570_v15  ;;  %v1692_v15 = vshrl.u32 %v9341_v41, 16  ;;  %v2490_v28 = vshll.u32 %v6702_v63, 16 }
 0x1e6   : > { %v4066_v25 = vrot.slane %v4059_v0, %v8643_v62  ;;  %2779 = vrot.lane.b32.xlu0 %v2714_v61, %s7488_s23  ;;  %v2750_v60 = vpop.permute.xlu1 %2749  ;;  %v9600_v26 = vrot.slane %v3830_v13, %v8643_v62  ;;  %v1706_v61 = vsel %vm691_vm0, %v1701_v35, %v9574_v1  ;;  %v3800_v35 = vcombine.high %v9543_v29, %v9543_v29  ;;  %v7367_v13 = vld [vmem:[%s7575_s30 + $0x74] ss:$0 sps:$4 sm:$0x11]  }
 0x1e7   : > { %v3352_v12 = vsel %vm3328_vm11, %v3279_v42, %v2750_v60  ;;  %v5162_v6 = vrot.slane %v5148_v20, %v8643_v62  ;;  %v1694_v49 = vor.u32 %v1692_v15, %v9394_v57  ;;  %v2492_v3 = vrot.slane %v2490_v28, 1  ;;  %v10828_v20 = vld [vmem:[#allocation36_spill] sm:$0xff] }
 0x1e8   : > { %v5115_v40 = vcombine.low %v4052_v4, %v4066_v25  ;;  %v9603_v52 = vpop.permute.xlu0 %1979  ;;  %1415 = vrot.lane.b32.xlu1 %v9470_v34, %s7482_s6  ;;  %v3807_v39 = vrot.slane %v3352_v12, %v8643_v62  ;;  %v4887_v34 = vrot.slane %v4871_v27, %v8643_v62  ;;  %v4873_v47 = vcombine.low %v9613_v51, %v9600_v26  ;;  %v9645_v4 = vld [vmem:[%s7575_s30 + $0xc8] ss:$0 sps:$4 sm:$0x33]   ;;  %v6395_v15 = vld [vmem:[%s7575_s30 + $0xc0] sm:$0xf] }
 0x1e9   : > { %v1617_v12 = vshrl.u32 %v9307_v43, 16 }
 0x1ea   : > { %2777 = vrot.lane.b32.xlu0 %v2710_v19, %s7488_s23  ;;  %v9625_v18 = vpop.permute.xlu1 %1401  ;;  %v5125_v9 = vrot.slane %v5115_v40, %v8643_v62  ;;  %v3814_v58 = vrot.slane %v3807_v39, %v8643_v62  ;;  %v1925_v19 = vsel %vm1088_vm1, %v1923_v37, %v1924_v23  ;;  %v4902_v59 = vcombine.low %v4880_v36, %v4887_v34 }
 0x1eb   : > { %v4901_v27 = vrot.slane %v4873_v47, %v8643_v62  ;;  %v2488_v40 = vshrl.u32 %v6702_v63, 16  ;;  %v2495_v39 = vshll.u32 %v9645_v4, 16  ;;  %v10829_v47 = vld [vmem:[#allocation16_spill] sm:$0xff] }
 0x1ec   : > { %v2196_v33 = vpop.permute.xlu0 %2195  ;;  %1413 = vrot.lane.b32.xlu1 %v7365_v8, %s7482_s6  ;;  %v5147_v29 = vcombine.low %v5125_v9, %v5132_v56  ;;  %v4872_v0 = vcombine.low %v3800_v35, %v3814_v58  ;;  %v6526_v8 = vld [vmem:[%s7575_s30 + $0xc0] sm:$0xe]  ;;  %v1619_v35 = vor.u32 %v1617_v12, %v9353_v14  ;;  %v2856_v9 = vsel %vm2799_vm4, %v10829_v47, %v10828_v20  ;;  %v7240_v20 = vld [vmem:[%s7575_s30 + $0x50] ss:$0 sps:$4 sm:$0x11]  }
 0x1ed   : > { %v6742_v34 = vcombine.low %v6526_v8, %v9596_v7  ;;  %v9672_v58 = vrot.slane %v2495_v39, 1  ;;  %v3815_v39 = vcombine.high %v9565_v32, %v9565_v32 }
 0x1ee   : > { %1811 = vrot.lane.b32.xlu0 %v1706_v61, %s7484_s8  ;;  %v9634_v10 = vpop.permute.xlu1 %1385  ;;  %v4894_v45 = vrot.slane %v4872_v0, %v8643_v62  ;;  %v5155_v38 = vrot.slane %v5147_v29, %v8643_v62  ;;  %v4910_v61 = vrot.slane %v4902_v59, %v8643_v62  ;;  %v9686_v59 = vld [vmem:[%s7575_s30 + $0xc4] sm:$0xf] }
 0x1ef   : > { %v2715_v0 = vrot.slane %v6742_v34, 1  ;;  %v3829_v32 = vrot.slane %v3815_v39, %v8643_v62 }
 0x1f0   : > { %v2592_v25 = vpop.permute.xlu0 %2591  ;;  %1393 = vrot.lane.b32.xlu1 %v7367_v13, %s7482_s6  ;;  %v4903_v42 = vcombine.low %v4894_v45, %v4901_v27  ;;  %v5163_v60 = vcombine.low %v5155_v38, %v5162_v6  ;;  %v10830_v13 = vld [vmem:[#allocation61_spill] sm:$0xff]  ;;  %v10831_v38 = vrot.slane %v9307_v43, 1  ;;  %v9705_v6 = vcombine.low %v6395_v15, %v9686_v59  ;;  %v7372_v43 = vld [vmem:[%s7575_s30 + $0xbc] ss:$0 sps:$4 sm:$0x11]  }
 0x1f1   : > { %v2936_v29 = vsel %vm2890_vm5, %v2856_v9, %v10830_v13  ;;  %v7253_v9 = vld [vmem:[%s7575_s30 + $0x80] ss:$0 sps:$4 sm:$0x11]   ;;  %v1707_v15 = vshrl.u32 %v9509_v55, 16 }
 0x1f2   : > { %1991 = vrot.lane.b32.xlu0 %v1925_v19, %s7483_s7  ;;  %v9649_v24 = vpop.permute.xlu1 %1797  ;;  %7068 = vmatmul.mubr.msk.bf16.vlgmr.msra.gmra.mrb[0].mxu1 %vm5586_vm12, %v5163_v60  ;;  %v4917_v37 = vrot.slane %v4903_v42, %v8643_v62  ;;  %v3009_v14 = vsel %vm2963_vm6, %v2936_v29, %v9487_v53  ;;  %v2716_v19 = vrot.slane %v9645_v4, 1  ;;  %v6437_v29 = vld [vmem:[%s7575_s30 + $0xc0] sm:$0xe] }
 0x1f3   : > { %7071 = vmatprep.mubr.msk.bf16.mxu1 %vm7489_vm3, %v10804_v21  ;;  %v3082_v28 = vsel %vm3036_vm7, %v3009_v14, %v9539_v30  ;;  %v2484_v30 = vshrl.u32 %v9437_v54, 16 }
 0x1f4   : > { %v9658_v36 = vpop.permute.xlu0 %1387  ;;  %2207 = vrot.lane.b32.xlu1 %v6702_v63, %s7487_s18  ;;  %v4918_v57 = vcombine.low %v4910_v61, %v4917_v37  ;;  %v2493_v63 = vor.u32 %v2492_v3, %v2488_v40  ;;  %v2717_v42 = vsel %vm1088_vm1, %v2715_v0, %v2716_v19  ;;  %v1713_v40 = vshll.u32 %v9705_v6, 16  ;;  %v7373_v37 = vld [vmem:[%s7575_s30 + $0x80] ss:$0 sps:$4 sm:$0x11]  }
 0x1f5   : > { %v2486_v12 = vor.u32 %v2484_v30, %v9478_v16  ;;  %v2409_v3 = vshrl.u32 %v9415_v48, 16  ;;  %v1711_v16 = vshrl.u32 %v9705_v6, 16  ;;  %v7374_v0 = vld [vmem:[%s7575_s30 + $0xbc] ss:$0 sps:$4 sm:$0x11]  }
 0x1f6   : > { %1809 = vrot.lane.b32.xlu0 %v1694_v49, %s7484_s8  ;;  %v9665_v56 = vpop.permute.xlu1 %1781  ;;  %7048 = vmatmul.mubr.msk.bf16.gmra.mrb[24].mxu0 %vm5586_vm12, %v4918_v57  ;;  %v2498_v53 = vsel %vm691_vm0, %v2493_v63, %v9672_v58  ;;  %v1715_v34 = vrot.slane %v1713_v40, 1  ;;  %v10833_v30 = vld [vmem:[#allocation28_spill] sm:$0xff]  ;;  %v10837_v40 = vld [vmem:[#allocation53_spill] sm:$0xff] }
 0x1f7   : > { %7051 = vmatprep.mubr.msk.bf16.mxu0 %vm7489_vm3, %v10804_v21  ;;  %v2411_v13 = vor.u32 %v2409_v3, %v9462_v11  ;;  %v10838_v3 = vld [vmem:[#allocation58_spill] sm:$0xff] }
 0x1f8   : > { %v2772_v7 = vpop.permute.xlu0 %2771  ;;  %1989 = vrot.lane.b32.xlu1 %v1921_v46, %s7483_s7  ;;  %v3155_v46 = vsel %vm3109_vm8, %v3082_v28, %v9603_v52  ;;  %v1716_v28 = vor.u32 %v1715_v34, %v1711_v16  ;;  %v6485_v34 = vld [vmem:[%s7575_s30 + $0xcc] sm:$0xf] }
 0x1f9   : > { %v3228_v27 = vsel %vm3182_vm9, %v3155_v46, %v2196_v33 }
 0x1fa   : > { %1789 = vrot.lane.b32.xlu0 %v1619_v35, %s7484_s8  ;;  %v9691_v41 = vpop.permute.xlu1 %1977  ;;  %v3301_v52 = vsel %vm3255_vm10, %v3228_v27, %v2592_v25  ;;  %v9721_v25 = vld [vmem:[%s7575_s30 + $0xc8] ss:$0 sps:$4 sm:$0x33]  }
 0x1fb   : > { %v3374_v33 = vsel %vm3328_vm11, %v3301_v52, %v2772_v7  ;;  %v1718_v35 = vshll.u32 %v9721_v25, 16  ;;  %v10834_v52 = vld [vmem:[#allocation12_spill] sm:$0xff] }
 0x1fc   : > { %v9698_v45 = vpop.permute.xlu0 %1783  ;;  %1969 = vrot.lane.b32.xlu1 %v10831_v38, %s7483_s7  ;;  %v4137_v8 = vrot.slane %v3374_v33, %v8643_v62  ;;  %v4130_v7 = vcombine.high %v3374_v33, %v3374_v33  ;;  %v6671_v38 = vcombine.low %v6437_v29, %v9686_v59  ;;  %v2836_v54 = vsel %vm2799_vm4, %v10834_v52, %v10833_v30  ;;  %v10836_v33 = vld [vmem:[#allocation50_spill] sm:$0xff] }
 0x1fd   : > { %v9746_v46 = vrot.slane %v1718_v35, 1  ;;  %v9772_v35 = vld [vmem:[%s7575_s30 + $0xd0] sm:$0xf] }
 0x1fe   : > { %2603 = vrot.lane.b32.xlu0 %v2498_v53, %s7485_s11  ;;  %v9713_v60 = vpop.permute.xlu1 %1963  ;;  %v4145_v47 = vcombine.high %v4137_v8, %v4137_v8  ;;  %v10832_v53 = vld [vmem:[#allocation22_spill] sm:$0xff]  ;;  %v9765_v59 = vrot.slane %v4130_v7, %v8643_v62  ;;  %v9768_v16 = vrot.slane %v4137_v8, %v8643_v62 }
 0x1ff   : > { %v2834_v11 = vsel %vm2799_vm4, %v7240_v20, %v10832_v53  ;;  %v3831_v20 = vcombine.high %v3829_v32, %v3829_v32  ;;  %v1721_v29 = vsel %vm691_vm0, %v1716_v28, %v9746_v46  ;;  %v1926_v53 = vrot.slane %v6671_v38, 1 }
 0x200   : > { %v9716_v49 = vpop.permute.xlu0 %1961  ;;  %2783 = vrot.lane.b32.xlu1 %v2717_v42, %s7488_s23  ;;  %v4167_v27 = vrot.slane %v4145_v47, %v8643_v62 }
 0x202   : > { %2205 = vrot.lane.b32.xlu0 %v7372_v43, %s7487_s18  ;;  %v9726_v61 = vpop.permute.xlu1 %2177  ;;  %v2918_v43 = vsel %vm2890_vm5, %v2834_v11, %v10836_v33  ;;  %v4177_v8 = vcombine.high %v4167_v27, %v4167_v27  ;;  %v1927_v11 = vrot.slane %v9721_v25, 1 }
 0x203   : > { %v2991_v28 = vsel %vm2963_vm6, %v2918_v43, %v9634_v10  ;;  %v9826_v43 = vld [vmem:[%s7575_s30 + $0xd4] ss:$0 sps:$4 sm:$0x33]  }
 0x204   : > { %v2194_v57 = vpop.permute.xlu0 %2193  ;;  %2601 = vrot.lane.b32.xlu1 %v2486_v12, %s7485_s11 }
 0x206   : > { %2185 = vrot.lane.b32.xlu0 %v7373_v37, %s7487_s18  ;;  %v2590_v63 = vpop.permute.xlu1 %2589  ;;  %v2920_v37 = vsel %vm2890_vm5, %v2836_v54, %v10837_v40 }
 0x207   : > { %v2993_v30 = vsel %vm2963_vm6, %v2920_v37, %v9658_v36  ;;  %v4175_v36 = vcombine.high %v9768_v16, %v9768_v16 }
 0x208   : > { %v2180_v14 = vpop.permute.xlu0 %2179  ;;  %2781 = vrot.lane.b32.xlu1 %v2713_v5, %s7488_s23  ;;  %v10835_v5 = vld [vmem:[#allocation33_spill] sm:$0xff] }
 0x209   : > { %v2854_v42 = vsel %vm2799_vm4, %v7253_v9, %v10835_v5  ;;  %v5166_v40 = vcombine.low %v4167_v27, %v4175_v36 }
 0x20a   : > { %2581 = vrot.lane.b32.xlu0 %v2411_v13, %s7485_s11  ;;  %v2576_v12 = vpop.permute.xlu1 %2575  ;;  %v2934_v39 = vsel %vm2890_vm5, %v2854_v42, %v10838_v3  ;;  %v1709_v13 = vor.u32 %v1707_v15, %v9574_v1  ;;  %v9798_v15 = vrot.slane %v9765_v59, %v8643_v62 }
 0x20b   : > { %v3007_v47 = vsel %vm2963_vm6, %v2934_v39, %v9625_v18 }
 0x20c   : > { %v2574_v9 = vpop.permute.xlu0 %2573  ;;  %1417 = vrot.lane.b32.xlu1 %v7374_v0, %s7482_s6  ;;  %v3080_v7 = vsel %vm3036_vm7, %v3007_v47, %v9649_v24  ;;  %v2499_v0 = vshrl.u32 %v9645_v4, 16  ;;  %v9794_v24 = vcombine.low %v6485_v34, %v9772_v35  ;;  %v6438_v4 = vld [vmem:[%s7575_s30 + $0xcc] sm:$0xe] }
 0x20d   : > { %v3153_v18 = vsel %vm3109_vm8, %v3080_v7, %v9691_v41  ;;  %v3066_v41 = vsel %vm3036_vm7, %v2993_v30, %v9698_v45  ;;  %v3064_v45 = vsel %vm3036_vm7, %v2991_v28, %v9665_v56  ;;  %v5188_v7 = vrot.slane %v5166_v40, %v8643_v62 }
 0x20e   : > { %2761 = vrot.lane.b32.xlu0 %v2698_v31, %s7488_s23  ;;  %v9790_v1 = vpop.permute.xlu1 %1407  ;;  %v3226_v48 = vsel %vm3182_vm9, %v3153_v18, %v2194_v57  ;;  %v9806_v31 = vrot.slane %v3831_v20, %v8643_v62  ;;  %v3139_v38 = vsel %vm3109_vm8, %v3066_v41, %v9713_v60  ;;  %v5167_v57 = vcombine.low %v4177_v8, %v9798_v15 }
 0x20f   : > { %v3299_v52 = vsel %vm3255_vm10, %v3226_v48, %v2590_v63  ;;  %v3212_v5 = vsel %vm3182_vm9, %v3139_v38, %v2180_v14  ;;  %v3137_v10 = vsel %vm3109_vm8, %v3064_v45, %v9716_v49  ;;  %v2505_v56 = vshll.u32 %v9794_v24, 16  ;;  %v9880_v45 = vld [vmem:[%s7575_s30 + $0xd0] sm:$0xf] }
 0x210   : > { %v2770_v54 = vpop.permute.xlu0 %2769  ;;  %1813 = vrot.lane.b32.xlu1 %v1709_v13, %s7484_s8  ;;  %v3285_v33 = vsel %vm3255_vm10, %v3212_v5, %v2576_v12  ;;  %v3845_v14 = vrot.slane %v3829_v32, %v8643_v62  ;;  %v3210_v37 = vsel %vm3182_vm9, %v3137_v10, %v9726_v61  ;;  %v6757_v12 = vcombine.high %v9559_v17, %v9548_v2  ;;  %v7377_v61 = vld [vmem:[%s7575_s30 + $0xc8] ss:$0 sps:$4 sm:$0x11]  }
 0x211   : > { %v3372_v42 = vsel %vm3328_vm11, %v3299_v52, %v2770_v54  ;;  %v5195_v34 = vrot.slane %v5167_v57, %v8643_v62  ;;  %v1928_v17 = vsel %vm1088_vm1, %v1926_v53, %v1927_v11  ;;  %v2503_v55 = vshrl.u32 %v9794_v24, 16  ;;  %v6527_v53 = vld [vmem:[%s7575_s30 + $0xcc] sm:$0xe] }
 0x212   : > { %v4122_v60 = vrot.slane %v3372_v42, %v8643_v62  ;;  %1419 = vrot.lane.b32.xlu0 %v9705_v6, %s7482_s6  ;;  %v2756_v63 = vpop.permute.xlu1 %2755  ;;  %v3283_v6 = vsel %vm3255_vm10, %v3210_v37, %v2574_v9  ;;  %v4920_v27 = vcombine.low %v3845_v14, %v9806_v31  ;;  %v2510_v9 = vshll.u32 %v9826_v43, 16  ;;  %v6398_v54 = vld [vmem:[%s7575_s30 + $0xcc] sm:$0xf] }
 0x213   : > { %v9833_v49 = vsel %vm3328_vm11, %v3285_v33, %v2756_v63  ;;  %v6752_v13 = vcombine.high %v9613_v51, %v9600_v26  ;;  %v5174_v30 = vrot.slane %v6757_v12, %v8643_v62  ;;  %v6753_v18 = vcombine.high %v3845_v14, %v9806_v31 }
 0x214   : > { %v4129_v3 = vrot.slane %v4122_v60, %v8643_v62  ;;  %v9841_v39 = vrot.slane %v9833_v49, %v8643_v62  ;;  %v2754_v32 = vpop.permute.xlu0 %2753  ;;  %1993 = vrot.lane.b32.xlu1 %v1924_v23, %s7483_s7  ;;  %v2507_v23 = vrot.slane %v2505_v56, 1  ;;  %v2501_v51 = vor.u32 %v2499_v0, %v9672_v58 }
 0x215   : > { %v3356_v2 = vsel %vm3328_vm11, %v3283_v6, %v2754_v32  ;;  %v4936_v48 = vrot.slane %v4920_v27, %v8643_v62  ;;  %v5197_v52 = vcombine.low %v5188_v7, %v5195_v34  ;;  %v9890_v5 = vrot.slane %v2510_v9, 1  ;;  %v6488_v6 = vld [vmem:[%s7575_s30 + $0xd8] sm:$0xf]  ;;  %v7381_v9 = vld [vmem:[%s7575_s30 + $0xc8] ss:$0 sps:$4 sm:$0x11]  }
 0x216   : > { %v5165_v20 = vcombine.low %v4129_v3, %v9768_v16  ;;  %1815 = vrot.lane.b32.xlu0 %v1721_v29, %s7484_s8  ;;  %v9855_v47 = vpop.permute.xlu1 %1405  ;;  %v9865_v8 = vrot.slane %v9841_v39, %v8643_v62  ;;  %v3870_v16 = vrot.slane %v3356_v2, %v8643_v62  ;;  %v2508_v0 = vor.u32 %v2507_v23, %v2503_v55 }
 0x217   : > { %v5688_v29 = vpop.f32.mrb[0].mxu0  ;;  %v6743_v42 = vcombine.low %v6527_v53, %v9772_v35  ;;  %v4929_v10 = vrot.slane %v6752_v13, %v8643_v62  ;;  %v4943_v56 = vrot.slane %v6753_v18, %v8643_v62  ;;  %v9900_v12 = vcombine.low %v6398_v54, %v9880_v45  ;;  %v9904_v35 = vld [vmem:[%s7575_s30 + $0xdc] sm:$0xf]  ;;  %v10840_v54 = vld [vmem:[#allocation17_spill] sm:$0xff] }
 0x218   : > { %v5181_v36 = vrot.slane %v5165_v20, %v8643_v62  ;;  %v7025_v41 = vpop.f32.mrb[1].mxu0  ;;  %v9872_v26 = vpop.permute.xlu0 %1803  ;;  %2209 = vrot.lane.b32.xlu1 %v7377_v61, %s7487_s18  ;;  %v3877_v28 = vrot.slane %v3870_v16, %v8643_v62  ;;  %v6108_v14 = vmul.f32 %v5688_v29, %v5688_v29  ;;  %v5211_v27 = vrot.slane %v5197_v52, %v8643_v62  ;;  %v10839_v52 = vld [vmem:[#allocation38_spill] sm:$0xff] }
 0x219   : > { %v5691_v38 = vpop.f32.mrb[2].mxu0  ;;  %v4951_v3 = vcombine.low %v4929_v10, %v4936_v48  ;;  %v2718_v20 = vrot.slane %v6743_v42, 1  ;;  %v2719_v13 = vrot.slane %v9826_v43, 1  ;;  %v9919_v7 = vcombine.low %v6488_v6, %v9904_v35  ;;  %v9939_v41 = vld [vmem:[%s7575_s30 + $0xe0] ss:$0 sps:$4 sm:$0x33]  }
 0x21a   : > { %v5196_v57 = vcombine.low %v5174_v30, %v5181_v36  ;;  %v7026_v31 = vpop.f32.mrb[3].mxu0  ;;  %1995 = vrot.lane.b32.xlu0 %v1928_v17, %s7483_s7  ;;  %v9888_v58 = vpop.permute.xlu1 %1389  ;;  %v4922_v33 = vcombine.low %v3877_v28, %v9865_v8  ;;  %v6877_v60 = vpack.c.bf16 %v5691_v38, %v5688_v29  ;;  %v9895_v63 = vadd.f32 %v5691_v38, %v5688_v29  ;;  %v6401_v28 = vld [vmem:[%s7575_s30 + $0xd8] sm:$0xf] }
 0x21b   : > { %v6109_v40 = vmul.f32 %v5691_v38, %v5691_v38  ;;  %v2513_v17 = vsel %vm691_vm0, %v2508_v0, %v9890_v5  ;;  %v1728_v29 = vshll.u32 %v9900_v12, 16  ;;  %v4959_v53 = vrot.slane %v4951_v3, %v8643_v62  ;;  %v9949_v38 = vld [vmem:[%s7575_s30 + $0xdc] sm:$0xf] }
 0x21c   : > { %v1984_v37 = vpop.permute.xlu0 %1983  ;;  %2605 = vrot.lane.b32.xlu1 %v2501_v51, %s7485_s11  ;;  %v4950_v32 = vrot.slane %v4922_v33, %v8643_v62  ;;  %6878 = vst [vmem:[%s9885_s9] sm:$0xff] %v6877_v60   ;;  %v5204_v61 = vrot.slane %v5196_v57, %v8643_v62  ;;  %v1722_v18 = vshrl.u32 %v9721_v25, 16  ;;  %v2720_v51 = vsel %vm1088_vm1, %v2718_v20, %v2719_v13  ;;  %v10841_v33 = vld [vmem:[#allocation63_spill] sm:$0xff]  ;;  %v7255_v20 = vld [vmem:[%s7575_s30 + $0x8c] ss:$0 sps:$4 sm:$0x11]  }
 0x21d   : > { %v9910_v34 = vadd.f32 %v6109_v40, %v6108_v14  ;;  %v2520_v48 = vshll.u32 %v9919_v7, 16  ;;  %v2861_v57 = vsel %vm2799_vm4, %v10840_v54, %v10839_v52  ;;  %v1726_v0 = vshrl.u32 %v9900_v12, 16  ;;  %v10843_v52 = vld [vmem:[#allocation35_spill] sm:$0xff] }
 0x21e   : > { %2211 = vrot.lane.b32.xlu0 %v9794_v24, %s7487_s18  ;;  %v2200_v2 = vpop.permute.xlu1 %2199  ;;  %v4952_v55 = vcombine.low %v4943_v56, %v4950_v32  ;;  %v5212_v23 = vcombine.low %v5204_v61, %v5211_v27  ;;  %v9927_v24 = vld [vmem:[%s7575_s30 + $0xd4] ss:$0 sps:$4 sm:$0x33]   ;;  %v1730_v42 = vrot.slane %v1728_v29, 1  ;;  %v2940_v60 = vsel %vm2890_vm5, %v2861_v57, %v10841_v33  ;;  %v6528_v32 = vld [vmem:[%s7575_s30 + $0xd8] sm:$0xe] }
 0x21f   : > { %v1733_v10 = vshll.u32 %v9927_v24, 16  ;;  %v1724_v56 = vor.u32 %v1722_v18, %v9746_v46  ;;  %v3013_v14 = vsel %vm2963_vm6, %v2940_v60, %v9790_v1  ;;  %v6672_v6 = vcombine.low %v6438_v4, %v9880_v45  ;;  %v7244_v61 = vld [vmem:[%s7575_s30 + $0x5c] ss:$0 sps:$4 sm:$0x11]  }
 0x220   : > { %v9921_v16 = vpop.permute.xlu0 %1801  ;;  %2785 = vrot.lane.b32.xlu1 %v2716_v19, %s7488_s23  ;;  %7072 = vmatmul.mubr.msk.bf16.gmra.mrb[4].mxu1 %vm5586_vm12, %v5212_v23  ;;  %v4966_v30 = vrot.slane %v4952_v55, %v8643_v62  ;;  %v9970_v3 = vcombine.low %v6401_v28, %v9949_v38  ;;  %v3086_v46 = vsel %vm3036_vm7, %v3013_v14, %v9872_v26  ;;  %v2518_v1 = vshrl.u32 %v9919_v7, 16  ;;  %v7384_v26 = vld [vmem:[%s7575_s30 + $0xd4] ss:$0 sps:$4 sm:$0x11]  }
 0x221   : > { %7075 = vmatprep.mubr.msk.bf16.mxu1 %vm7489_vm3, %v10804_v21  ;;  %v2522_v27 = vrot.slane %v2520_v48, 1  ;;  %v3159_v45 = vsel %vm3109_vm8, %v3086_v46, %v1984_v37  ;;  %v1731_v23 = vor.u32 %v1730_v42, %v1726_v0  ;;  %v2514_v37 = vshrl.u32 %v9826_v43, 16 }
 0x222   : > { %2607 = vrot.lane.b32.xlu0 %v2513_v17, %s7485_s11  ;;  %v9935_v36 = vpop.permute.xlu1 %1981  ;;  %v4967_v19 = vcombine.low %v4959_v53, %v4966_v30  ;;  %v2525_v17 = vshll.u32 %v9939_v41, 16  ;;  %v3232_v29 = vsel %vm3182_vm9, %v3159_v45, %v2200_v2  ;;  %v6744_v53 = vcombine.low %v6528_v32, %v9904_v35  ;;  %v10842_v35 = vld [vmem:[#allocation27_spill] sm:$0xff] }
 0x223   : > { %v1929_v4 = vrot.slane %v6672_v6, 1  ;;  %v1743_v25 = vshll.u32 %v9970_v3, 16  ;;  %v1930_v2 = vrot.slane %v9927_v24, 1  ;;  %v2839_v28 = vsel %vm2799_vm4, %v7244_v61, %v10842_v35 }
 0x224   : > { %v9954_v31 = vpop.permute.xlu0 %1785  ;;  %1421 = vrot.lane.b32.xlu1 %v7381_v9, %s7482_s6  ;;  %7052 = vmatmul.mubr.msk.bf16.gmra.mrb[28].mxu0 %vm5586_vm12, %v4967_v19  ;;  %v9985_v9 = vrot.slane %v1733_v10, 1  ;;  %v6439_v19 = vld [vmem:[%s7575_s30 + $0xd8] sm:$0xe]  ;;  %v9999_v48 = vrot.slane %v2525_v17, 1  ;;  %v2859_v54 = vsel %vm2799_vm4, %v7255_v20, %v10843_v52  ;;  %v3878_v33 = vcombine.high %v9833_v49, %v9833_v49 }
 0x225   : > { %7055 = vmatprep.mubr.msk.bf16.mxu0 %vm7489_vm3, %v10804_v21  ;;  %v10014_v10 = vld [vmem:[%s7575_s30 + $0xe0] ss:$0 sps:$4 sm:$0x33]   ;;  %v2721_v60 = vrot.slane %v6744_v53, 1  ;;  %v6673_v14 = vcombine.low %v6439_v19, %v9949_v38  ;;  %v3893_v6 = vcombine.high %v9841_v39, %v9841_v39  ;;  %v1741_v61 = vshrl.u32 %v9970_v3, 16 }
 0x226   : > { %2787 = vrot.lane.b32.xlu0 %v2720_v51, %s7488_s23  ;;  %v9966_v40 = vpop.permute.xlu1 %1965  ;;  %v2523_v51 = vor.u32 %v2522_v27, %v2518_v1  ;;  %v1736_v42 = vsel %vm691_vm0, %v1731_v23, %v9985_v9  ;;  %v1745_v46 = vrot.slane %v1743_v25, 1  ;;  %v10844_v1 = vld [vmem:[#allocation52_spill] sm:$0xff]  ;;  %v1931_v39 = vsel %vm1088_vm1, %v1929_v4, %v1930_v2  ;;  %v6491_v53 = vld [vmem:[%s7575_s30 + $0xe4] sm:$0xf] }
 0x227   : > { %v2922_v49 = vsel %vm2890_vm5, %v2839_v28, %v10844_v1  ;;  %v10845_v27 = vld [vmem:[#allocation60_spill] sm:$0xff]  ;;  %v3915_v19 = vrot.slane %v3893_v6, %v8643_v62  ;;  %v1933_v28 = vrot.slane %v10014_v10, 1 }
 0x228   : > { %v2596_v55 = vpop.permute.xlu0 %2595  ;;  %1997 = vrot.lane.b32.xlu1 %v1927_v11, %s7483_s7  ;;  %v2938_v17 = vsel %vm2890_vm5, %v2859_v54, %v10845_v27  ;;  %v2528_v20 = vsel %vm691_vm0, %v2523_v51, %v9999_v48  ;;  %v10052_v52 = vor.u32 %v1745_v46, %v1741_v61 }
 0x229   : > { %v3305_v30 = vsel %vm3255_vm10, %v3232_v29, %v2596_v55  ;;  %v3011_v6 = vsel %vm2963_vm6, %v2938_v17, %v9855_v47  ;;  %v2995_v47 = vsel %vm2963_vm6, %v2922_v49, %v9888_v58 }
 0x22a   : > { %1817 = vrot.lane.b32.xlu0 %v1724_v56, %s7484_s8  ;;  %v2776_v18 = vpop.permute.xlu1 %2775  ;;  %v2722_v56 = vrot.slane %v9939_v41, 1  ;;  %v3084_v27 = vsel %vm3036_vm7, %v3011_v6, %v9921_v16  ;;  %v4176_v16 = vcombine.high %v9798_v15, %v9798_v15  ;;  %v3068_v58 = vsel %vm3036_vm7, %v2995_v47, %v9954_v31 }
 0x22b   : > { %v9996_v11 = vsel %vm3328_vm11, %v3305_v30, %v2776_v18  ;;  %v10041_v30 = vld [vmem:[%s7575_s30 + $0xe8] sm:$0xf]  ;;  %v3892_v18 = vrot.slane %v3878_v33, %v8643_v62  ;;  %v3157_v17 = vsel %vm3109_vm8, %v3084_v27, %v9935_v36 }
 0x22c   : > { %v4200_v57 = vrot.slane %v9996_v11, %v8643_v62  ;;  %v10007_v0 = vpop.permute.xlu0 %2197  ;;  %1423 = vrot.lane.b32.xlu1 %v9900_v12, %s7482_s6  ;;  %v2516_v12 = vor.u32 %v2514_v37, %v9890_v5  ;;  %v4146_v5 = vcombine.high %v9765_v59, %v9765_v59  ;;  %v10047_v59 = vsel %vm1088_vm1, %v2721_v60, %v2722_v56 }
 0x22d   : > { %v10058_v60 = vcombine.low %v6491_v53, %v10041_v30  ;;  %v3908_v46 = vrot.slane %v3892_v18, %v8643_v62  ;;  %v3230_v36 = vsel %vm3182_vm9, %v3157_v17, %v10007_v0  ;;  %v10101_v53 = vld [vmem:[%s7575_s30 + $0xec] ss:$0 sps:$4 sm:$0x33]  }
 0x22e   : > { %2213 = vrot.lane.b32.xlu0 %v7384_v26, %s7487_s18  ;;  %v2594_v32 = vpop.permute.xlu1 %2593  ;;  %v4208_v45 = vcombine.high %v4200_v57, %v4200_v57  ;;  %v1748_v26 = vshll.u32 %v10014_v10, 16 }
 0x22f   : > { %v5696_v38 = vpop.f32.mrb[4].mxu0  ;;  %v3303_v49 = vsel %vm3255_vm10, %v3230_v36, %v2594_v32  ;;  %v2533_v17 = vshrl.u32 %v10058_v60, 16 }
 0x230   : > { %v6061_v55 = vadd.f32 %v9895_v63, %v5696_v38  ;;  %v7029_v23 = vpop.f32.mrb[5].mxu0  ;;  %v2182_v29 = vpop.permute.xlu0 %2181  ;;  %1819 = vrot.lane.b32.xlu1 %v1736_v42, %s7484_s8  ;;  %v6110_v37 = vmul.f32 %v5696_v38, %v5696_v38  ;;  %v1932_v63 = vrot.slane %v6673_v14, 1  ;;  %v4174_v14 = vrot.slane %v4146_v5, %v8643_v62 }
 0x231   : > { %v5699_v4 = vpop.f32.mrb[6].mxu0  ;;  %v10068_v61 = vrot.slane %v1748_v26, 1  ;;  %v3925_v5 = vcombine.high %v3915_v19, %v3915_v19  ;;  %v3924_v26 = vcombine.high %v3908_v46, %v3908_v46 }
 0x232   : > { %v6882_v25 = vpack.c.bf16 %v5699_v4, %v5696_v38  ;;  %v7030_v51 = vpop.f32.mrb[7].mxu0  ;;  %2609 = vrot.lane.b32.xlu0 %v2516_v12, %s7485_s11  ;;  %v2578_v35 = vpop.permute.xlu1 %2577  ;;  %v6150_v54 = vadd.f32 %v9910_v34, %v6110_v37  ;;  %v10055_v42 = vadd.f32 %v6061_v55, %v5699_v4  ;;  %v6111_v33 = vmul.f32 %v5699_v4, %v5699_v4 }
 0x233   : > { %v4230_v12 = vrot.slane %v4208_v45, %v8643_v62  ;;  %v3894_v34 = vcombine.high %v3892_v18, %v3892_v18  ;;  %v4216_v45 = vrot.slane %v4200_v57, %v8643_v62  ;;  %v3923_v55 = vcombine.high %v9865_v8, %v9865_v8 }
 0x234   : > { %6974 = vst [vmem:[%s9885_s9 + $0x8] sm:$0xff] %v6882_v25   ;;  %v10065_v1 = vpop.permute.xlu0 %1391  ;;  %1999 = vrot.lane.b32.xlu1 %v1931_v39, %s7483_s7  ;;  %v10073_v38 = vadd.f32 %v6150_v54, %v6111_v33  ;;  %v3141_v57 = vsel %vm3109_vm8, %v3068_v58, %v9966_v40  ;;  %v4969_v0 = vcombine.low %v3925_v5, %v3908_v46 }
 0x235   : > { %v5215_v43 = vcombine.low %v4216_v45, %v4230_v12  ;;  %v3922_v15 = vrot.slane %v3894_v34, %v8643_v62  ;;  %v3214_v8 = vsel %vm3182_vm9, %v3141_v57, %v2182_v29  ;;  %v5213_v37 = vcombine.low %v4174_v14, %v4176_v16 }
 0x236   : > { %2789 = vrot.lane.b32.xlu0 %v2719_v13, %s7488_s23  ;;  %v10083_v39 = vpop.permute.xlu1 %1411  ;;  %v6758_v13 = vcombine.high %v4216_v45, %v4230_v12  ;;  %v3287_v18 = vsel %vm3255_vm10, %v3214_v8, %v2578_v35  ;;  %v4968_v4 = vcombine.low %v3915_v19, %v3923_v55  ;;  %v4178_v25 = vcombine.high %v4174_v14, %v4174_v14 }
 0x237   : > { %v5237_v51 = vrot.slane %v5215_v43, %v8643_v62  ;;  %v1934_v19 = vsel %vm1088_vm1, %v1932_v63, %v1933_v28  ;;  %v1737_v14 = vshrl.u32 %v9927_v24, 16  ;;  %v2540_v12 = vshll.u32 %v10101_v53, 16  ;;  %v6529_v43 = vld [vmem:[%s7575_s30 + $0xe4] sm:$0xe] }
 0x238   : > { %v2774_v23 = vpop.permute.xlu0 %2773  ;;  %2611 = vrot.lane.b32.xlu1 %v2528_v20, %s7485_s11  ;;  %v2535_v20 = vshll.u32 %v10058_v60, 16  ;;  %v5244_v54 = vrot.slane %v6758_v13, %v8643_v62  ;;  %v4985_v34 = vrot.slane %v4969_v0, %v8643_v62  ;;  %v3926_v27 = vcombine.high %v3922_v15, %v3922_v15 }
 0x239   : > { %v3376_v31 = vsel %vm3328_vm11, %v3303_v49, %v2774_v23  ;;  %v5223_v47 = vrot.slane %v5213_v37, %v8643_v62  ;;  %v1751_v63 = vsel %vm691_vm0, %v10052_v52, %v10068_v61  ;;  %v4978_v16 = vrot.slane %v4968_v4, %v8643_v62 }
 0x23a   : > { %v4185_v40 = vrot.slane %v3376_v31, %v8643_v62  ;;  %2215 = vrot.lane.b32.xlu0 %v9919_v7, %s7487_s18  ;;  %v2758_v32 = vpop.permute.xlu1 %2757  ;;  %v4970_v7 = vcombine.low %v3922_v15, %v3924_v26  ;;  %v2537_v45 = vrot.slane %v2535_v20, 1  ;;  %v5246_v55 = vcombine.low %v5237_v51, %v5244_v54 }
 0x23b   : > { %v3360_v29 = vsel %vm3328_vm11, %v3287_v18, %v2758_v32  ;;  %v5000_v15 = vcombine.low %v4978_v16, %v4985_v34  ;;  %v10145_v8 = vrot.slane %v2540_v12, 1  ;;  %v6745_v31 = vcombine.low %v6529_v43, %v10041_v30  ;;  %v10846_v16 = vld [vmem:[#allocation30_spill] sm:$0xff]  ;;  %v10848_v43 = vld [vmem:[#allocation55_spill] sm:$0xff] }
 0x23c   : > { %v4192_v33 = vrot.slane %v4185_v40, %v8643_v62  ;;  %v3933_v35 = vrot.slane %v3360_v29, %v8643_v62  ;;  %v10113_v6 = vpop.permute.xlu0 %1787  ;;  %1427 = vrot.lane.b32.xlu1 %v9970_v3, %s7482_s6  ;;  %v4992_v49 = vrot.slane %v4970_v7, %v8643_v62  ;;  %v2538_v26 = vor.u32 %v2537_v45, %v2533_v17 }
 0x23d   : > { %v5260_v32 = vrot.slane %v5246_v55, %v8643_v62  ;;  %v1739_v20 = vor.u32 %v1737_v14, %v9985_v9  ;;  %v2724_v54 = vrot.slane %v6745_v31, 1  ;;  %v2529_v14 = vshrl.u32 %v9939_v41, 16  ;;  %v10847_v55 = vld [vmem:[#allocation13_spill] sm:$0xff] }
 0x23e   : > { %v5214_v46 = vcombine.low %v4178_v25, %v4192_v33  ;;  %v3940_v5 = vrot.slane %v3933_v35, %v8643_v62  ;;  %2791 = vrot.lane.b32.xlu0 %v10047_v59, %s7488_s23  ;;  %v10126_v3 = vpop.permute.xlu1 %1967  ;;  %v7393_v59 = vld [vmem:[%s7575_s30 + $0xd4] ss:$0 sps:$4 sm:$0x11]   ;;  %v5008_v25 = vrot.slane %v5000_v15, %v8643_v62  ;;  %v2543_v51 = vsel %vm691_vm0, %v2538_v26, %v10145_v8  ;;  %v10849_v15 = vld [vmem:[#allocation40_spill] sm:$0xff]  ;;  %v10850_v26 = vld [vmem:[#allocation18_spill] sm:$0xff] }
 0x23f   : > { %v2725_v33 = vrot.slane %v10101_v53, 1  ;;  %v4193_v24 = vcombine.high %v9996_v11, %v9996_v11  ;;  %v2866_v31 = vsel %vm2799_vm4, %v10850_v26, %v10849_v15 }
 0x240   : > { %v5230_v58 = vrot.slane %v5214_v46, %v8643_v62  ;;  %v4971_v36 = vcombine.low %v3926_v27, %v3940_v5  ;;  %v10135_v57 = vpop.permute.xlu0 %1807  ;;  %2003 = vrot.lane.b32.xlu1 %v1934_v19, %s7483_s7 }
 0x242   : > { %v5245_v13 = vcombine.low %v5223_v47, %v5230_v58  ;;  %v4999_v52 = vrot.slane %v4971_v36, %v8643_v62  ;;  %1823 = vrot.lane.b32.xlu0 %v1751_v63, %s7484_s8  ;;  %v10143_v23 = vpop.permute.xlu1 %1987  ;;  %v2726_v63 = vsel %vm1088_vm1, %v2724_v54, %v2725_v33  ;;  %v2841_v58 = vsel %vm2799_vm4, %v10847_v55, %v10846_v16 }
 0x244   : > { %v5001_v0 = vcombine.low %v4992_v49, %v4999_v52  ;;  %v10148_v18 = vpop.permute.xlu0 %1409  ;;  %1425 = vrot.lane.b32.xlu1 %v7393_v59, %s7482_s6  ;;  %v5253_v40 = vrot.slane %v5245_v13, %v8643_v62  ;;  %v7397_v59 = vld [vmem:[%s7575_s30 + $0xe0] ss:$0 sps:$4 sm:$0x11]   ;;  %v2924_v13 = vsel %vm2890_vm5, %v2841_v58, %v10848_v43  ;;  %v1752_v49 = vshrl.u32 %v10014_v10, 16 }
 0x246   : > { %2219 = vrot.lane.b32.xlu0 %v10058_v60, %s7487_s18  ;;  %v10156_v37 = vpop.permute.xlu1 %1805  ;;  %v5261_v4 = vcombine.low %v5253_v40, %v5260_v32  ;;  %v5015_v30 = vrot.slane %v5001_v0, %v8643_v62  ;;  %v4207_v32 = vrot.slane %v4193_v24, %v8643_v62 }
 0x247   : > { %v5704_v29 = vpop.f32.mrb[8].mxu0 }
 0x248   : > { %v6063_v35 = vadd.f32 %v10055_v42, %v5704_v29  ;;  %v6112_v9 = vmul.f32 %v5704_v29, %v5704_v29  ;;  %v7033_v7 = vpop.f32.mrb[9].mxu0  ;;  %7076 = vmatmul.mubr.msk.bf16.gmra.mrb[8].mxu1 %vm5586_vm12, %v5261_v4  ;;  %v2184_v60 = vpop.permute.xlu0 %2183  ;;  %1821 = vrot.lane.b32.xlu1 %v1739_v20, %s7484_s8  ;;  %v5016_v19 = vcombine.low %v5008_v25, %v5015_v30 }
 0x249   : > { %v5707_v12 = vpop.f32.mrb[10].mxu0  ;;  %7079 = vmatprep.mubr.msk.bf16.mxu1 %vm7489_vm3, %v10804_v21 }
 0x24a   : > { %v6152_v34 = vadd.f32 %v10073_v38, %v6112_v9  ;;  %v6887_v46 = vpack.c.bf16 %v5707_v12, %v5704_v29  ;;  %v10170_v27 = vadd.f32 %v6063_v35, %v5707_v12  ;;  %v6113_v42 = vmul.f32 %v5707_v12, %v5707_v12  ;;  %v7034_v5 = vpop.f32.mrb[11].mxu0  ;;  %2615 = vrot.lane.b32.xlu0 %v2543_v51, %s7485_s11  ;;  %v2580_v47 = vpop.permute.xlu1 %2579  ;;  %v10854_v12 = vld [vmem:[#allocation37_spill] sm:$0xff] }
 0x24b   : > { %7056 = vmatmul.mubr.msk.bf16.gmra.mrb[32].mxu0 %vm5586_vm12, %v5016_v19  ;;  %v2531_v38 = vor.u32 %v2529_v14, %v9999_v48  ;;  %v1754_v51 = vor.u32 %v1752_v49, %v10068_v61  ;;  %v7398_v19 = vld [vmem:[%s7575_s30 + $0xe0] ss:$0 sps:$4 sm:$0x11]   ;;  %v4209_v14 = vcombine.high %v4207_v32, %v4207_v32  ;;  %v7399_v5 = vld [vmem:[%s7575_s30 + $0xec] ss:$0 sps:$4 sm:$0x11]  }
 0x24c   : > { %6975 = vst [vmem:[%s9885_s9 + $0x10] sm:$0xff] %v6887_v46   ;;  %v10178_v17 = vadd.f32 %v6152_v34, %v6113_v42  ;;  %v2204_v45 = vpop.permute.xlu0 %2203  ;;  %2001 = vrot.lane.b32.xlu1 %v1930_v2, %s7483_s7  ;;  %7059 = vmatprep.mubr.msk.bf16.mxu0 %vm7489_vm3, %v10804_v21  ;;  %v2997_v2 = vsel %vm2963_vm6, %v2924_v13, %v10065_v1  ;;  %v10851_v1 = vld [vmem:[#allocation65_spill] sm:$0xff] }
 0x24d   : > { %v3070_v52 = vsel %vm3036_vm7, %v2997_v2, %v10113_v6  ;;  %v2944_v40 = vsel %vm2890_vm5, %v2866_v31, %v10851_v1  ;;  %v7259_v6 = vld [vmem:[%s7575_s30 + $0x98] ss:$0 sps:$4 sm:$0x11]  }
 0x24e   : > { %2795 = vrot.lane.b32.xlu0 %v2726_v63, %s7488_s23  ;;  %v2600_v36 = vpop.permute.xlu1 %2599  ;;  %v3143_v0 = vsel %vm3109_vm8, %v3070_v52, %v10126_v3  ;;  %v3017_v4 = vsel %vm2963_vm6, %v2944_v40, %v10083_v39  ;;  %v10852_v3 = vld [vmem:[#allocation24_spill] sm:$0xff]  ;;  %v2544_v63 = vshrl.u32 %v10101_v53, 16 }
 0x24f   : > { %v3216_v20 = vsel %vm3182_vm9, %v3143_v0, %v2184_v60  ;;  %v10853_v29 = vrot.slane %v10852_v3, 1  ;;  %v3090_v54 = vsel %vm3036_vm7, %v3017_v4, %v10135_v57  ;;  %v2864_v57 = vsel %vm2799_vm4, %v7259_v6, %v10854_v12 }
 0x250   : > { %v1986_v48 = vpop.permute.xlu0 %1985  ;;  %2613 = vrot.lane.b32.xlu1 %v2531_v38, %s7485_s11  ;;  %v3289_v25 = vsel %vm3255_vm10, %v3216_v20, %v2580_v47  ;;  %v3163_v9 = vsel %vm3109_vm8, %v3090_v54, %v10143_v23  ;;  %v10855_v47 = vld [vmem:[#allocation62_spill] sm:$0xff] }
 0x251   : > { %v3236_v61 = vsel %vm3182_vm9, %v3163_v9, %v2204_v45  ;;  %v2942_v41 = vsel %vm2890_vm5, %v2864_v57, %v10855_v47 }
 0x252   : > { %2217 = vrot.lane.b32.xlu0 %v7397_v59, %s7487_s18  ;;  %v10207_v11 = vpop.permute.xlu1 %2201  ;;  %v3309_v34 = vsel %vm3255_vm10, %v3236_v61, %v2600_v36  ;;  %v3015_v45 = vsel %vm2963_vm6, %v2942_v41, %v10148_v18  ;;  %v4223_v36 = vrot.slane %v4207_v32, %v8643_v62  ;;  %v4237_v59 = vrot.slane %v4209_v14, %v8643_v62 }
 0x253   : > { %v3088_v43 = vsel %vm3036_vm7, %v3015_v45, %v10156_v37 }
 0x254   : > { %v2760_v30 = vpop.permute.xlu0 %2759  ;;  %1213 = vrot.lane.b32.xlu1 %v10853_v29, %s7481_s5  ;;  %v3161_v32 = vsel %vm3109_vm8, %v3088_v43, %v1986_v48  ;;  %v5262_v3 = vcombine.low %v4223_v36, %v4237_v59  ;;  %v6759_v29 = vcombine.high %v4223_v36, %v4237_v59 }
 0x255   : > { %v3362_v35 = vsel %vm3328_vm11, %v3289_v25, %v2760_v30  ;;  %v2546_v30 = vor.u32 %v2544_v63, %v10145_v8 }
 0x256   : > { %v3941_v7 = vcombine.high %v3362_v35, %v3362_v35  ;;  %v3948_v39 = vrot.slane %v3362_v35, %v8643_v62  ;;  %2793 = vrot.lane.b32.xlu0 %v2722_v56, %s7488_s23  ;;  %v2598_v60 = vpop.permute.xlu1 %2597  ;;  %v5272_v12 = vrot.slane %v5262_v3, %v8643_v62  ;;  %v5279_v57 = vrot.slane %v6759_v29, %v8643_v62 }
 0x258   : > { %v3955_v46 = vrot.slane %v3941_v7, %v8643_v62  ;;  %v3956_v23 = vcombine.high %v3948_v39, %v3948_v39  ;;  %v2780_v42 = vpop.permute.xlu0 %2779  ;;  %1825 = vrot.lane.b32.xlu1 %v1754_v51, %s7484_s8  ;;  %v3964_v16 = vrot.slane %v3948_v39, %v8643_v62 }
 0x259   : > { %v10241_v56 = vsel %vm3328_vm11, %v3309_v34, %v2780_v42 }
 0x25a   : > { %v3957_v38 = vcombine.high %v3955_v46, %v3955_v46  ;;  %v3978_v55 = vrot.slane %v3956_v23, %v8643_v62  ;;  %1429 = vrot.lane.b32.xlu0 %v7398_v19, %s7482_s6  ;;  %v10249_v58 = vpop.permute.xlu1 %1415  ;;  %v4263_v13 = vrot.slane %v10241_v56, %v8643_v62  ;;  %v3971_v24 = vrot.slane %v3955_v46, %v8643_v62 }
 0x25b   : > { %v5712_v18 = vpop.f32.mrb[12].mxu0  ;;  %v4256_v45 = vcombine.high %v10241_v56, %v10241_v56 }
 0x25c   : > { %v3985_v2 = vrot.slane %v3957_v38, %v8643_v62  ;;  %v5017_v49 = vcombine.low %v3964_v16, %v3978_v55  ;;  %v6754_v52 = vcombine.high %v3964_v16, %v3978_v55  ;;  %v7037_v15 = vpop.f32.mrb[13].mxu0  ;;  %v2778_v26 = vpop.permute.xlu0 %2777  ;;  %2221 = vrot.lane.b32.xlu1 %v7399_v5, %s7487_s18  ;;  %v4271_v31 = vcombine.high %v4263_v13, %v4263_v13 }
 0x25d   : > { %v4279_v0 = vrot.slane %v4263_v13, %v8643_v62  ;;  %v6065_v1 = vadd.f32 %v10170_v27, %v5712_v18  ;;  %v6114_v37 = vmul.f32 %v5712_v18, %v5712_v18  ;;  %v5715_v40 = vpop.f32.mrb[14].mxu0  ;;  %v3234_v27 = vsel %vm3182_vm9, %v3161_v32, %v10207_v11  ;;  %v10856_v13 = vld [vmem:[#allocation42_spill] sm:$0xff] }
 0x25e   : > { %v5019_v20 = vcombine.low %v3971_v24, %v3985_v2  ;;  %v6755_v6 = vcombine.high %v3971_v24, %v3985_v2  ;;  %v7038_v4 = vpop.f32.mrb[15].mxu0  ;;  %2005 = vrot.lane.b32.xlu0 %v1933_v28, %s7483_s7  ;;  %v10266_v25 = vpop.permute.xlu1 %1413  ;;  %v5027_v51 = vrot.slane %v5017_v49, %v8643_v62  ;;  %v5034_v48 = vrot.slane %v6754_v52, %v8643_v62  ;;  %v10858_v49 = vld [vmem:[#allocation67_spill] sm:$0xff]  ;;  %s6830_s7 = sshll.u32 %s7470_s15, 5  ;;  %s7491_s15 = smov [#allocation2]  }
 0x25f   : > { %v3307_v54 = vsel %vm3255_vm10, %v3234_v27, %v2598_v60  ;;  %v6154_v35 = vadd.f32 %v10178_v17, %v6114_v37  ;;  %v10281_v11 = vrot.slane %v4271_v31, %v8643_v62  ;;  %v4301_v9 = vcombine.high %v4279_v0, %v4279_v0  ;;  %s10608_s18 = scalar_lea.hbm %s10661_s3, %s6830_s7 }
 0x260   : > { %v1812_v10 = vpop.permute.xlu0 %1811  ;;  %2797 = vrot.lane.b32.xlu1 %v2725_v33, %s7488_s23  ;;  %v5041_v28 = vrot.slane %v5019_v20, %v8643_v62  ;;  %v5048_v8 = vrot.slane %v6755_v6, %v8643_v62  ;;  %v3380_v7 = vsel %vm3328_vm11, %v3307_v54, %v2778_v26  ;;  %v6892_v39 = vpack.c.bf16 %v5715_v40, %v5712_v18  ;;  %v10857_v18 = vld [vmem:[#allocation20_spill] sm:$0xff]  ;;  %s7404_s23 = sshll.u32 %s7491_s15, 4  ;;  %s7405_s23 = int_to_ptr.vmem [resolvable:$false] %s7404_s23 }
 0x261   : > { %v6066_v60 = vadd.f32 %v6065_v1, %v5715_v40  ;;  %v6115_v19 = vmul.f32 %v5715_v40, %v5715_v40  ;;  %v4248_v53 = vrot.slane %v3380_v7, %v8643_v62  ;;  %v5049_v33 = vcombine.low %v5027_v51, %v5034_v48  ;;  %v7261_v1 = vld [vmem:[%s7575_s30 + $0xa4] ss:$0 sps:$4 sm:$0x11]   ;;  %v10860_v48 = vld [vmem:[#allocation64_spill] sm:$0xff]  ;;  %s7406_s27 = scalar_lea.vmem %s7405_s23, 64 }
 0x262   : > { %2617 = vrot.lane.b32.xlu0 %v2546_v30, %s7485_s11  ;;  %v10285_v17 = vpop.permute.xlu1 %1393  ;;  %6976 = vst [vmem:[%s9885_s9 + $0x18] sm:$0xff] %v6892_v39   ;;  %v5265_v34 = vcombine.low %v10281_v11, %v4301_v9  ;;  %v5050_v42 = vcombine.low %v5041_v28, %v5048_v8  ;;  %v5294_v55 = vcombine.low %v5272_v12, %v5279_v57 }
 0x263   : > { %v6155_v14 = vadd.f32 %v6154_v35, %v6115_v19  ;;  %v4255_v46 = vrot.slane %v4248_v53, %v8643_v62  ;;  %v5057_v47 = vrot.slane %v5049_v33, %v8643_v62  ;;  %v2871_v24 = vsel %vm2799_vm4, %v10857_v18, %v10856_v13  ;;  %v7246_v53 = vld [vmem:[%s7575_s30 + $0x68] ss:$0 sps:$4 sm:$0x11]  }
 0x264   : > { %v1992_v61 = vpop.permute.xlu0 %1991  ;;  %v5064_v41 = vrot.slane %v5050_v42, %v8643_v62  ;;  %v5293_v38 = vrot.slane %v5265_v34, %v8643_v62  ;;  %v2948_v52 = vsel %vm2890_vm5, %v2871_v24, %v10858_v49  ;;  %v4270_v56 = vrot.slane %v4256_v45, %v8643_v62 }
 0x265   : > { %v5264_v5 = vcombine.low %v4255_v46, %v4279_v0  ;;  %v5302_v15 = vrot.slane %v5294_v55, %v8643_v62  ;;  %v3021_v31 = vsel %vm2963_vm6, %v2948_v52, %v10249_v58  ;;  %v10859_v58 = vld [vmem:[#allocation39_spill] sm:$0xff]  ;;  %v4027_v24 = vrot.slane %v9323_v44, %v8643_v62 }
 0x266   : > { %v2208_v23 = vpop.permute.xlu1 %2207  ;;  %v5065_v36 = vcombine.low %v5057_v47, %v5064_v41  ;;  %v3094_v37 = vsel %vm3036_vm7, %v3021_v31, %v1812_v10  ;;  %v4272_v6 = vcombine.high %v4270_v56, %v4270_v56  ;;  %v4286_v30 = vrot.slane %v4270_v56, %v8643_v62 }
 0x267   : > { %v5286_v16 = vrot.slane %v5264_v5, %v8643_v62  ;;  %v3167_v32 = vsel %vm3109_vm8, %v3094_v37, %v1992_v61  ;;  %v2869_v27 = vsel %vm2799_vm4, %v7261_v1, %v10859_v58  ;;  %v4303_v61 = vcombine.high %v10281_v11, %v10281_v11  ;;  %v10861_v11 = vld [vmem:[#allocation29_spill] sm:$0xff] }
 0x268   : > { %v1810_v63 = vpop.permute.xlu0 %1809  ;;  %7060 = vmatmul.mubr.msk.bf16.gmra.mrb[36].mxu0 %vm5586_vm12, %v5065_v36  ;;  %v3240_v4 = vsel %vm3182_vm9, %v3167_v32, %v2208_v23  ;;  %v2946_v54 = vsel %vm2890_vm5, %v2869_v27, %v10860_v48  ;;  %v4300_v8 = vrot.slane %v4272_v6, %v8643_v62  ;;  %v4302_v33 = vcombine.high %v4286_v30, %v4286_v30 }
 0x269   : > { %v5295_v43 = vcombine.low %v5286_v16, %v5293_v38  ;;  %7063 = vmatprep.mubr.msk.bf16.mxu0 %vm7489_vm3, %v10804_v21  ;;  %v3019_v9 = vsel %vm2963_vm6, %v2946_v54, %v10266_v25  ;;  %v5311_v16 = vcombine.low %v4303_v61, %v4286_v30 }
 0x26a   : > { %v1990_v59 = vpop.permute.xlu1 %1989  ;;  %v3092_v12 = vsel %vm3036_vm7, %v3019_v9, %v1810_v63  ;;  %v2844_v63 = vsel %vm2799_vm4, %v7246_v53, %v10861_v11  ;;  %v5312_v55 = vcombine.low %v4300_v8, %v4302_v33  ;;  %v4304_v32 = vcombine.high %v4300_v8, %v4300_v8 }
 0x26b   : > { %v5309_v26 = vrot.slane %v5295_v43, %v8643_v62  ;;  %v10862_v43 = vld [vmem:[#allocation54_spill] sm:$0xff]  ;;  %v5321_v31 = vrot.slane %v5311_v16, %v8643_v62 }
 0x26c   : > { %v1790_v2 = vpop.permute.xlu0 %1789  ;;  %v2926_v13 = vsel %vm2890_vm5, %v2844_v63, %v10862_v43  ;;  %v5328_v1 = vrot.slane %v5312_v55, %v8643_v62 }
 0x26d   : > { %v5310_v40 = vcombine.low %v5302_v15, %v5309_v26  ;;  %v2999_v49 = vsel %vm2963_vm6, %v2926_v13, %v10285_v17 }
 0x26e   : > { %v1970_v0 = vpop.permute.xlu1 %1969  ;;  %v3072_v56 = vsel %vm3036_vm7, %v2999_v49, %v1790_v2  ;;  %v5343_v48 = vcombine.low %v5321_v31, %v5328_v1 }
 0x26f   : > { %7080 = vmatmul.mubr.msk.bf16.gmra.mrb[12].mxu1 %vm5586_vm12, %v5310_v40  ;;  %v3145_v37 = vsel %vm3109_vm8, %v3072_v56, %v1970_v0 }
 0x270   : > { %v2604_v20 = vpop.permute.xlu0 %2603  ;;  %7083 = vmatprep.mubr.msk.bf16.mxu1 %vm7489_vm3, %v10804_v21 }
 0x271   : > { %v3313_v3 = vsel %vm3255_vm10, %v3240_v4, %v2604_v20  ;;  %v4049_v20 = vcombine.high %v4027_v24, %v4027_v24 }
 0x272   : > { %v2784_v29 = vpop.permute.xlu1 %2783 }
 0x273   : > { %v10324_v51 = vsel %vm3328_vm11, %v3313_v3, %v2784_v29  ;;  %v5720_v35 = vpop.f32.mrb[16].mxu0  ;;  %v5067_v54 = vcombine.low %v9347_v50, %v4049_v20 }
 0x274   : > { %v4326_v10 = vrot.slane %v10324_v51, %v8643_v62  ;;  %v2206_v28 = vpop.permute.xlu0 %2205  ;;  %v6067_v7 = vadd.f32 %v6066_v60, %v5720_v35  ;;  %v6116_v39 = vmul.f32 %v5720_v35, %v5720_v35  ;;  %v7041_v19 = vpop.f32.mrb[17].mxu0  ;;  %v3165_v60 = vsel %vm3109_vm8, %v3092_v12, %v1990_v59 }
 0x275   : > { %v5723_v34 = vpop.f32.mrb[18].mxu0  ;;  %v3238_v45 = vsel %vm3182_vm9, %v3165_v60, %v2206_v28  ;;  %v5083_v19 = vrot.slane %v5067_v54, %v8643_v62  ;;  %v4319_v61 = vcombine.high %v10324_v51, %v10324_v51  ;;  %v10863_v51 = vld [vmem:[#allocation41_spill] sm:$0xff] }
 0x276   : > { %v4334_v57 = vcombine.high %v4326_v10, %v4326_v10  ;;  %v2602_v46 = vpop.permute.xlu1 %2601  ;;  %v6156_v23 = vadd.f32 %v6155_v14, %v6116_v39  ;;  %v6897_v42 = vpack.c.bf16 %v5723_v34, %v5720_v35  ;;  %v10337_v5 = vadd.f32 %v6067_v7, %v5723_v34  ;;  %v7042_v25 = vpop.f32.mrb[19].mxu0 }
 0x277   : > { %v6117_v47 = vmul.f32 %v5723_v34, %v5723_v34  ;;  %v3311_v14 = vsel %vm3255_vm10, %v3238_v45, %v2602_v46  ;;  %v10359_v15 = vrot.slane %v4326_v10, %v8643_v62  ;;  %v5351_v7 = vrot.slane %v5343_v48, %v8643_v62  ;;  %v7262_v34 = vld [vmem:[%s7575_s30 + $0xb0] ss:$0 sps:$4 sm:$0x11]  }
 0x278   : > { %v2186_v41 = vpop.permute.xlu0 %2185  ;;  %6977 = vst [vmem:[%s9885_s9 + $0x20] sm:$0xff] %v6897_v42   ;;  %v10350_v18 = vrot.slane %v4334_v57, %v8643_v62  ;;  %v5113_v42 = vrot.slane %v9406_v22, %v8643_v62  ;;  %v10864_v45 = vld [vmem:[#allocation66_spill] sm:$0xff]  ;;  %v10865_v22 = vld [vmem:[#allocation44_spill] sm:$0xff] }
 0x279   : > { %v10342_v38 = vadd.f32 %v6156_v23, %v6117_v47  ;;  %v3218_v17 = vsel %vm3182_vm9, %v3145_v37, %v2186_v41  ;;  %v4333_v47 = vrot.slane %v4319_v61, %v8643_v62  ;;  %v2874_v41 = vsel %vm2799_vm4, %v7262_v34, %v10863_v51 }
 0x27a   : > { %v2782_v36 = vpop.permute.xlu1 %2781  ;;  %v5314_v44 = vcombine.low %v10359_v15, %v10350_v18  ;;  %v2950_v11 = vsel %vm2890_vm5, %v2874_v41, %v10864_v45 }
 0x27b   : > { %v3384_v59 = vsel %vm3328_vm11, %v3311_v14, %v2782_v36  ;;  %v4335_v16 = vcombine.high %v4333_v47, %v4333_v47  ;;  %v10866_v14 = vld [vmem:[#allocation21_spill] sm:$0xff] }
 0x27c   : > { %v2582_v52 = vpop.permute.xlu0 %2581  ;;  %v4311_v26 = vrot.slane %v3384_v59, %v8643_v62  ;;  %v5342_v0 = vrot.slane %v5314_v44, %v8643_v62  ;;  %v2876_v36 = vsel %vm2799_vm4, %v10866_v14, %v10865_v22  ;;  %v10867_v59 = vld [vmem:[#allocation69_spill] sm:$0xff] }
 0x27d   : > { %v3291_v6 = vsel %vm3255_vm10, %v3218_v17, %v2582_v52  ;;  %v4363_v31 = vrot.slane %v4335_v16, %v8643_v62 }
 0x27e   : > { %v1418_v40 = vpop.permute.xlu1 %1417  ;;  %v4318_v2 = vrot.slane %v4311_v26, %v8643_v62 }
 0x27f   : > { %v3023_v55 = vsel %vm2963_vm6, %v2950_v11, %v1418_v40 }
 0x280   : > { %v2762_v4 = vpop.permute.xlu0 %2761  ;;  %v5313_v30 = vcombine.low %v4304_v32, %v4318_v2  ;;  %v4349_v32 = vrot.slane %v4333_v47, %v8643_v62 }
 0x281   : > { %v3364_v3 = vsel %vm3328_vm11, %v3291_v6, %v2762_v4 }
 0x282   : > { %v3996_v29 = vrot.slane %v3364_v3, %v8643_v62  ;;  %v1814_v58 = vpop.permute.xlu1 %1813  ;;  %v5335_v27 = vrot.slane %v5313_v30, %v8643_v62  ;;  %v5361_v4 = vcombine.low %v4349_v32, %v4363_v31 }
 0x283   : > { %v3096_v43 = vsel %vm3036_vm7, %v3023_v55, %v1814_v58  ;;  %v6760_v58 = vcombine.high %v10359_v15, %v10350_v18  ;;  %v10868_v18 = vld [vmem:[#allocation43_spill] sm:$0xff] }
 0x284   : > { %v4003_v35 = vrot.slane %v3996_v29, %v8643_v62  ;;  %v1420_v10 = vpop.permute.xlu0 %1419  ;;  %v5344_v28 = vcombine.low %v5335_v27, %v5342_v0  ;;  %v7266_v29 = vld [vmem:[%s7575_s30 + $0xbc] ss:$0 sps:$4 sm:$0x11]  }
 0x285   : > { %v2879_v15 = vsel %vm2799_vm4, %v7266_v29, %v10868_v18  ;;  %v5370_v61 = vrot.slane %v6760_v58, %v8643_v62 }
 0x286   : > { %v5066_v8 = vcombine.low %v4003_v35, %v4027_v24  ;;  %v1994_v9 = vpop.permute.xlu1 %1993  ;;  %v5358_v39 = vrot.slane %v5344_v28, %v8643_v62  ;;  %v2952_v24 = vsel %vm2890_vm5, %v2876_v36, %v10867_v59  ;;  %v6761_v35 = vcombine.high %v4349_v32, %v4363_v31 }
 0x287   : > { %v3169_v49 = vsel %vm3109_vm8, %v3096_v43, %v1994_v9  ;;  %v3025_v52 = vsel %vm2963_vm6, %v2952_v24, %v1420_v10 }
 0x288   : > { %v5076_v53 = vrot.slane %v5066_v8, %v8643_v62  ;;  %v1816_v33 = vpop.permute.xlu0 %1815  ;;  %v5359_v12 = vcombine.low %v5351_v7, %v5358_v39  ;;  %v5377_v39 = vrot.slane %v5361_v4, %v8643_v62 }
 0x289   : > { %v3098_v1 = vsel %vm3036_vm7, %v3025_v52, %v1816_v33 }
 0x28a   : > { %v5098_v50 = vcombine.low %v5076_v53, %v5083_v19  ;;  %v2210_v57 = vpop.permute.xlu1 %2209  ;;  %7084 = vmatmul.mubr.msk.bf16.gmra.mrb[16].mxu1 %vm5586_vm12, %v5359_v12  ;;  %v5392_v41 = vcombine.low %v5370_v61, %v5377_v39 }
 0x28b   : > { %7087 = vmatprep.mubr.msk.bf16.mxu1 %vm7489_vm3, %v10804_v21  ;;  %v3242_v56 = vsel %vm3182_vm9, %v3169_v49, %v2210_v57 }
 0x28c   : > { %v1996_v46 = vpop.permute.xlu0 %1995  ;;  %v5106_v23 = vrot.slane %v5098_v50, %v8643_v62  ;;  %v5400_v59 = vrot.slane %v5392_v41, %v8643_v62  ;;  %v10874_v41 = vld [vmem:[#allocation25_spill] sm:$0xff] }
 0x28d   : > { %v3171_v40 = vsel %vm3109_vm8, %v3098_v1, %v1996_v46 }
 0x28e   : > { %v2606_v25 = vpop.permute.xlu1 %2605  ;;  %v5114_v60 = vcombine.low %v5106_v23, %v5113_v42  ;;  %v10869_v42 = vld [vmem:[#allocation68_spill] sm:$0xff] }
 0x28f   : > { %v3315_v37 = vsel %vm3255_vm10, %v3242_v56, %v2606_v25  ;;  %v2954_v47 = vsel %vm2890_vm5, %v2879_v15, %v10869_v42  ;;  %v5384_v25 = vrot.slane %v6761_v35, %v8643_v62 }
 0x290   : > { %7064 = vmatmul.mubr.msk.bf16.gmra.mrb[40].mxu0 %vm5586_vm12, %v5114_v60  ;;  %v2212_v63 = vpop.permute.xlu0 %2211 }
 0x291   : > { %v3244_v2 = vsel %vm3182_vm9, %v3171_v40, %v2212_v63  ;;  %v10870_v40 = vld [vmem:[#allocation46_spill] sm:$0xff] }
 0x292   : > { %v2786_v13 = vpop.permute.xlu1 %2785 }
 0x293   : > { %v3388_v44 = vsel %vm3328_vm11, %v3315_v37, %v2786_v13 }
 0x294   : > { %v2608_v26 = vpop.permute.xlu0 %2607  ;;  %v4374_v30 = vrot.slane %v3388_v44, %v8643_v62  ;;  %v10871_v44 = vld [vmem:[#allocation23_spill] sm:$0xff] }
 0x295   : > { %v3317_v20 = vsel %vm3255_vm10, %v3244_v2, %v2608_v26 }
 0x296   : > { %v1422_v17 = vpop.permute.xlu1 %1421  ;;  %v4381_v19 = vrot.slane %v4374_v30, %v8643_v62 }
 0x297   : > { %v3027_v45 = vsel %vm2963_vm6, %v2954_v47, %v1422_v17  ;;  %v2881_v17 = vsel %vm2799_vm4, %v10871_v44, %v10870_v40  ;;  %v7268_v44 = vld [vmem:[%s7575_s30 + $0xc8] ss:$0 sps:$4 sm:$0x11]  }
 0x298   : > { %v2788_v6 = vpop.permute.xlu0 %2787 }
 0x299   : > { %v3390_v3 = vsel %vm3328_vm11, %v3317_v20, %v2788_v6  ;;  %v10872_v6 = vld [vmem:[#allocation71_spill] sm:$0xff] }
 0x29a   : > { %v4382_v0 = vcombine.high %v3390_v3, %v3390_v3  ;;  %v4389_v27 = vrot.slane %v3390_v3, %v8643_v62  ;;  %v1998_v48 = vpop.permute.xlu1 %1997  ;;  %v2956_v4 = vsel %vm2890_vm5, %v2881_v17, %v10872_v6 }
 0x29b   : > { %v5728_v54 = vpop.f32.mrb[20].mxu0 }
 0x29c   : > { %v4397_v10 = vcombine.high %v4389_v27, %v4389_v27  ;;  %v4405_v28 = vrot.slane %v4389_v27, %v8643_v62  ;;  %v6069_v8 = vadd.f32 %v10337_v5, %v5728_v54  ;;  %v7045_v9 = vpop.f32.mrb[21].mxu0  ;;  %v1818_v7 = vpop.permute.xlu0 %1817  ;;  %v6118_v53 = vmul.f32 %v5728_v54, %v5728_v54 }
 0x29d   : > { %v5731_v33 = vpop.f32.mrb[22].mxu0  ;;  %v4396_v12 = vrot.slane %v4382_v0, %v8643_v62 }
 0x29e   : > { %v7046_v50 = vpop.f32.mrb[23].mxu0  ;;  %v1424_v57 = vpop.permute.xlu1 %1423  ;;  %v5363_v34 = vcombine.low %v4381_v19, %v4405_v28  ;;  %v6158_v5 = vadd.f32 %v10342_v38, %v6118_v53  ;;  %v6902_v46 = vpack.c.bf16 %v5731_v33, %v5728_v54  ;;  %v10428_v23 = vadd.f32 %v6069_v8, %v5731_v33 }
 0x29f   : > { %v4419_v60 = vrot.slane %v4397_v10, %v8643_v62  ;;  %v6119_v63 = vmul.f32 %v5731_v33, %v5731_v33  ;;  %v3100_v38 = vsel %vm3036_vm7, %v3027_v45, %v1818_v7  ;;  %v4398_v55 = vcombine.high %v4396_v12, %v4396_v12 }
 0x2a0   : > { %v2214_v51 = vpop.permute.xlu0 %2213  ;;  %v5391_v11 = vrot.slane %v5363_v34, %v8643_v62  ;;  %6978 = vst [vmem:[%s9885_s9 + $0x28] sm:$0xff] %v6902_v46   ;;  %v4412_v22 = vrot.slane %v4396_v12, %v8643_v62  ;;  %v4427_v49 = vcombine.high %v4405_v28, %v4405_v28  ;;  %v3173_v52 = vsel %vm3109_vm8, %v3100_v38, %v1998_v48 }
 0x2a1   : > { %v10439_v36 = vadd.f32 %v6158_v5, %v6119_v63  ;;  %v4429_v43 = vcombine.high %v4419_v60, %v4419_v60  ;;  %v4426_v26 = vrot.slane %v4398_v55, %v8643_v62  ;;  %v3246_v1 = vsel %vm3182_vm9, %v3173_v52, %v2214_v51  ;;  %v10873_v51 = vld [vmem:[#allocation48_spill] sm:$0xff] }
 0x2a2   : > { %v1820_v16 = vpop.permute.xlu1 %1819  ;;  %v5393_v14 = vcombine.low %v5384_v25, %v5391_v11  ;;  %v4428_v31 = vcombine.high %v4412_v22, %v4412_v22  ;;  %v5409_v3 = vcombine.low %v4419_v60, %v4427_v49  ;;  %v3029_v29 = vsel %vm2963_vm6, %v2956_v4, %v1424_v57 }
 0x2a3   : > { %v5410_v32 = vcombine.low %v4429_v43, %v4412_v22  ;;  %v3102_v48 = vsel %vm3036_vm7, %v3029_v29, %v1820_v16  ;;  %v4430_v10 = vcombine.high %v4426_v26, %v4426_v26  ;;  %v2886_v45 = vsel %vm2799_vm4, %v10874_v41, %v10873_v51  ;;  %v10875_v22 = vld [vmem:[#allocation72_spill] sm:$0xff]  ;;  %v10876_v29 = vld [vmem:[#allocation45_spill] sm:$0xff] }
 0x2a4   : > { %v2610_v13 = vpop.permute.xlu0 %2609  ;;  %v5407_v24 = vrot.slane %v5393_v14, %v8643_v62  ;;  %v5411_v27 = vcombine.low %v4426_v26, %v4428_v31  ;;  %v5419_v7 = vrot.slane %v5409_v3, %v8643_v62  ;;  %v2960_v14 = vsel %vm2890_vm5, %v2886_v45, %v10875_v22 }
 0x2a5   : > { %v3319_v2 = vsel %vm3255_vm10, %v3246_v1, %v2610_v13  ;;  %v5426_v54 = vrot.slane %v5410_v32, %v8643_v62 }
 0x2a6   : > { %v2000_v56 = vpop.permute.xlu1 %1999  ;;  %v5408_v37 = vcombine.low %v5400_v59, %v5407_v24  ;;  %v5433_v53 = vrot.slane %v5411_v27, %v8643_v62 }
 0x2a7   : > { %v3175_v35 = vsel %vm3109_vm8, %v3102_v48, %v2000_v56  ;;  %v5441_v61 = vcombine.low %v5419_v7, %v5426_v54 }
 0x2a8   : > { %v2790_v20 = vpop.permute.xlu0 %2789  ;;  %7088 = vmatmul.mubr.msk.bf16.gmra.mrb[20].mxu1 %vm5586_vm12, %v5408_v37 }
 0x2a9   : > { %v3392_v30 = vsel %vm3328_vm11, %v3319_v2, %v2790_v20  ;;  %7091 = vmatprep.mubr.msk.bf16.mxu1 %vm7489_vm3, %v10804_v21  ;;  %v5449_v25 = vrot.slane %v5441_v61, %v8643_v62 }
 0x2aa   : > { %v4437_v58 = vrot.slane %v3392_v30, %v8643_v62  ;;  %v2612_v0 = vpop.permute.xlu1 %2611 }
 0x2ac   : > { %v4444_v28 = vrot.slane %v4437_v58, %v8643_v62  ;;  %v2216_v8 = vpop.permute.xlu0 %2215  ;;  %v2884_v58 = vsel %vm2799_vm4, %v7268_v44, %v10876_v29 }
 0x2ad   : > { %v3248_v9 = vsel %vm3182_vm9, %v3175_v35, %v2216_v8  ;;  %v10877_v35 = vld [vmem:[#allocation70_spill] sm:$0xff] }
 0x2ae   : > { %v5412_v39 = vcombine.low %v4430_v10, %v4444_v28  ;;  %v1428_v19 = vpop.permute.xlu1 %1427  ;;  %v3321_v18 = vsel %vm3255_vm10, %v3248_v9, %v2612_v0  ;;  %v2958_v10 = vsel %vm2890_vm5, %v2884_v58, %v10877_v35 }
 0x2af   : > { %v3033_v52 = vsel %vm2963_vm6, %v2960_v14, %v1428_v19 }
 0x2b0   : > { %v5440_v33 = vrot.slane %v5412_v39, %v8643_v62  ;;  %v2792_v15 = vpop.permute.xlu0 %2791 }
 0x2b1   : > { %v3394_v12 = vsel %vm3328_vm11, %v3321_v18, %v2792_v15 }
 0x2b2   : > { %v5442_v50 = vcombine.low %v5433_v53, %v5440_v33  ;;  %v4445_v57 = vcombine.high %v3394_v12, %v3394_v12  ;;  %v4452_v34 = vrot.slane %v3394_v12, %v8643_v62  ;;  %v2004_v5 = vpop.permute.xlu1 %2003 }
 0x2b4   : > { %v4459_v46 = vrot.slane %v4445_v57, %v8643_v62  ;;  %v4460_v42 = vcombine.high %v4452_v34, %v4452_v34  ;;  %v1824_v47 = vpop.permute.xlu0 %1823  ;;  %v5456_v60 = vrot.slane %v5442_v50, %v8643_v62  ;;  %v4468_v63 = vrot.slane %v4452_v34, %v8643_v62 }
 0x2b5   : > { %v3106_v40 = vsel %vm3036_vm7, %v3033_v52, %v1824_v47  ;;  %v7269_v47 = vld [vmem:[%s7575_s30 + $0xd4] ss:$0 sps:$4 sm:$0x11]   ;;  %s187_s30 = sand.u32 1, %s7462_s13  }
 0x2b6   : > { %v4461_v11 = vcombine.high %v4459_v46, %v4459_v46  ;;  %v4482_v38 = vrot.slane %v4460_v42, %v8643_v62  ;;  %v1426_v16 = vpop.permute.xlu1 %1425  ;;  %v5457_v55 = vcombine.low %v5449_v25, %v5456_v60  ;;  %v4475_v43 = vrot.slane %v4459_v46, %v8643_v62  ;;  %s6347_s5 = sshll.u32 %s187_s30, 1  ;;  %s6211_s19 = scalar_lea.sflag [#allocation3], %s187_s30 }
 0x2b7   : > { %v3179_v6 = vsel %vm3109_vm8, %v3106_v40, %v2004_v5  ;;  %v3031_v8 = vsel %vm2963_vm6, %v2958_v10, %v1426_v16  ;;  %s10572_s6 = scalar_lea.vmem [#allocation2], %s6347_s5 }
 0x2b8   : > { %v4489_v13 = vrot.slane %v4461_v11, %v8643_v62  ;;  %v5458_v59 = vcombine.low %v4468_v63, %v4482_v38  ;;  %v6762_v24 = vcombine.high %v4468_v63, %v4482_v38  ;;  %7092 = vmatmul.mubr.msk.bf16.gmra.mrb[24].mxu1 %vm5586_vm12, %v5457_v55  ;;  %v2220_v49 = vpop.permute.xlu0 %2219  ;;  %210 = vst [vmem:[%s10572_s6] sm:$0x3] %v10804_v21  ;;  %s6228_s8 = sshll.u32 %s10572_s6, 4  ;;  %s10610_s8 = int_to_ptr.vmem [resolvable:$true] %s6228_s8 }
 0x2b9   : > { %7095 = vmatprep.mubr.msk.bf16.mxu1 %vm7489_vm3, %v10804_v21  ;;  %v3252_v3 = vsel %vm3182_vm9, %v3179_v6, %v2220_v49  ;;  %v10878_v49 = vld [vmem:[#allocation47_spill] sm:$0xff]  ;;  %s7400_s21 = scalar_lea.vmem %s10610_s8, 32  ;;  %p7407_p1 = scmp.lt.s32.totalorder %s10610_s8, %s7405_s23 }
 0x2ba   : > { %v5460_v56 = vcombine.low %v4475_v43, %v4489_v13  ;;  %v6763_v26 = vcombine.high %v4475_v43, %v4489_v13  ;;  %v5468_v31 = vrot.slane %v5458_v59, %v8643_v62  ;;  %v5475_v1 = vrot.slane %v6762_v24, %v8643_v62  ;;  %v1822_v37 = vpop.permute.xlu1 %1821  ;;  %p7401_p12 = scmp.ne.s32.totalorder %s10610_s8, %s7400_s21  ;;  %p7408_p2 = scmp.lt.s32.totalorder %s7406_s27, %s7400_s21 }
 0x2bb   : > { %v3104_v53 = vsel %vm3036_vm7, %v3031_v8, %v1822_v37  ;;  %v2889_v52 = vsel %vm2799_vm4, %v7269_v47, %v10878_v49 }
 0x2bc   : > { %v5482_v17 = vrot.slane %v5460_v56, %v8643_v62  ;;  %v5489_v32 = vrot.slane %v6763_v26, %v8643_v62  ;;  %v5490_v2 = vcombine.low %v5468_v31, %v5475_v1  ;;  %v2616_v20 = vpop.permute.xlu0 %2615  ;;  %p7402_p13 = pnand %p7401_p12, %p7552_p4  ;;  %p7409_p3 = por %p7408_p2, %p7407_p1 }
 0x2bd   : > { %v3325_v0 = vsel %vm3255_vm10, %v3252_v3, %v2616_v20 }
 0x2be   : > { %v2002_v4 = vpop.permute.xlu1 %2001  ;;  %v5491_v30 = vcombine.low %v5482_v17, %v5489_v32  ;;  %v5498_v48 = vrot.slane %v5490_v2, %v8643_v62  ;;  %p7403_p0 = pneg %p7402_p13 }
 0x2bf   : > { %v3177_v33 = vsel %vm3109_vm8, %v3104_v53, %v2002_v4 }
 0x2c0   : > { %v2796_v27 = vpop.permute.xlu0 %2795  ;;  %v5505_v54 = vrot.slane %v5491_v30, %v8643_v62  ;;  %p7410_p5 = pnand %p7409_p3, %p7403_p0 }
 0x2c1   : > { %v3398_v28 = vsel %vm3328_vm11, %v3325_v0, %v2796_v27 }
 0x2c2   : > { %v4508_v9 = vcombine.high %v3398_v28, %v3398_v28  ;;  %v4515_v7 = vrot.slane %v3398_v28, %v8643_v62  ;;  %v2614_v39 = vpop.permute.xlu1 %2613  ;;  %v5506_v19 = vcombine.low %v5498_v48, %v5505_v54 }
 0x2c4   : > { %v4522_v18 = vrot.slane %v4508_v9, %v8643_v62  ;;  %v4523_v15 = vcombine.high %v4515_v7, %v4515_v7  ;;  %v4531_v61 = vrot.slane %v4515_v7, %v8643_v62  ;;  %7096 = vmatmul.mubr.msk.bf16.gmra.mrb[28].mxu1 %vm5586_vm12, %v5506_v19  ;;  %v2218_v12 = vpop.permute.xlu0 %2217 }
 0x2c5   : > { %v3250_v50 = vsel %vm3182_vm9, %v3177_v33, %v2218_v12  ;;  %7099 = vmatprep.mubr.msk.bf16.mxu1 %vm7489_vm3, %v10804_v21  ;;  %v10513_v46 = vpop.f32.mrb[0].mxu1 }
 0x2c6   : > { %v4524_v57 = vcombine.high %v4522_v18, %v4522_v18  ;;  %v4538_v34 = vrot.slane %v4522_v18, %v8643_v62  ;;  %v4545_v5 = vrot.slane %v4523_v15, %v8643_v62  ;;  %v1214_v42 = vpop.permute.xlu1 %1213  ;;  %v4553_v25 = vcombine.high %v4531_v61, %v4531_v61  ;;  %v7069_v60 = vpop.f32.mrb[1].mxu1 }
 0x2c7   : > { %v3323_v11 = vsel %vm3255_vm10, %v3250_v50, %v2614_v39  ;;  %v10518_v38 = vpop.f32.mrb[2].mxu1  ;;  %v2962_v44 = vsel %vm2890_vm5, %v2889_v52, %v1214_v42 }
 0x2c8   : > { %v4552_v51 = vrot.slane %v4524_v57, %v8643_v62  ;;  %v4554_v41 = vcombine.high %v4538_v34, %v4538_v34  ;;  %v4555_v45 = vcombine.high %v4545_v5, %v4545_v5  ;;  %v2794_v63 = vpop.permute.xlu0 %2793  ;;  %v6932_v55 = vpack.c.bf16 %v10518_v38, %v10513_v46  ;;  %v7070_v22 = vpop.f32.mrb[3].mxu1 }
 0x2c9   : > { %v3396_v16 = vsel %vm3328_vm11, %v3323_v11, %v2794_v63  ;;  %v5736_v59 = vpop.f32.mrb[24].mxu0  ;;  %v5508_v56 = vcombine.low %v4545_v5, %v4553_v25 }
 0x2ca   : > { %v5509_v14 = vcombine.low %v4555_v45, %v4538_v34  ;;  %v5510_v43 = vcombine.low %v4552_v51, %v4554_v41  ;;  %v4500_v13 = vrot.slane %v3396_v16, %v8643_v62  ;;  %v1826_v24 = vpop.permute.xlu1 %1825  ;;  %6984 = vst [vmem:[%s9885_s9 + $0x58] sm:$0xff] %v6932_v55   ;;  %v6071_v26 = vadd.f32 %v10428_v23, %v5736_v59  ;;  %v7049_v1 = vpop.f32.mrb[25].mxu0 }
 0x2cb   : > { %v6120_v31 = vmul.f32 %v5736_v59, %v5736_v59  ;;  %v5739_v2 = vpop.f32.mrb[26].mxu0  ;;  %v5524_v0 = vrot.slane %v5508_v56, %v8643_v62 }
 0x2cc   : > { %v5531_v37 = vrot.slane %v5509_v14, %v8643_v62  ;;  %v5538_v40 = vrot.slane %v5510_v43, %v8643_v62  ;;  %v4507_v17 = vrot.slane %v4500_v13, %v8643_v62  ;;  %v1430_v32 = vpop.permute.xlu0 %1429  ;;  %v6907_v4 = vpack.c.bf16 %v5739_v2, %v5736_v59  ;;  %v7050_v23 = vpop.f32.mrb[27].mxu0 }
 0x2cd   : > { %v6160_v20 = vadd.f32 %v10439_v36, %v6120_v31  ;;  %v3035_v6 = vsel %vm2963_vm6, %v2962_v44, %v1430_v32  ;;  %v6072_v30 = vadd.f32 %v6071_v26, %v5739_v2  ;;  %v6121_v29 = vmul.f32 %v5739_v2, %v5739_v2 }
 0x2ce   : > { %v5507_v3 = vcombine.low %v4507_v17, %v4531_v61  ;;  %v2222_v58 = vpop.permute.xlu1 %2221  ;;  %6979 = vst [vmem:[%s9885_s9 + $0x30] sm:$0xff] %v6907_v4   ;;  %v3108_v48 = vsel %vm3036_vm7, %v3035_v6, %v1826_v24  ;;  %v5540_v10 = vcombine.low %v5531_v37, %v5538_v40  ;;  %v4556_v61 = vcombine.high %v4552_v51, %v4552_v51 }
 0x2cf   : > { %v6161_v54 = vadd.f32 %v6160_v20, %v6121_v29 }
 0x2d0   : > { %v5517_v27 = vrot.slane %v5507_v3, %v8643_v62  ;;  %v2006_v35 = vpop.permute.xlu0 %2005  ;;  %v5554_v19 = vrot.slane %v5540_v10, %v8643_v62 }
 0x2d1   : > { %v3181_v36 = vsel %vm3109_vm8, %v3108_v48, %v2006_v35 }
 0x2d2   : > { %v5539_v28 = vcombine.low %v5517_v27, %v5524_v0  ;;  %v2798_v8 = vpop.permute.xlu1 %2797  ;;  %v3254_v9 = vsel %vm3182_vm9, %v3181_v36, %v2222_v58 }
 0x2d4   : > { %v2618_v7 = vpop.permute.xlu0 %2617  ;;  %v5547_v39 = vrot.slane %v5539_v28, %v8643_v62 }
 0x2d5   : > { %v3327_v53 = vsel %vm3255_vm10, %v3254_v9, %v2618_v7 }
 0x2d6   : > { %v3400_v33 = vsel %vm3328_vm11, %v3327_v53, %v2798_v8  ;;  %v5555_v18 = vcombine.low %v5547_v39, %v5554_v19 }
 0x2d7   : > { %v4563_v15 = vrot.slane %v3400_v33, %v8643_v62 }
 0x2d8   : > { %7100 = vmatmul.mubr.msk.bf16.gmra.mrb[32].mxu1 %vm5586_vm12, %v5555_v18 }
 0x2d9   : > { %v4570_v12 = vrot.slane %v4563_v15, %v8643_v62  ;;  %7103 = vmatprep.mubr.msk.bf16.mxu1 %vm7489_vm3, %v10804_v21 }
 0x2db   : > { %v5556_v50 = vcombine.low %v4556_v61, %v4570_v12 }
 0x2dd   : > { %v5563_v57 = vrot.slane %v5556_v50, %v8643_v62 }
 0x2df   : > { %v5570_v34 = vrot.slane %v5563_v57, %v8643_v62 }
 0x2e1   : > { %7104 = vmatmul.mubr.msk.bf16.gmra.mrb[36].mxu1 %vm5586_vm12, %v5570_v34 }
 0x2f3   : > { %v10552_v5 = vpop.f32.mrb[4].mxu1 }
 0x2f4   : > { %v7073_v42 = vpop.f32.mrb[5].mxu1 }
 0x2f5   : > { %v10554_v47 = vpop.f32.mrb[6].mxu1 }
 0x2f6   : > { %v6937_v25 = vpack.c.bf16 %v10554_v47, %v10552_v5  ;;  %v7074_v60 = vpop.f32.mrb[7].mxu1 }
 0x2f7   : > { %v5744_v51 = vpop.f32.mrb[28].mxu0 }
 0x2f8   : > { %6985 = vst [vmem:[%s9885_s9 + $0x60] sm:$0xff] %v6937_v25   ;;  %v6073_v41 = vadd.f32 %v6072_v30, %v5744_v51  ;;  %v6122_v45 = vmul.f32 %v5744_v51, %v5744_v51  ;;  %v7053_v11 = vpop.f32.mrb[29].mxu0  ;;  %v6130_v25 = vmul.f32 %v10513_v46, %v10513_v46 }
 0x2f9   : > { %v5747_v63 = vpop.f32.mrb[30].mxu0 }
 0x2fa   : > { %v6162_v16 = vadd.f32 %v6161_v54, %v6122_v45  ;;  %v6912_v62 = vpack.c.bf16 %v5747_v63, %v5744_v51  ;;  %v6074_v55 = vadd.f32 %v6073_v41, %v5747_v63  ;;  %v6123_v22 = vmul.f32 %v5747_v63, %v5747_v63  ;;  %v7054_v14 = vpop.f32.mrb[31].mxu0 }
 0x2fb   : > { %v6131_v41 = vmul.f32 %v10518_v38, %v10518_v38  ;;  %v6132_v63 = vmul.f32 %v10552_v5, %v10552_v5 }
 0x2fc   : > { %6980 = vst [vmem:[%s9885_s9 + $0x38] sm:$0xff] %v6912_v62   ;;  %v6163_v43 = vadd.f32 %v6162_v16, %v6123_v22 }
 0x31b   : > { %v10560_v13 = vpop.f32.mrb[8].mxu1 }
 0x31c   : > { %v7077_v59 = vpop.f32.mrb[9].mxu1 }
 0x31d   : > { %v10562_v24 = vpop.f32.mrb[10].mxu1 }
 0x31e   : > { %v6942_v49 = vpack.c.bf16 %v10562_v24, %v10560_v13  ;;  %v7078_v52 = vpop.f32.mrb[11].mxu1  ;;  %v5752_v56 = vpop.f32.mrb[32].mxu0 }
 0x31f   : > { %v6075_v26 = vadd.f32 %v6074_v55, %v5752_v56  ;;  %v6124_v31 = vmul.f32 %v5752_v56, %v5752_v56  ;;  %v7057_v1 = vpop.f32.mrb[33].mxu0  ;;  %v6133_v55 = vmul.f32 %v10554_v47, %v10554_v47 }
 0x320   : > { %6986 = vst [vmem:[%s9885_s9 + $0x68] sm:$0xff] %v6942_v49   ;;  %v5755_v37 = vpop.f32.mrb[34].mxu0 }
 0x321   : > { %v6164_v40 = vadd.f32 %v6163_v43, %v6124_v31  ;;  %v6917_v44 = vpack.c.bf16 %v5755_v37, %v5752_v56  ;;  %v6076_v17 = vadd.f32 %v6075_v26, %v5755_v37  ;;  %v6125_v32 = vmul.f32 %v5755_v37, %v5755_v37  ;;  %v7058_v2 = vpop.f32.mrb[35].mxu0 }
 0x323   : > { %6981 = vst [vmem:[%s9885_s9 + $0x40] sm:$0xff] %v6917_v44   ;;  %v6165_v20 = vadd.f32 %v6164_v40, %v6125_v32 }
 0x33b   : > { %v5760_v6 = vpop.f32.mrb[36].mxu0 }
 0x33c   : > { %v6077_v4 = vadd.f32 %v6076_v17, %v5760_v6  ;;  %v6126_v30 = vmul.f32 %v5760_v6, %v5760_v6  ;;  %v7061_v23 = vpop.f32.mrb[37].mxu0 }
 0x33d   : > { %v5763_v3 = vpop.f32.mrb[38].mxu0 }
 0x33e   : > { %v6166_v29 = vadd.f32 %v6165_v20, %v6126_v30  ;;  %v6922_v58 = vpack.c.bf16 %v5763_v3, %v5760_v6  ;;  %v6078_v0 = vadd.f32 %v6077_v4, %v5763_v3  ;;  %v6127_v27 = vmul.f32 %v5763_v3, %v5763_v3  ;;  %v7062_v48 = vpop.f32.mrb[39].mxu0 }
 0x340   : > { %6982 = vst [vmem:[%s9885_s9 + $0x48] sm:$0xff] %v6922_v58   ;;  %v6167_v54 = vadd.f32 %v6166_v29, %v6127_v27 }
 0x342   : > { %v5800_v35 = vpop.f32.mrb[12].mxu1 }
 0x343   : > { %v7081_v10 = vpop.f32.mrb[13].mxu1 }
 0x344   : > { %v5803_v36 = vpop.f32.mrb[14].mxu1 }
 0x345   : > { %v6947_v28 = vpack.c.bf16 %v5803_v36, %v5800_v35  ;;  %v7082_v8 = vpop.f32.mrb[15].mxu1  ;;  %v6137_v31 = vmul.f32 %v5803_v36, %v5803_v36 }
 0x347   : > { %6987 = vst [vmem:[%s9885_s9 + $0x70] sm:$0xff] %v6947_v28  }
 0x35d   : > { %v5808_v9 = vpop.f32.mrb[16].mxu1 }
 0x35e   : > { %v7085_v7 = vpop.f32.mrb[17].mxu1 }
 0x35f   : > { %v5811_v39 = vpop.f32.mrb[18].mxu1 }
 0x360   : > { %v6952_v19 = vpack.c.bf16 %v5811_v39, %v5808_v9  ;;  %v7086_v53 = vpop.f32.mrb[19].mxu1  ;;  %v6139_v17 = vmul.f32 %v5811_v39, %v5811_v39 }
 0x362   : > { %6988 = vst [vmem:[%s9885_s9 + $0x78] sm:$0xff] %v6952_v19  }
 0x363   : > { %v5768_v33 = vpop.f32.mrb[40].mxu0 }
 0x364   : > { %v6079_v18 = vadd.f32 %v6078_v0, %v5768_v33  ;;  %v6128_v15 = vmul.f32 %v5768_v33, %v5768_v33  ;;  %v7065_v61 = vpop.f32.mrb[41].mxu0 }
 0x365   : > { %v5771_v12 = vpop.f32.mrb[42].mxu0 }
 0x366   : > { %v6168_v50 = vadd.f32 %v6167_v54, %v6128_v15  ;;  %v6927_v57 = vpack.c.bf16 %v5771_v12, %v5768_v33  ;;  %v6080_v21 = vadd.f32 %v6079_v18, %v5771_v12  ;;  %v6129_v34 = vmul.f32 %v5771_v12, %v5771_v12  ;;  %v7066_v42 = vpop.f32.mrb[43].mxu0 }
 0x368   : > { %6983 = vst [vmem:[%s9885_s9 + $0x50] sm:$0xff] %v6927_v57   ;;  %v6081_v60 = vadd.f32 %v6080_v21, %v10513_v46  ;;  %v6169_v51 = vadd.f32 %v6168_v50, %v6129_v34  ;;  %v6134_v46 = vmul.f32 %v10560_v13, %v10560_v13 }
 0x36a   : > { %v6082_v45 = vadd.f32 %v6081_v60, %v10518_v38  ;;  %v6170_v11 = vadd.f32 %v6169_v51, %v6130_v25  ;;  %v6135_v38 = vmul.f32 %v10562_v24, %v10562_v24 }
 0x36c   : > { %v6083_v16 = vadd.f32 %v6082_v45, %v10552_v5  ;;  %v6171_v62 = vadd.f32 %v6170_v11, %v6131_v41  ;;  %v6136_v5 = vmul.f32 %v5800_v35, %v5800_v35 }
 0x36e   : > { %v6084_v22 = vadd.f32 %v6083_v16, %v10554_v47  ;;  %v6172_v14 = vadd.f32 %v6171_v62, %v6132_v63  ;;  %v6138_v47 = vmul.f32 %v5808_v9, %v5808_v9 }
 0x370   : > { %v6085_v43 = vadd.f32 %v6084_v22, %v10560_v13  ;;  %v6173_v59 = vadd.f32 %v6172_v14, %v6133_v55 }
 0x372   : > { %v6174_v49 = vadd.f32 %v6173_v59, %v6134_v46  ;;  %v6086_v52 = vadd.f32 %v6085_v43, %v10562_v24 }
 0x374   : > { %v6087_v56 = vadd.f32 %v6086_v52, %v5800_v35  ;;  %v6175_v26 = vadd.f32 %v6174_v49, %v6135_v38 }
 0x376   : > { %v6088_v1 = vadd.f32 %v6087_v56, %v5803_v36  ;;  %v6176_v37 = vadd.f32 %v6175_v26, %v6136_v5 }
 0x378   : > { %v6089_v40 = vadd.f32 %v6088_v1, %v5808_v9  ;;  %v6177_v44 = vadd.f32 %v6176_v37, %v6137_v31 }
 0x37a   : > { %v6090_v32 = vadd.f32 %v6089_v40, %v5811_v39  ;;  %v6178_v13 = vadd.f32 %v6177_v44, %v6138_v47 }
 0x37b   : > { %v5816_v2 = vpop.f32.mrb[20].mxu1 }
 0x37c   : > { %v6179_v20 = vadd.f32 %v6178_v13, %v6139_v17  ;;  %v6091_v6 = vadd.f32 %v6090_v32, %v5816_v2  ;;  %v6140_v4 = vmul.f32 %v5816_v2, %v5816_v2  ;;  %v7089_v30 = vpop.f32.mrb[21].mxu1 }
 0x37d   : > { %v5819_v23 = vpop.f32.mrb[22].mxu1 }
 0x37e   : > { %v6180_v24 = vadd.f32 %v6179_v20, %v6140_v4  ;;  %v6957_v3 = vpack.c.bf16 %v5819_v23, %v5816_v2  ;;  %v6092_v29 = vadd.f32 %v6091_v6, %v5819_v23  ;;  %v6141_v58 = vmul.f32 %v5819_v23, %v5819_v23  ;;  %v7090_v0 = vpop.f32.mrb[23].mxu1  ;;  %v6196_v4 = vld [vmem:[%s10572_s6] sm:$0x3] }
 0x380   : > { %6989 = vst [vmem:[%s9885_s9 + $0x80] sm:$0xff] %v6957_v3   ;;  %v6181_v27 = vadd.f32 %v6180_v24, %v6141_v58 }
 0x38b   : > { %v5824_v48 = vpop.f32.mrb[24].mxu1 }
 0x38c   : > { %v6093_v54 = vadd.f32 %v6092_v29, %v5824_v48  ;;  %v6142_v35 = vmul.f32 %v5824_v48, %v5824_v48  ;;  %v7093_v10 = vpop.f32.mrb[25].mxu1 }
 0x38d   : > { %v5827_v36 = vpop.f32.mrb[26].mxu1 }
 0x38e   : > { %v6182_v28 = vadd.f32 %v6181_v27, %v6142_v35  ;;  %v6962_v8 = vpack.c.bf16 %v5827_v36, %v5824_v48  ;;  %v6094_v9 = vadd.f32 %v6093_v54, %v5827_v36  ;;  %v6143_v7 = vmul.f32 %v5827_v36, %v5827_v36  ;;  %v7094_v39 = vpop.f32.mrb[27].mxu1 }
 0x390   : > { %6990 = vst [vmem:[%s9885_s9 + $0x88] sm:$0xff] %v6962_v8   ;;  %v6183_v19 = vadd.f32 %v6182_v28, %v6143_v7 }
 0x397   : > { %v5832_v53 = vpop.f32.mrb[28].mxu1 }
 0x398   : > { %v6095_v33 = vadd.f32 %v6094_v9, %v5832_v53  ;;  %v6144_v18 = vmul.f32 %v5832_v53, %v5832_v53  ;;  %v7097_v15 = vpop.f32.mrb[29].mxu1 }
 0x399   : > { %v5835_v61 = vpop.f32.mrb[30].mxu1 }
 0x39a   : > { %v6184_v12 = vadd.f32 %v6183_v19, %v6144_v18  ;;  %v6967_v50 = vpack.c.bf16 %v5835_v61, %v5832_v53  ;;  %v6096_v57 = vadd.f32 %v6095_v33, %v5835_v61  ;;  %v6145_v21 = vmul.f32 %v5835_v61, %v5835_v61  ;;  %v7098_v34 = vpop.f32.mrb[31].mxu1 }
 0x39c   : > { %6991 = vst [vmem:[%s9885_s9 + $0x90] sm:$0xff] %v6967_v50   ;;  %v6185_v42 = vadd.f32 %v6184_v12, %v6145_v21 }
 0x3ab   : > { %v5840_v25 = vpop.f32.mrb[32].mxu1 }
 0x3ac   : > { %v6097_v60 = vadd.f32 %v6096_v57, %v5840_v25  ;;  %v6146_v51 = vmul.f32 %v5840_v25, %v5840_v25  ;;  %v7101_v41 = vpop.f32.mrb[33].mxu1 }
 0x3ad   : > { %v5843_v45 = vpop.f32.mrb[34].mxu1 }
 0x3ae   : > { %v6186_v11 = vadd.f32 %v6185_v42, %v6146_v51  ;;  %v6972_v63 = vpack.c.bf16 %v5843_v45, %v5840_v25  ;;  %v6098_v16 = vadd.f32 %v6097_v60, %v5843_v45  ;;  %v6147_v62 = vmul.f32 %v5843_v45, %v5843_v45  ;;  %v7102_v55 = vpop.f32.mrb[35].mxu1 }
 0x3b0   : > { %6992 = vst [vmem:[%s9885_s9 + $0x98] sm:$0xff] %v6972_v63   ;;  %v6187_v22 = vadd.f32 %v6186_v11, %v6147_v62 }
 0x3b4   : > { %v5848_v14 = vpop.f32.mrb[36].mxu1 }
 0x3b5   : > { %v6873_v46 = vpack.c.bf16 %v5848_v14, %v5848_v14  ;;  %v6100_v43 = vsel %vm6099_vm13, %v5848_v14, 0.0  ;;  %v6148_v59 = vmul.f32 %v5848_v14, %v5848_v14  ;;  %v7105_v38 = vpop.f32.mrb[37].mxu1 }
 0x3b6   : > { %v6101_v49 = vadd.f32 %v6100_v43, %v6098_v16  ;;  %v5851_v52 = vpop.f32.mrb[38].mxu1 }
 0x3b7   : > { %6059 = vst [vmem:[%s9885_s9 + $0xa0] sm:$0x3] %v6873_v46  ;;  %v6188_v5 = vsel %vm6099_vm13, %v6148_v59, 0.0  ;;  %v7106_v56 = vpop.f32.mrb[39].mxu1 }
 0x3b8   : > { %v6102_v26 = vrot.slane %v6101_v49, 4  ;;  %v6189_v31 = vadd.f32 %v6188_v5, %v6187_v22 }
 0x3ba   : > { %v6103_v1 = vadd.f32 %v6102_v26, %v6101_v49  ;;  %v6190_v37 = vrot.slane %v6189_v31, 4 }
 0x3bc   : > { %v6104_v47 = vrot.slane %v6103_v1, 2  ;;  %v6191_v40 = vadd.f32 %v6190_v37, %v6189_v31 }
 0x3be   : > { %v6105_v44 = vadd.f32 %v6104_v47, %v6103_v1  ;;  %v6192_v17 = vrot.slane %v6191_v40, 2 }
 0x3c0   : > { %v6106_v32 = vrot.slane %v6105_v44, 1  ;;  %v6193_v13 = vadd.f32 %v6192_v17, %v6191_v40 }
 0x3c2   : > { %v6194_v2 = vrot.slane %v6193_v13, 1  ;;  %v6107_v20 = vadd.f32 %v6106_v32, %v6105_v44 }
 0x3c4   : > { %v6195_v6 = vadd.f32 %v6194_v2, %v6193_v13 }
 0x3c6   : > { %v6198_v30 = vsel %vm6197_vm14, %v6107_v20, %v6195_v6 }
 0x3c7   : > { %v6199_v23 = vadd.f32 %v6198_v30, %v6196_v4 }
 0x3c9   : > { %6200 = vst [vmem:[%s10572_s6] sm:$0x3] %v6199_v23 }
 0x3ca   : > { %7413 = shalt.err (!%p7410_p5)
}
 0x3cb   : > { %s7414_s28 = scalar_lea.hbm %s10608_s18, 32  ;;  %s7418_s4 = scalar_lea.hbm %s10661_s3, 64 }
 0x3cc   : > { %p7415_p6 = scmp.ne.s32.totalorder %s10608_s18, %s7414_s28  ;;  %p7419_p10 = scmp.lt.u32.totalorder %s10608_s18, %s10661_s3 }
 0x3cd   : > { %p7420_p11 = scmp.lt.u32.totalorder %s7418_s4, %s7414_s28  ;;  %p7422_p13 = scmp.lt.u32.totalorder %s7414_s28, %s10608_s18 }
 0x3ce   : > { %p7416_p7 = pnand %p7415_p6, %p7552_p4 }
 0x3cf   : > { %p7421_p12 = por %p7420_p11, %p7419_p10 }
 0x3d0   : > { %p7417_p9 = pneg %p7416_p7 }
 0x3d1   : > { %p7423_p0 = por %p7422_p13, %p7421_p12 }
 0x3d3   : > { %p7424_p1 = pnand %p7423_p0, %p7417_p9 }
 0x3d5   : > { %7427 = shalt.err (!%p7424_p1)
}
 0x3d6   : > { %7115 = dma.vmem_to_hbm [thread:$0]  (%p7552_p4), %s10610_s8, 32, %s10608_s18, %s6211_s19  }
 0x3d7 PF: > { %p7121_p2 = scmp.ge.s32.totalorder %s7478_s17, 2  ;;  %s6252_s5 = sand.u32 1, %s7458_s12  }
 0x3d8   : > { %s6253_s6 = scalar_lea.sflag [#allocation3], %s6252_s5 }
 0x3d9   : > { %p7118_p3 = pnand %p7121_p2, %p7559_p8 }
 0x3db   : > { %7453 = dma.done.wait (!%p7118_p3), %s6253_s6, 32  }
 0x3dc   : > { %7455 = vsyncadd (!%p7118_p3), %s6253_s6, 4294967264  ;;  %s17_s17 = sadd.s32 1, %s7478_s17   ;;  %s10879_s12 = smov %s7462_s13 }
 0x3dd   : > { %p14_p5 = scmp.ge.s32.totalorder %s17_s17, 4   ;;  %s10880_s13 = smov %s7466_s14 }
 0x3de   : > { %s10881_s14 = smov %s7565_s25  ;;  %s10882_s15 = smov %s7474_s16 }
 0x3df   : > { %s10883_s16 = smov %s10885_s20  ;;  %16 = sbr.rel (!%p14_p5) target bundleno = 4 (0x4), region = 82 }
 0x3e6   :  { %6258 = vsyncpa [#allocation3], 1 }
 0x3e7   :  { %6260 = vsyncpa [#allocation3 + $0x1], 1 }

</bundles_post_ra>
